<compile_context>
chip_gen: v7x
topology: tpu7x:2x2x1
jax: 0.10.0
libtpu: 0.0.40
codegen_flags: <defaults>
</compile_context>

<pallas_src>
import numpy as np
import jax
import jax.numpy as jnp
from jax.experimental import pallas as pl
from jax.experimental.pallas import tpu as pltpu

INPUT_DIM = 6
MODEL_DIM = 64
NUM_HEADS = 8
NUM_LAYERS = 6
OUTPUT_DIM = 4
FF_DIM = 2048                       # nn.TransformerEncoderLayer default
HEAD_DIM = MODEL_DIM // NUM_HEADS   # 8
LN_EPS = 1e-5


def _layernorm(x, gamma, beta):
    mu = jnp.mean(x, axis=-1, keepdims=True)
    var = jnp.mean((x - mu) ** 2, axis=-1, keepdims=True)
    return (x - mu) * jax.lax.rsqrt(var + LN_EPS) * gamma + beta


# ---------------------------------------------------------------------------
# Single fused kernel: embedding + 6 encoder layers + mean/fc head.
# One grid step per encoder layer; activation carried in VMEM scratch.
# ---------------------------------------------------------------------------
def _fused_kernel(x_ref, emb_w_ref, emb_b_ref, fc_w_ref, fc_b_ref,
                  hmask_ref, bbias_ref, seg_ref, expand_ref, mean_ref,
                  wqkv_ref, bqkv_ref, wo_ref, bo_ref, g1_ref, be1_ref,
                  w1_ref, b1_ref, w2t_ref, b2_ref, g2_ref, be2_ref,
                  out_ref, h_ref):
    layer = pl.program_id(0)

    # ---- layer 0: embedding Linear, result parked in the VMEM scratch ------
    @pl.when(layer == 0)
    def _():
        h_ref[...] = (jnp.dot(x_ref[...], emb_w_ref[...],
                              preferred_element_type=jnp.float32)
                      + emb_b_ref[...])

    x = h_ref[...]                                      # (R, D) f32, R = B*S
    x_bf = x.astype(jnp.bfloat16)

    # ---- fused QKV projection (softmax scale folded into the Q block) ------
    qkv = (jnp.dot(x_bf, wqkv_ref[0], preferred_element_type=jnp.float32)
           + bqkv_ref[0])                               # (R, 3D) float32
    q = qkv[:, :MODEL_DIM]
    k = qkv[:, MODEL_DIM:2 * MODEL_DIM]
    v = qkv[:, 2 * MODEL_DIM:]

    # ---- all-heads / all-batch attention via block-masked matmuls ----------
    # hmask[h*R + j, h'*Dh + d] = (h == h'): replicate K/V over heads along
    # rows and zero the cross-head dims.  One big matmul then yields the
    # per-head scores packed along lanes: sc[i, h*R + j] = <q_h[i], k_h[j]>.
    hmask = hmask_ref[...]                              # (H*R, D) 0/1
    kb = jnp.concatenate([k] * NUM_HEADS, axis=0) * hmask   # (H*R, D)
    vb = jnp.concatenate([v] * NUM_HEADS, axis=0) * hmask   # (H*R, D)

    sc = jax.lax.dot_general(q, kb, (((1,), (1,)), ((), ())),
                             preferred_element_type=jnp.float32)  # (R, H*R)
    sc = sc + bbias_ref[...]                            # mask cross-batch keys
    sc = sc - jnp.max(sc, axis=-1, keepdims=True)       # row-global max (exact)
    e = jnp.exp(sc)                                     # masked entries -> 0

    # per-(row, head) softmax denominators via 0/1 segment matmuls
    sums = jnp.dot(e, seg_ref[...],
                   preferred_element_type=jnp.float32)           # (R, H)
    denom = jnp.dot(sums, expand_ref[...],
                    preferred_element_type=jnp.float32)          # (R, D)
    ctx = jnp.dot(e, vb, preferred_element_type=jnp.float32)     # (R, D)
    ctx = ctx * pl.reciprocal(jnp.maximum(denom, 1e-30), approx=True)

    attn = (jnp.dot(ctx, wo_ref[0].astype(jnp.float32),
                    preferred_element_type=jnp.float32) + bo_ref[0])

    # ---- post-norm residual #1 ---------------------------------------------
    h1 = _layernorm(x + attn, g1_ref[0], be1_ref[0])

    # ---- feed-forward (ReLU); W2 stored transposed => lane-dense 2048 ------
    ff = (jnp.dot(h1.astype(jnp.bfloat16), w1_ref[0],
                  preferred_element_type=jnp.float32) + b1_ref[0])   # (R, FF)
    ff = jnp.maximum(ff, 0.0)
    ff2 = (jax.lax.dot_general(ff.astype(jnp.bfloat16), w2t_ref[0],
                               dimension_numbers=(((1,), (1,)), ((), ())),
                               preferred_element_type=jnp.float32)
           + b2_ref[0])                                              # (R, D)

    # ---- post-norm residual #2; carry activation to the next grid step -----
    h2 = _layernorm(h1 + ff2, g2_ref[0], be2_ref[0])
    h_ref[...] = h2

    # ---- last layer: mean over sequence (matmul) + output Linear ------------
    @pl.when(layer == pl.num_programs(0) - 1)
    def _():
        m = jnp.dot(mean_ref[...], h2,
                    preferred_element_type=jnp.float32)              # (B, D)
        out_ref[...] = (jnp.dot(m, fc_w_ref[...],
                                preferred_element_type=jnp.float32)
                        + fc_b_ref[...])


# ---------------------------------------------------------------------------
# Static 0/1 helper matrices (masks / segment sums / sequence mean).
# ---------------------------------------------------------------------------
def _make_constants(batch, seq):
    rows = batch * seq
    hr = NUM_HEADS * rows

    hmask = np.zeros((hr, MODEL_DIM), np.float32)
    seg = np.zeros((hr, NUM_HEADS), np.float32)
    for h in range(NUM_HEADS):
        hmask[h * rows:(h + 1) * rows,
              h * HEAD_DIM:(h + 1) * HEAD_DIM] = 1.0
        seg[h * rows:(h + 1) * rows, h] = 1.0

    same_batch = (np.arange(rows)[:, None] // seq) == (np.arange(rows)[None, :] // seq)
    bb = np.where(same_batch, 0.0, -1e9).astype(np.float32)      # (rows, rows)
    bbias = np.tile(bb, (1, NUM_HEADS))                          # (rows, H*rows)

    expand = np.zeros((NUM_HEADS, MODEL_DIM), np.float32)
    for h in range(NUM_HEADS):
        expand[h, h * HEAD_DIM:(h + 1) * HEAD_DIM] = 1.0

    mean_mat = np.zeros((batch, rows), np.float32)
    for b in range(batch):
        mean_mat[b, b * seq:(b + 1) * seq] = 1.0 / seq

    return (jnp.asarray(hmask), jnp.asarray(bbias), jnp.asarray(seg),
            jnp.asarray(expand), jnp.asarray(mean_mat))


# ---------------------------------------------------------------------------
# Wrapper: one pallas_call for the whole model.
# ---------------------------------------------------------------------------
def transformer_forward(x, params):
    (emb_w, emb_b, fc_w, fc_b,
     wqkv, bqkv, wo, bo, g1, be1, w1, b1, w2t, b2, g2, be2) = params
    B, S, _ = x.shape
    rows = B * S
    x2d = x.reshape(rows, INPUT_DIM)
    hmask, bbias, seg, expand, mean_mat = _make_constants(B, S)

    rep2 = lambda l: (0, 0)          # resident (layer-invariant) 2-D inputs
    lyr3 = lambda l: (l, 0, 0)       # per-layer stacked weights

    in_specs = [
        pl.BlockSpec((rows, INPUT_DIM), rep2),              # x
        pl.BlockSpec((INPUT_DIM, MODEL_DIM), rep2),         # emb_w
        pl.BlockSpec((1, MODEL_DIM), rep2),                 # emb_b
        pl.BlockSpec((MODEL_DIM, OUTPUT_DIM), rep2),        # fc_w
        pl.BlockSpec((1, OUTPUT_DIM), rep2),                # fc_b
        pl.BlockSpec((NUM_HEADS * rows, MODEL_DIM), rep2),  # head mask
        pl.BlockSpec((rows, NUM_HEADS * rows), rep2),       # batch bias
        pl.BlockSpec((NUM_HEADS * rows, NUM_HEADS), rep2),  # segment sum
        pl.BlockSpec((NUM_HEADS, MODEL_DIM), rep2),         # segment expand
        pl.BlockSpec((B, rows), rep2),                      # sequence mean
        pl.BlockSpec((1, MODEL_DIM, 3 * MODEL_DIM), lyr3),  # wqkv (bf16)
        pl.BlockSpec((1, 1, 3 * MODEL_DIM), lyr3),          # bqkv
        pl.BlockSpec((1, MODEL_DIM, MODEL_DIM), lyr3),      # wo   (bf16)
        pl.BlockSpec((1, 1, MODEL_DIM), lyr3),              # bo
        pl.BlockSpec((1, 1, MODEL_DIM), lyr3),              # ln1 gamma
        pl.BlockSpec((1, 1, MODEL_DIM), lyr3),              # ln1 beta
        pl.BlockSpec((1, MODEL_DIM, FF_DIM), lyr3),         # w1   (bf16)
        pl.BlockSpec((1, 1, FF_DIM), lyr3),                 # b1
        pl.BlockSpec((1, MODEL_DIM, FF_DIM), lyr3),         # w2^T (bf16)
        pl.BlockSpec((1, 1, MODEL_DIM), lyr3),              # b2
        pl.BlockSpec((1, 1, MODEL_DIM), lyr3),              # ln2 gamma
        pl.BlockSpec((1, 1, MODEL_DIM), lyr3),              # ln2 beta
    ]

    return pl.pallas_call(
        _fused_kernel,
        out_shape=jax.ShapeDtypeStruct((B, OUTPUT_DIM), jnp.float32),
        grid=(NUM_LAYERS,),
        in_specs=in_specs,
        out_specs=pl.BlockSpec((B, OUTPUT_DIM), rep2),
        scratch_shapes=[pltpu.VMEM((rows, MODEL_DIM), jnp.float32)],
        compiler_params=pltpu.CompilerParams(
            dimension_semantics=("arbitrary",)),
    )(x2d, emb_w, emb_b, fc_w, fc_b,
      hmask, bbias, seg, expand, mean_mat,
      wqkv, bqkv, wo, bo, g1, be1, w1, b1, w2t, b2, g2, be2)


# ---------------------------------------------------------------------------
# Deterministic synthetic parameters (shapes match the PyTorch module).
# Weights are stacked per layer; the big ones are kept in bfloat16.
# ---------------------------------------------------------------------------
def init_params(key):
    keys = iter(jax.random.split(key, 256))

    def nrm(shape, s=0.05):
        return s * jax.random.normal(next(keys), shape, jnp.float32)

    emb_w = nrm((INPUT_DIM, MODEL_DIM))
    emb_b = nrm((1, MODEL_DIM), 0.01)
    fc_w = nrm((MODEL_DIM, OUTPUT_DIM))
    fc_b = nrm((1, OUTPUT_DIM), 0.01)

    scale = 1.0 / (HEAD_DIM ** 0.5)
    names = ("wqkv", "bqkv", "wo", "bo", "g1", "be1",
             "w1", "b1", "w2t", "b2", "g2", "be2")
    stacks = {n: [] for n in names}
    for _ in range(NUM_LAYERS):
        wq, bq = nrm((MODEL_DIM, MODEL_DIM)), nrm((1, MODEL_DIM), 0.01)
        wk, bk = nrm((MODEL_DIM, MODEL_DIM)), nrm((1, MODEL_DIM), 0.01)
        wv, bv = nrm((MODEL_DIM, MODEL_DIM)), nrm((1, MODEL_DIM), 0.01)
        # fuse QKV; fold the 1/sqrt(head_dim) attention scale into Q.
        stacks["wqkv"].append(jnp.concatenate([wq * scale, wk, wv], axis=1))
        stacks["bqkv"].append(jnp.concatenate([bq * scale, bk, bv], axis=1))
        stacks["wo"].append(nrm((MODEL_DIM, MODEL_DIM)))
        stacks["bo"].append(nrm((1, MODEL_DIM), 0.01))
        stacks["g1"].append(jnp.ones((1, MODEL_DIM), jnp.float32))
        stacks["be1"].append(jnp.zeros((1, MODEL_DIM), jnp.float32))
        stacks["w1"].append(nrm((MODEL_DIM, FF_DIM)))
        stacks["b1"].append(nrm((1, FF_DIM), 0.01))
        stacks["w2t"].append(nrm((FF_DIM, MODEL_DIM)).T)   # stored (D, FF)
        stacks["b2"].append(nrm((1, MODEL_DIM), 0.01))
        stacks["g2"].append(jnp.ones((1, MODEL_DIM), jnp.float32))
        stacks["be2"].append(jnp.zeros((1, MODEL_DIM), jnp.float32))

    def stk(name, dtype=jnp.float32):
        return jnp.stack(stacks[name]).astype(dtype)

    return (emb_w, emb_b, fc_w, fc_b,
            stk("wqkv", jnp.bfloat16), stk("bqkv"),
            stk("wo", jnp.bfloat16), stk("bo"),
            stk("g1"), stk("be1"),
            stk("w1", jnp.bfloat16), stk("b1"),
            stk("w2t", jnp.bfloat16), stk("b2"),
            stk("g2"), stk("be2"))


# ---------------------------------------------------------------------------
# Plain-JAX reference (f32 math on the same, bf16-rounded, weights).
# ---------------------------------------------------------------------------
def reference_forward(x, params):
    (emb_w, emb_b, fc_w, fc_b,
     wqkv, bqkv, wo, bo, g1, be1, w1, b1, w2t, b2, g2, be2) = params
    h = x @ emb_w + emb_b
    B, S, D = h.shape
    for l in range(NUM_LAYERS):
        qkv = h @ wqkv[l].astype(jnp.float32) + bqkv[l]
        q, k, v = qkv[..., :D], qkv[..., D:2 * D], qkv[..., 2 * D:]
        qh = q.reshape(B, S, NUM_HEADS, HEAD_DIM).transpose(0, 2, 1, 3)
        kh = k.reshape(B, S, NUM_HEADS, HEAD_DIM).transpose(0, 2, 1, 3)
        vh = v.reshape(B, S, NUM_HEADS, HEAD_DIM).transpose(0, 2, 1, 3)
        s = jnp.einsum('bhqd,bhkd->bhqk', qh, kh)        # scale already folded
        p = jax.nn.softmax(s, axis=-1)
        ctx = jnp.einsum('bhqk,bhkd->bhqd', p, vh)
        ctx = ctx.transpose(0, 2, 1, 3).reshape(B, S, D)
        attn = ctx @ wo[l].astype(jnp.float32) + bo[l]
        h1 = _layernorm(h + attn, g1[l], be1[l])
        ff = jnp.maximum(h1 @ w1[l].astype(jnp.float32) + b1[l], 0.0)
        ff2 = ff @ w2t[l].astype(jnp.float32).T + b2[l]
        h = _layernorm(h1 + ff2, g2[l], be2[l])
    return h.mean(axis=1) @ fc_w + fc_b


# ---------------------------------------------------------------------------
if __name__ == "__main__":
    key = jax.random.PRNGKey(0)
    pkey, xkey = jax.random.split(key)
    params = init_params(pkey)

    B, S = 2, 8
    x = jax.random.normal(xkey, (B, S, INPUT_DIM), jnp.float32)

    out = jax.block_until_ready(transformer_forward(x, params))
    assert out.shape == (B, OUTPUT_DIM)

    ref = reference_forward(x, params)
    if not jnp.allclose(out, ref, atol=2e-2, rtol=2e-2):
        raise AssertionError(
            f"mismatch vs reference, max abs diff = "
            f"{float(jnp.max(jnp.abs(out - ref)))}")

    print("KERNEL_OK")
</pallas_src>

<mosaic_0001>
module attributes {stable_mosaic.version = 11 : i64} {
  func.func @_fused_kernel(%arg0: i32, %arg1: memref<16x6xf32, #tpu.memory_space<vmem>>, %arg2: memref<6x64xf32, #tpu.memory_space<vmem>>, %arg3: memref<1x64xf32, #tpu.memory_space<vmem>>, %arg4: memref<64x4xf32, #tpu.memory_space<vmem>>, %arg5: memref<1x4xf32, #tpu.memory_space<vmem>>, %arg6: memref<128x64xf32, #tpu.memory_space<vmem>>, %arg7: memref<16x128xf32, #tpu.memory_space<vmem>>, %arg8: memref<128x8xf32, #tpu.memory_space<vmem>>, %arg9: memref<8x64xf32, #tpu.memory_space<vmem>>, %arg10: memref<2x16xf32, #tpu.memory_space<vmem>>, %arg11: memref<1x64x192xbf16, #tpu.memory_space<vmem>>, %arg12: memref<1x1x192xf32, #tpu.memory_space<vmem>>, %arg13: memref<1x64x64xbf16, #tpu.memory_space<vmem>>, %arg14: memref<1x1x64xf32, #tpu.memory_space<vmem>>, %arg15: memref<1x1x64xf32, #tpu.memory_space<vmem>>, %arg16: memref<1x1x64xf32, #tpu.memory_space<vmem>>, %arg17: memref<1x64x2048xbf16, #tpu.memory_space<vmem>>, %arg18: memref<1x1x2048xf32, #tpu.memory_space<vmem>>, %arg19: memref<1x64x2048xbf16, #tpu.memory_space<vmem>>, %arg20: memref<1x1x64xf32, #tpu.memory_space<vmem>>, %arg21: memref<1x1x64xf32, #tpu.memory_space<vmem>>, %arg22: memref<1x1x64xf32, #tpu.memory_space<vmem>>, %arg23: memref<2x4xf32, #tpu.memory_space<vmem>>, %arg24: memref<16x64xf32, #tpu.memory_space<vmem>>) attributes {dimension_semantics = [#tpu.dimension_semantics<arbitrary>], iteration_bounds = array<i64: 6>, scalar_prefetch = 0 : i64, scratch_operands = 1 : i64, tpu.core_type = #tpu.core_type<tc>, window_params = [{pipeline_mode = #tpu.pipeline_mode<synchronous>, transform_indices = @transform_0, window_bounds = array<i64: 16, 6>}, {pipeline_mode = #tpu.pipeline_mode<synchronous>, transform_indices = @transform_1, window_bounds = array<i64: 6, 64>}, {pipeline_mode = #tpu.pipeline_mode<synchronous>, transform_indices = @transform_2, window_bounds = array<i64: 1, 64>}, {pipeline_mode = #tpu.pipeline_mode<synchronous>, transform_indices = @transform_3, window_bounds = array<i64: 64, 4>}, {pipeline_mode = #tpu.pipeline_mode<synchronous>, transform_indices = @transform_4, window_bounds = array<i64: 1, 4>}, {pipeline_mode = #tpu.pipeline_mode<synchronous>, transform_indices = @transform_5, window_bounds = array<i64: 128, 64>}, {pipeline_mode = #tpu.pipeline_mode<synchronous>, transform_indices = @transform_6, window_bounds = array<i64: 16, 128>}, {pipeline_mode = #tpu.pipeline_mode<synchronous>, transform_indices = @transform_7, window_bounds = array<i64: 128, 8>}, {pipeline_mode = #tpu.pipeline_mode<synchronous>, transform_indices = @transform_8, window_bounds = array<i64: 8, 64>}, {pipeline_mode = #tpu.pipeline_mode<synchronous>, transform_indices = @transform_9, window_bounds = array<i64: 2, 16>}, {transform_indices = @transform_10, window_bounds = array<i64: 1, 64, 192>}, {transform_indices = @transform_11, window_bounds = array<i64: 1, 1, 192>}, {transform_indices = @transform_12, window_bounds = array<i64: 1, 64, 64>}, {transform_indices = @transform_13, window_bounds = array<i64: 1, 1, 64>}, {transform_indices = @transform_14, window_bounds = array<i64: 1, 1, 64>}, {transform_indices = @transform_15, window_bounds = array<i64: 1, 1, 64>}, {transform_indices = @transform_16, window_bounds = array<i64: 1, 64, 2048>}, {transform_indices = @transform_17, window_bounds = array<i64: 1, 1, 2048>}, {transform_indices = @transform_18, window_bounds = array<i64: 1, 64, 2048>}, {transform_indices = @transform_19, window_bounds = array<i64: 1, 1, 64>}, {transform_indices = @transform_20, window_bounds = array<i64: 1, 1, 64>}, {transform_indices = @transform_21, window_bounds = array<i64: 1, 1, 64>}, {pipeline_mode = #tpu.pipeline_mode<synchronous>, transform_indices = @transform_22, window_bounds = array<i64: 2, 4>}]} {
    %c0_i32 = arith.constant 0 : i32
    %0 = arith.cmpi eq, %arg0, %c0_i32 : i32
    %1 = arith.extui %0 : i1 to i32
    %c0_i32_0 = arith.constant 0 : i32
    %2 = arith.cmpi ne, %1, %c0_i32_0 : i32
    scf.if %2 {
      %c0_69 = arith.constant 0 : index
      %c0_70 = arith.constant 0 : index
      %121 = vector.load %arg1[%c0_69, %c0_70] : memref<16x6xf32, #tpu.memory_space<vmem>>, vector<16x6xf32>
      %c0_71 = arith.constant 0 : index
      %c0_72 = arith.constant 0 : index
      %122 = vector.load %arg2[%c0_71, %c0_72] : memref<6x64xf32, #tpu.memory_space<vmem>>, vector<6x64xf32>
      %cst_73 = arith.constant dense<0.000000e+00> : vector<16x64xf32>
      %123 = tpu.matmul %121, %122, %cst_73 {dimension_numbers = #tpu.dot_dimension_numbers<[1], [0], [0], [1], [0, 0, 1, 1], [], []>} : vector<16x6xf32>, vector<6x64xf32>, vector<16x64xf32> -> vector<16x64xf32>
      %c0_74 = arith.constant 0 : index
      %c0_75 = arith.constant 0 : index
      %124 = vector.load %arg3[%c0_74, %c0_75] : memref<1x64xf32, #tpu.memory_space<vmem>>, vector<1x64xf32>
      %125 = vector.broadcast %124 : vector<1x64xf32> to vector<16x64xf32>
      %126 = arith.addf %123, %125 : vector<16x64xf32>
      %c0_76 = arith.constant 0 : index
      %c0_77 = arith.constant 0 : index
      %127 = vector.load %arg24[%c0_76, %c0_77] : memref<16x64xf32, #tpu.memory_space<vmem>>, vector<16x64xf32>
      tpu.vector_store %arg24[%c0_76, %c0_77], %126 {strides = array<i32>} : memref<16x64xf32, #tpu.memory_space<vmem>>, vector<16x64xf32>,
    } else {
    }
    %c0 = arith.constant 0 : index
    %c0_1 = arith.constant 0 : index
    %3 = vector.load %arg24[%c0, %c0_1] : memref<16x64xf32, #tpu.memory_space<vmem>>, vector<16x64xf32>
    %4 = arith.truncf %3 : vector<16x64xf32> to vector<16x64xbf16>
    %c0_2 = arith.constant 0 : index
    %c0_3 = arith.constant 0 : index
    %c0_4 = arith.constant 0 : index
    %5 = vector.load %arg11[%c0_2, %c0_3, %c0_4] : memref<1x64x192xbf16, #tpu.memory_space<vmem>>, vector<1x64x192xbf16>
    %6 = vector.shape_cast %5 : vector<1x64x192xbf16> to vector<64x192xbf16>
    %cst = arith.constant dense<0.000000e+00> : vector<16x192xf32>
    %7 = tpu.matmul %4, %6, %cst {dimension_numbers = #tpu.dot_dimension_numbers<[1], [0], [0], [1], [0, 0, 1, 1], [], []>} : vector<16x64xbf16>, vector<64x192xbf16>, vector<16x192xf32> -> vector<16x192xf32>
    %c0_5 = arith.constant 0 : index
    %c0_6 = arith.constant 0 : index
    %c0_7 = arith.constant 0 : index
    %8 = vector.load %arg12[%c0_5, %c0_6, %c0_7] : memref<1x1x192xf32, #tpu.memory_space<vmem>>, vector<1x1x192xf32>
    %9 = vector.shape_cast %8 : vector<1x1x192xf32> to vector<1x192xf32>
    %10 = vector.broadcast %9 : vector<1x192xf32> to vector<16x192xf32>
    %11 = arith.addf %7, %10 : vector<16x192xf32>
    %12 = vector.extract_strided_slice %11 {offsets = [0, 0], sizes = [16, 64], strides = [1, 1]} : vector<16x192xf32> to vector<16x64xf32>
    %13 = vector.extract_strided_slice %11 {offsets = [0, 64], sizes = [16, 64], strides = [1, 1]} : vector<16x192xf32> to vector<16x64xf32>
    %14 = vector.extract_strided_slice %11 {offsets = [0, 128], sizes = [16, 64], strides = [1, 1]} : vector<16x192xf32> to vector<16x64xf32>
    %c0_8 = arith.constant 0 : index
    %c0_9 = arith.constant 0 : index
    %15 = vector.load %arg6[%c0_8, %c0_9] : memref<128x64xf32, #tpu.memory_space<vmem>>, vector<128x64xf32>
    %16 = tpu.concatenate %13, %13, %13, %13, %13, %13, %13, %13 in 0 : vector<16x64xf32>, vector<16x64xf32>, vector<16x64xf32>, vector<16x64xf32>, vector<16x64xf32>, vector<16x64xf32>, vector<16x64xf32>, vector<16x64xf32> -> vector<128x64xf32>
    %17 = arith.mulf %16, %15 : vector<128x64xf32>
    %18 = tpu.concatenate %14, %14, %14, %14, %14, %14, %14, %14 in 0 : vector<16x64xf32>, vector<16x64xf32>, vector<16x64xf32>, vector<16x64xf32>, vector<16x64xf32>, vector<16x64xf32>, vector<16x64xf32>, vector<16x64xf32> -> vector<128x64xf32>
    %19 = arith.mulf %18, %15 : vector<128x64xf32>
    %cst_10 = arith.constant dense<0.000000e+00> : vector<16x128xf32>
    %20 = tpu.matmul %12, %17, %cst_10 {dimension_numbers = #tpu.dot_dimension_numbers<[1], [1], [0], [0], [0, 0, 1, 0], [], []>} : vector<16x64xf32>, vector<128x64xf32>, vector<16x128xf32> -> vector<16x128xf32>
    %c0_11 = arith.constant 0 : index
    %c0_12 = arith.constant 0 : index
    %21 = vector.load %arg7[%c0_11, %c0_12] : memref<16x128xf32, #tpu.memory_space<vmem>>, vector<16x128xf32>
    %22 = arith.addf %20, %21 : vector<16x128xf32>
    %cst_13 = arith.constant dense<0xFF800000> : vector<16xf32>
    %23 = vector.multi_reduction <maximumf>, %22, %cst_13 [1] : vector<16x128xf32> to vector<16xf32>
    %24 = vector.shape_cast %23 : vector<16xf32> to vector<16x1xf32>
    %25 = vector.broadcast %24 : vector<16x1xf32> to vector<16x128xf32>
    %26 = arith.subf %22, %25 : vector<16x128xf32>
    %27 = math.exp %26 : vector<16x128xf32>
    %c0_14 = arith.constant 0 : index
    %c0_15 = arith.constant 0 : index
    %28 = vector.load %arg8[%c0_14, %c0_15] : memref<128x8xf32, #tpu.memory_space<vmem>>, vector<128x8xf32>
    %cst_16 = arith.constant dense<0.000000e+00> : vector<16x8xf32>
    %29 = tpu.matmul %27, %28, %cst_16 {dimension_numbers = #tpu.dot_dimension_numbers<[1], [0], [0], [1], [0, 0, 1, 1], [], []>} : vector<16x128xf32>, vector<128x8xf32>, vector<16x8xf32> -> vector<16x8xf32>
    %c0_17 = arith.constant 0 : index
    %c0_18 = arith.constant 0 : index
    %30 = vector.load %arg9[%c0_17, %c0_18] : memref<8x64xf32, #tpu.memory_space<vmem>>, vector<8x64xf32>
    %cst_19 = arith.constant dense<0.000000e+00> : vector<16x64xf32>
    %31 = tpu.matmul %29, %30, %cst_19 {dimension_numbers = #tpu.dot_dimension_numbers<[1], [0], [0], [1], [0, 0, 1, 1], [], []>} : vector<16x8xf32>, vector<8x64xf32>, vector<16x64xf32> -> vector<16x64xf32>
    %cst_20 = arith.constant dense<0.000000e+00> : vector<16x64xf32>
    %32 = tpu.matmul %27, %19, %cst_20 {dimension_numbers = #tpu.dot_dimension_numbers<[1], [0], [0], [1], [0, 0, 1, 1], [], []>} : vector<16x128xf32>, vector<128x64xf32>, vector<16x64xf32> -> vector<16x64xf32>
    %cst_21 = arith.constant 1.000000e-30 : f32
    %33 = vector.broadcast %cst_21 : f32 to vector<16x64xf32>
    %34 = arith.maximumf %31, %33 : vector<16x64xf32>
    %35 = tpu.reciprocal %34 {approx = true} : vector<16x64xf32> -> vector<16x64xf32>
    %36 = arith.mulf %32, %35 : vector<16x64xf32>
    %c0_22 = arith.constant 0 : index
    %c0_23 = arith.constant 0 : index
    %c0_24 = arith.constant 0 : index
    %37 = vector.load %arg13[%c0_22, %c0_23, %c0_24] : memref<1x64x64xbf16, #tpu.memory_space<vmem>>, vector<1x64x64xbf16>
    %38 = vector.shape_cast %37 : vector<1x64x64xbf16> to vector<64x64xbf16>
    %39 = arith.extf %38 : vector<64x64xbf16> to vector<64x64xf32>
    %cst_25 = arith.constant dense<0.000000e+00> : vector<16x64xf32>
    %40 = tpu.matmul %36, %39, %cst_25 {dimension_numbers = #tpu.dot_dimension_numbers<[1], [0], [0], [1], [0, 0, 1, 1], [], []>} : vector<16x64xf32>, vector<64x64xf32>, vector<16x64xf32> -> vector<16x64xf32>
    %c0_26 = arith.constant 0 : index
    %c0_27 = arith.constant 0 : index
    %c0_28 = arith.constant 0 : index
    %41 = vector.load %arg14[%c0_26, %c0_27, %c0_28] : memref<1x1x64xf32, #tpu.memory_space<vmem>>, vector<1x1x64xf32>
    %42 = vector.shape_cast %41 : vector<1x1x64xf32> to vector<1x64xf32>
    %43 = vector.broadcast %42 : vector<1x64xf32> to vector<16x64xf32>
    %44 = arith.addf %40, %43 : vector<16x64xf32>
    %45 = arith.addf %3, %44 : vector<16x64xf32>
    %c0_29 = arith.constant 0 : index
    %c0_30 = arith.constant 0 : index
    %c0_31 = arith.constant 0 : index
    %46 = vector.load %arg15[%c0_29, %c0_30, %c0_31] : memref<1x1x64xf32, #tpu.memory_space<vmem>>, vector<1x1x64xf32>
    %47 = vector.shape_cast %46 : vector<1x1x64xf32> to vector<1x64xf32>
    %c0_32 = arith.constant 0 : index
    %c0_33 = arith.constant 0 : index
    %c0_34 = arith.constant 0 : index
    %48 = vector.load %arg16[%c0_32, %c0_33, %c0_34] : memref<1x1x64xf32, #tpu.memory_space<vmem>>, vector<1x1x64xf32>
    %49 = vector.shape_cast %48 : vector<1x1x64xf32> to vector<1x64xf32>
    %cst_35 = arith.constant dense<0.000000e+00> : vector<16xf32>
    %50 = vector.multi_reduction <add>, %45, %cst_35 [1] : vector<16x64xf32> to vector<16xf32>
    %51 = vector.shape_cast %50 : vector<16xf32> to vector<16x1xf32>
    %cst_36 = arith.constant 6.400000e+01 : f32
    %52 = vector.broadcast %cst_36 : f32 to vector<16x1xf32>
    %53 = arith.divf %51, %52 : vector<16x1xf32>
    %54 = vector.broadcast %53 : vector<16x1xf32> to vector<16x64xf32>
    %55 = arith.subf %45, %54 : vector<16x64xf32>
    %56 = arith.mulf %55, %55 : vector<16x64xf32>
    %cst_37 = arith.constant dense<0.000000e+00> : vector<16xf32>
    %57 = vector.multi_reduction <add>, %56, %cst_37 [1] : vector<16x64xf32> to vector<16xf32>
    %58 = vector.shape_cast %57 : vector<16xf32> to vector<16x1xf32>
    %cst_38 = arith.constant 6.400000e+01 : f32
    %59 = vector.broadcast %cst_38 : f32 to vector<16x1xf32>
    %60 = arith.divf %58, %59 : vector<16x1xf32>
    %61 = vector.broadcast %53 : vector<16x1xf32> to vector<16x64xf32>
    %62 = arith.subf %45, %61 : vector<16x64xf32>
    %cst_39 = arith.constant 9.99999974E-6 : f32
    %63 = vector.broadcast %cst_39 : f32 to vector<16x1xf32>
    %64 = arith.addf %60, %63 : vector<16x1xf32>
    %65 = math.rsqrt %64 : vector<16x1xf32>
    %66 = vector.broadcast %65 : vector<16x1xf32> to vector<16x64xf32>
    %67 = arith.mulf %62, %66 : vector<16x64xf32>
    %68 = vector.broadcast %47 : vector<1x64xf32> to vector<16x64xf32>
    %69 = arith.mulf %67, %68 : vector<16x64xf32>
    %70 = vector.broadcast %49 : vector<1x64xf32> to vector<16x64xf32>
    %71 = arith.addf %69, %70 : vector<16x64xf32>
    %72 = arith.truncf %71 : vector<16x64xf32> to vector<16x64xbf16>
    %c0_40 = arith.constant 0 : index
    %c0_41 = arith.constant 0 : index
    %c0_42 = arith.constant 0 : index
    %73 = vector.load %arg17[%c0_40, %c0_41, %c0_42] : memref<1x64x2048xbf16, #tpu.memory_space<vmem>>, vector<1x64x2048xbf16>
    %74 = vector.shape_cast %73 : vector<1x64x2048xbf16> to vector<64x2048xbf16>
    %cst_43 = arith.constant dense<0.000000e+00> : vector<16x2048xf32>
    %75 = tpu.matmul %72, %74, %cst_43 {dimension_numbers = #tpu.dot_dimension_numbers<[1], [0], [0], [1], [0, 0, 1, 1], [], []>} : vector<16x64xbf16>, vector<64x2048xbf16>, vector<16x2048xf32> -> vector<16x2048xf32>
    %c0_44 = arith.constant 0 : index
    %c0_45 = arith.constant 0 : index
    %c0_46 = arith.constant 0 : index
    %76 = vector.load %arg18[%c0_44, %c0_45, %c0_46] : memref<1x1x2048xf32, #tpu.memory_space<vmem>>, vector<1x1x2048xf32>
    %77 = vector.shape_cast %76 : vector<1x1x2048xf32> to vector<1x2048xf32>
    %78 = vector.broadcast %77 : vector<1x2048xf32> to vector<16x2048xf32>
    %79 = arith.addf %75, %78 : vector<16x2048xf32>
    %cst_47 = arith.constant 0.000000e+00 : f32
    %80 = vector.broadcast %cst_47 : f32 to vector<16x2048xf32>
    %81 = arith.maximumf %79, %80 : vector<16x2048xf32>
    %82 = arith.truncf %81 : vector<16x2048xf32> to vector<16x2048xbf16>
    %c0_48 = arith.constant 0 : index
    %c0_49 = arith.constant 0 : index
    %c0_50 = arith.constant 0 : index
    %83 = vector.load %arg19[%c0_48, %c0_49, %c0_50] : memref<1x64x2048xbf16, #tpu.memory_space<vmem>>, vector<1x64x2048xbf16>
    %84 = vector.shape_cast %83 : vector<1x64x2048xbf16> to vector<64x2048xbf16>
    %cst_51 = arith.constant dense<0.000000e+00> : vector<16x64xf32>
    %85 = tpu.matmul %82, %84, %cst_51 {dimension_numbers = #tpu.dot_dimension_numbers<[1], [1], [0], [0], [0, 0, 1, 0], [], []>} : vector<16x2048xbf16>, vector<64x2048xbf16>, vector<16x64xf32> -> vector<16x64xf32>
    %c0_52 = arith.constant 0 : index
    %c0_53 = arith.constant 0 : index
    %c0_54 = arith.constant 0 : index
    %86 = vector.load %arg20[%c0_52, %c0_53, %c0_54] : memref<1x1x64xf32, #tpu.memory_space<vmem>>, vector<1x1x64xf32>
    %87 = vector.shape_cast %86 : vector<1x1x64xf32> to vector<1x64xf32>
    %88 = vector.broadcast %87 : vector<1x64xf32> to vector<16x64xf32>
    %89 = arith.addf %85, %88 : vector<16x64xf32>
    %90 = arith.addf %71, %89 : vector<16x64xf32>
    %c0_55 = arith.constant 0 : index
    %c0_56 = arith.constant 0 : index
    %c0_57 = arith.constant 0 : index
    %91 = vector.load %arg21[%c0_55, %c0_56, %c0_57] : memref<1x1x64xf32, #tpu.memory_space<vmem>>, vector<1x1x64xf32>
    %92 = vector.shape_cast %91 : vector<1x1x64xf32> to vector<1x64xf32>
    %c0_58 = arith.constant 0 : index
    %c0_59 = arith.constant 0 : index
    %c0_60 = arith.constant 0 : index
    %93 = vector.load %arg22[%c0_58, %c0_59, %c0_60] : memref<1x1x64xf32, #tpu.memory_space<vmem>>, vector<1x1x64xf32>
    %94 = vector.shape_cast %93 : vector<1x1x64xf32> to vector<1x64xf32>
    %cst_61 = arith.constant dense<0.000000e+00> : vector<16xf32>
    %95 = vector.multi_reduction <add>, %90, %cst_61 [1] : vector<16x64xf32> to vector<16xf32>
    %96 = vector.shape_cast %95 : vector<16xf32> to vector<16x1xf32>
    %cst_62 = arith.constant 6.400000e+01 : f32
    %97 = vector.broadcast %cst_62 : f32 to vector<16x1xf32>
    %98 = arith.divf %96, %97 : vector<16x1xf32>
    %99 = vector.broadcast %98 : vector<16x1xf32> to vector<16x64xf32>
    %100 = arith.subf %90, %99 : vector<16x64xf32>
    %101 = arith.mulf %100, %100 : vector<16x64xf32>
    %cst_63 = arith.constant dense<0.000000e+00> : vector<16xf32>
    %102 = vector.multi_reduction <add>, %101, %cst_63 [1] : vector<16x64xf32> to vector<16xf32>
    %103 = vector.shape_cast %102 : vector<16xf32> to vector<16x1xf32>
    %cst_64 = arith.constant 6.400000e+01 : f32
    %104 = vector.broadcast %cst_64 : f32 to vector<16x1xf32>
    %105 = arith.divf %103, %104 : vector<16x1xf32>
    %106 = vector.broadcast %98 : vector<16x1xf32> to vector<16x64xf32>
    %107 = arith.subf %90, %106 : vector<16x64xf32>
    %cst_65 = arith.constant 9.99999974E-6 : f32
    %108 = vector.broadcast %cst_65 : f32 to vector<16x1xf32>
    %109 = arith.addf %105, %108 : vector<16x1xf32>
    %110 = math.rsqrt %109 : vector<16x1xf32>
    %111 = vector.broadcast %110 : vector<16x1xf32> to vector<16x64xf32>
    %112 = arith.mulf %107, %111 : vector<16x64xf32>
    %113 = vector.broadcast %92 : vector<1x64xf32> to vector<16x64xf32>
    %114 = arith.mulf %112, %113 : vector<16x64xf32>
    %115 = vector.broadcast %94 : vector<1x64xf32> to vector<16x64xf32>
    %116 = arith.addf %114, %115 : vector<16x64xf32>
    %c0_66 = arith.constant 0 : index
    %c0_67 = arith.constant 0 : index
    %117 = vector.load %arg24[%c0_66, %c0_67] : memref<16x64xf32, #tpu.memory_space<vmem>>, vector<16x64xf32>
    tpu.vector_store %arg24[%c0_66, %c0_67], %116 {strides = array<i32>} : memref<16x64xf32, #tpu.memory_space<vmem>>, vector<16x64xf32>,
    %c5_i32 = arith.constant 5 : i32
    %118 = arith.cmpi eq, %arg0, %c5_i32 : i32
    %119 = arith.extui %118 : i1 to i32
    %c0_i32_68 = arith.constant 0 : i32
    %120 = arith.cmpi ne, %119, %c0_i32_68 : i32
    scf.if %120 {
      %c0_69 = arith.constant 0 : index
      %c0_70 = arith.constant 0 : index
      %121 = vector.load %arg10[%c0_69, %c0_70] : memref<2x16xf32, #tpu.memory_space<vmem>>, vector<2x16xf32>
      %cst_71 = arith.constant dense<0.000000e+00> : vector<2x64xf32>
      %122 = tpu.matmul %121, %116, %cst_71 {dimension_numbers = #tpu.dot_dimension_numbers<[1], [0], [0], [1], [0, 0, 1, 1], [], []>} : vector<2x16xf32>, vector<16x64xf32>, vector<2x64xf32> -> vector<2x64xf32>
      %c0_72 = arith.constant 0 : index
      %c0_73 = arith.constant 0 : index
      %123 = vector.load %arg4[%c0_72, %c0_73] : memref<64x4xf32, #tpu.memory_space<vmem>>, vector<64x4xf32>
      %cst_74 = arith.constant dense<0.000000e+00> : vector<2x4xf32>
      %124 = tpu.matmul %122, %123, %cst_74 {dimension_numbers = #tpu.dot_dimension_numbers<[1], [0], [0], [1], [0, 0, 1, 1], [], []>} : vector<2x64xf32>, vector<64x4xf32>, vector<2x4xf32> -> vector<2x4xf32>
      %c0_75 = arith.constant 0 : index
      %c0_76 = arith.constant 0 : index
      %125 = vector.load %arg5[%c0_75, %c0_76] : memref<1x4xf32, #tpu.memory_space<vmem>>, vector<1x4xf32>
      %126 = vector.broadcast %125 : vector<1x4xf32> to vector<2x4xf32>
      %127 = arith.addf %124, %126 : vector<2x4xf32>
      %c0_77 = arith.constant 0 : index
      %c0_78 = arith.constant 0 : index
      %128 = vector.load %arg23[%c0_77, %c0_78] : memref<2x4xf32, #tpu.memory_space<vmem>>, vector<2x4xf32>
      tpu.vector_store %arg23[%c0_77, %c0_78], %127 {strides = array<i32>} : memref<2x4xf32, #tpu.memory_space<vmem>>, vector<2x4xf32>,
    } else {
    }
    return
  }
  func.func @transform_0(%arg0: i32) -> (i32, i32) {
    %c0_i32 = arith.constant 0 : i32
    %c0_i32_0 = arith.constant 0 : i32
    %c0_i32_1 = arith.constant 0 : i32
    return %c0_i32, %c0_i32_0 : i32, i32
  }
  func.func @transform_1(%arg0: i32) -> (i32, i32) {
    %c0_i32 = arith.constant 0 : i32
    %c0_i32_0 = arith.constant 0 : i32
    %c0_i32_1 = arith.constant 0 : i32
    return %c0_i32, %c0_i32_0 : i32, i32
  }
  func.func @transform_2(%arg0: i32) -> (i32, i32) {
    %c0_i32 = arith.constant 0 : i32
    %c0_i32_0 = arith.constant 0 : i32
    %c0_i32_1 = arith.constant 0 : i32
    return %c0_i32, %c0_i32_0 : i32, i32
  }
  func.func @transform_3(%arg0: i32) -> (i32, i32) {
    %c0_i32 = arith.constant 0 : i32
    %c0_i32_0 = arith.constant 0 : i32
    %c0_i32_1 = arith.constant 0 : i32
    return %c0_i32, %c0_i32_0 : i32, i32
  }
  func.func @transform_4(%arg0: i32) -> (i32, i32) {
    %c0_i32 = arith.constant 0 : i32
    %c0_i32_0 = arith.constant 0 : i32
    %c0_i32_1 = arith.constant 0 : i32
    return %c0_i32, %c0_i32_0 : i32, i32
  }
  func.func @transform_5(%arg0: i32) -> (i32, i32) {
    %c0_i32 = arith.constant 0 : i32
    %c0_i32_0 = arith.constant 0 : i32
    %c0_i32_1 = arith.constant 0 : i32
    return %c0_i32, %c0_i32_0 : i32, i32
  }
  func.func @transform_6(%arg0: i32) -> (i32, i32) {
    %c0_i32 = arith.constant 0 : i32
    %c0_i32_0 = arith.constant 0 : i32
    %c0_i32_1 = arith.constant 0 : i32
    return %c0_i32, %c0_i32_0 : i32, i32
  }
  func.func @transform_7(%arg0: i32) -> (i32, i32) {
    %c0_i32 = arith.constant 0 : i32
    %c0_i32_0 = arith.constant 0 : i32
    %c0_i32_1 = arith.constant 0 : i32
    return %c0_i32, %c0_i32_0 : i32, i32
  }
  func.func @transform_8(%arg0: i32) -> (i32, i32) {
    %c0_i32 = arith.constant 0 : i32
    %c0_i32_0 = arith.constant 0 : i32
    %c0_i32_1 = arith.constant 0 : i32
    return %c0_i32, %c0_i32_0 : i32, i32
  }
  func.func @transform_9(%arg0: i32) -> (i32, i32) {
    %c0_i32 = arith.constant 0 : i32
    %c0_i32_0 = arith.constant 0 : i32
    %c0_i32_1 = arith.constant 0 : i32
    return %c0_i32, %c0_i32_0 : i32, i32
  }
  func.func @transform_10(%arg0: i32) -> (i32, i32, i32) {
    %c0_i32 = arith.constant 0 : i32
    %c0_i32_0 = arith.constant 0 : i32
    %c0_i32_1 = arith.constant 0 : i32
    return %arg0, %c0_i32, %c0_i32_0 : i32, i32, i32
  }
  func.func @transform_11(%arg0: i32) -> (i32, i32, i32) {
    %c0_i32 = arith.constant 0 : i32
    %c0_i32_0 = arith.constant 0 : i32
    %c0_i32_1 = arith.constant 0 : i32
    return %arg0, %c0_i32, %c0_i32_0 : i32, i32, i32
  }
  func.func @transform_12(%arg0: i32) -> (i32, i32, i32) {
    %c0_i32 = arith.constant 0 : i32
    %c0_i32_0 = arith.constant 0 : i32
    %c0_i32_1 = arith.constant 0 : i32
    return %arg0, %c0_i32, %c0_i32_0 : i32, i32, i32
  }
  func.func @transform_13(%arg0: i32) -> (i32, i32, i32) {
    %c0_i32 = arith.constant 0 : i32
    %c0_i32_0 = arith.constant 0 : i32
    %c0_i32_1 = arith.constant 0 : i32
    return %arg0, %c0_i32, %c0_i32_0 : i32, i32, i32
  }
  func.func @transform_14(%arg0: i32) -> (i32, i32, i32) {
    %c0_i32 = arith.constant 0 : i32
    %c0_i32_0 = arith.constant 0 : i32
    %c0_i32_1 = arith.constant 0 : i32
    return %arg0, %c0_i32, %c0_i32_0 : i32, i32, i32
  }
  func.func @transform_15(%arg0: i32) -> (i32, i32, i32) {
    %c0_i32 = arith.constant 0 : i32
    %c0_i32_0 = arith.constant 0 : i32
    %c0_i32_1 = arith.constant 0 : i32
    return %arg0, %c0_i32, %c0_i32_0 : i32, i32, i32
  }
  func.func @transform_16(%arg0: i32) -> (i32, i32, i32) {
    %c0_i32 = arith.constant 0 : i32
    %c0_i32_0 = arith.constant 0 : i32
    %c0_i32_1 = arith.constant 0 : i32
    return %arg0, %c0_i32, %c0_i32_0 : i32, i32, i32
  }
  func.func @transform_17(%arg0: i32) -> (i32, i32, i32) {
    %c0_i32 = arith.constant 0 : i32
    %c0_i32_0 = arith.constant 0 : i32
    %c0_i32_1 = arith.constant 0 : i32
    return %arg0, %c0_i32, %c0_i32_0 : i32, i32, i32
  }
  func.func @transform_18(%arg0: i32) -> (i32, i32, i32) {
    %c0_i32 = arith.constant 0 : i32
    %c0_i32_0 = arith.constant 0 : i32
    %c0_i32_1 = arith.constant 0 : i32
    return %arg0, %c0_i32, %c0_i32_0 : i32, i32, i32
  }
  func.func @transform_19(%arg0: i32) -> (i32, i32, i32) {
    %c0_i32 = arith.constant 0 : i32
    %c0_i32_0 = arith.constant 0 : i32
    %c0_i32_1 = arith.constant 0 : i32
    return %arg0, %c0_i32, %c0_i32_0 : i32, i32, i32
  }
  func.func @transform_20(%arg0: i32) -> (i32, i32, i32) {
    %c0_i32 = arith.constant 0 : i32
    %c0_i32_0 = arith.constant 0 : i32
    %c0_i32_1 = arith.constant 0 : i32
    return %arg0, %c0_i32, %c0_i32_0 : i32, i32, i32
  }
  func.func @transform_21(%arg0: i32) -> (i32, i32, i32) {
    %c0_i32 = arith.constant 0 : i32
    %c0_i32_0 = arith.constant 0 : i32
    %c0_i32_1 = arith.constant 0 : i32
    return %arg0, %c0_i32, %c0_i32_0 : i32, i32, i32
  }
  func.func @transform_22(%arg0: i32) -> (i32, i32) {
    %c0_i32 = arith.constant 0 : i32
    %c0_i32_0 = arith.constant 0 : i32
    %c0_i32_1 = arith.constant 0 : i32
    return %c0_i32, %c0_i32_0 : i32, i32
  }
}

</mosaic_0001>

<bundles_post_ra>
// kernel: tpu_custom_call.1
= control target key start
LH: loop header
LB: loop body
LE: loop exit
PB: predicated region body
PF: predicated region fallthrough
CT: control target
= control target key end

     0   :  { %s7027_s0 = inlined_call_operand.vmem [shape: f32[16,6], index: 0, kind: input, shape index: {}]   ;;  %s7028_s1 = inlined_call_operand.hbm [shape: f32[6,64], index: 1, kind: input, shape index: {}]   ;;  %s7029_s2 = inlined_call_operand.hbm [shape: f32[1,64], index: 2, kind: input, shape index: {}]   ;;  %s7030_s3 = inlined_call_operand.vmem [shape: f32[64,4], index: 3, kind: input, shape index: {}]   ;;  %s7031_s4 = inlined_call_operand.hbm [shape: f32[1,4], index: 4, kind: input, shape index: {}]   ;;  %s7032_s5 = inlined_call_operand.vmem [shape: f32[128,64], index: 5, kind: input, shape index: {}]   ;;  %s7033_s6 = inlined_call_operand.hbm [shape: f32[16,128], index: 6, kind: input, shape index: {}]   ;;  %s7034_s7 = inlined_call_operand.vmem [shape: f32[128,8], index: 7, kind: input, shape index: {}]   ;;  %s7035_s8 = inlined_call_operand.hbm [shape: f32[8,64], index: 8, kind: input, shape index: {}]   ;;  %s7036_s9 = inlined_call_operand.hbm [shape: f32[2,16], index: 9, kind: input, shape index: {}]   ;;  %s7037_s10 = inlined_call_operand.hbm [shape: bf16[6,64,192], index: 10, kind: input, shape index: {}]   ;;  %s7038_s11 = inlined_call_operand.hbm [shape: f32[6,1,192], index: 11, kind: input, shape index: {}]   ;;  %s7039_s12 = inlined_call_operand.hbm [shape: bf16[6,64,64], index: 12, kind: input, shape index: {}]   ;;  %s7040_s13 = inlined_call_operand.hbm [shape: f32[6,1,64], index: 13, kind: input, shape index: {}]   ;;  %s7041_s14 = inlined_call_operand.hbm [shape: f32[6,1,64], index: 14, kind: input, shape index: {}]   ;;  %s7042_s15 = inlined_call_operand.hbm [shape: f32[6,1,64], index: 15, kind: input, shape index: {}]   ;;  %s7043_s16 = inlined_call_operand.hbm [shape: bf16[6,64,2048], index: 16, kind: input, shape index: {}]   ;;  %s7044_s17 = inlined_call_operand.hbm [shape: f32[6,1,2048], index: 17, kind: input, shape index: {}]   ;;  %s7045_s18 = inlined_call_operand.hbm [shape: bf16[6,64,2048], index: 18, kind: input, shape index: {}]   ;;  %s7046_s19 = inlined_call_operand.hbm [shape: f32[6,1,64], index: 19, kind: input, shape index: {}]   ;;  %s7047_s20 = inlined_call_operand.hbm [shape: f32[6,1,64], index: 20, kind: input, shape index: {}]   ;;  %s7048_s21 = inlined_call_operand.hbm [shape: f32[6,1,64], index: 21, kind: input, shape index: {}]   ;;  %s7049_s22 = inlined_call_operand.hbm [shape: f32[2,4], index: 22, kind: output, shape index: {}]  }
   0x1   :  { %7099 = sst [smem:[#allocation41_spill]] %s7027_s0 }
   0x2   :  { %7100 = sst [smem:[#allocation42_spill]] %s7028_s1 }
   0x3   :  { %7101 = sst [smem:[#allocation43_spill]] %s7029_s2 }
   0x4   :  { %7102 = sst [smem:[#allocation44_spill]] %s7030_s3 }
   0x5   :  { %7103 = sst [smem:[#allocation45_spill]] %s7031_s4 }
   0x6   :  { %7104 = sst [smem:[#allocation46_spill]] %s7032_s5 }
   0x7   :  { %7105 = sst [smem:[#allocation47_spill]] %s7033_s6 }
   0x8   :  { %7106 = sst [smem:[#allocation48_spill]] %s7034_s7 }
   0x9   :  { %7107 = sst [smem:[#allocation49_spill]] %s7035_s8 }
   0xa   :  { %7108 = sst [smem:[#allocation50_spill]] %s7036_s9 }
   0xb   :  { %7109 = sst [smem:[#allocation51_spill]] %s7037_s10 }
   0xc   :  { %7110 = sst [smem:[#allocation52_spill]] %s7038_s11 }
   0xd   :  { %7111 = sst [smem:[#allocation53_spill]] %s7047_s20 }
   0xe   :  { %7112 = sst [smem:[#allocation54_spill]] %s7048_s21 }
   0xf   :  { %7113 = sst [smem:[#allocation55_spill]] %s7049_s22 }
  0x10   :  { %27 = vsyncpa [#allocation4], 0 }
  0x11   :  { %28 = vsyncpa [#allocation7], 0 }
  0x12   :  { %29 = vsyncpa [#allocation10], 0 }
  0x13   :  { %30 = vsyncpa [#allocation13], 0 }
  0x14   :  { %31 = vsyncpa [#allocation5], 0  ;;  %s5789_s3 = smov 0   ;;  %s5791_s28 = smov 0  }
  0x15   :  { %s5793_s29 = smov 0   ;;  %s5795_s30 = smov 0  }
  0x16 LB: > { %7114 = sst [smem:[#allocation33_spill]] %s5635_s28  ;;  %s5808_s4 = sadd.s32 4294967295, %s5643_s30   ;;  %s5643_s30 = sphi %s5795_s30, %s7189_s30   ;;  %s5639_s29 = sphi %s5793_s29, %s7192_s29   ;;  %s5635_s28 = sphi %s5791_s28, %s7191_s28   ;;  %s5631_s3 = sphi %s5789_s3, %s7190_s3  }
  0x17   : > { %7115 = sst [smem:[#allocation34_spill]] %s5639_s29  ;;  %s5811_s0 = sadd.s32 1, %s5643_s30  }
  0x18   : > { %7116 = sst [smem:[#allocation35_spill]] %s5808_s4  ;;  %s251_s23 = ssub.s32 %s5643_s30, %s5811_s0 }
  0x19   : > { %7117 = sst [smem:[#allocation36_spill]] %s5811_s0  ;;  %s254_s1 = sadd.s32 1, %s5639_s29 }
  0x1a   : > { %p252_p0 = scmp.eq.s32.totalorder %s251_s23, 0  ;;  %p261_p1 = scmp.ne.s32.totalorder %s5639_s29, %s5635_s28 }
  0x1b   : > { %p262_p2 = scmp.eq.s32.totalorder %s5643_s30, 0  ;;  %p267_p3 = scmp.ne.s32.totalorder %s5635_s28, %s5631_s3 }
  0x1c   : > { %s5821_s5 = scalar_select %p252_p0, %s5639_s29, %s254_s1  }
  0x1d   : > { %p5823_p4 = por %p262_p2, %p261_p1  ;;  %p7065_p5 = scmp.eq.s32.totalorder %s5808_s4, 0 }
  0x1e   : > { %7118 = sst [smem:[#allocation37_spill]] %s5821_s5  ;;  %p4154_p6 = scmp.ge.s32.totalorder %s5643_s30, 1 }
  0x1f   : > { %p585_p7 = scmp.lt.s32.totalorder %s5643_s30, 7  ;;  %p5832_p8 = por %p7065_p5, %p267_p3 }
  0x20   : > { %s5645_s26 = smov [#allocation3]   ;;  %p4909_p12 = scmp.lt.s32.totalorder %s5643_s30, 6 }
  0x21   : > { %s7120_s6 = scalar_select %p5832_p8, 1, 0 }
  0x22   : > { %p5837_p10 = pnand %p4154_p6, %p585_p7  ;;  %s601_s2 = sshll.u32 %s5645_s26, 4  ;;  %s602_s2 = int_to_ptr.vmem [resolvable:$true] %s601_s2 }
  0x23   : > { %7121 = sst [smem:[#allocation38_spill]] %s7120_s6  ;;  %s5845_s27 = sand.u32 1, %s5639_s29  }
  0x24   : > { %s7122_s25 = scalar_select %p5837_p10, 1, 0 }
  0x25   : > { %p4847_p11 = pneg %p5837_p10  ;;  %p5855_p0 = pnand %p4909_p12, %p5823_p4 }
  0x26   : > { %7123 = sst [smem:[#allocation39_spill]] %s7122_s25  ;;  %s678_s1 = sand.u32 1, %s5643_s30  }
  0x27   : > { %p5849_p13 = pnand %p4847_p11, %p7065_p5  ;;  %s7127_s0 = sld [smem:[#allocation42_spill]] }
  0x28   : > { %s7126_s23 = scalar_select %p5855_p0, 1, 0 }
  0x29   : > { %s7124_s3 = scalar_select %p5849_p13, 1, 0 }
  0x2a   : > { %p5868_p2 = pneg %p5849_p13 }
  0x2b   : > { %7125 = sst [smem:[#allocation40_spill]] %s7124_s3 }
  0x2c   : > { %s7128_s29 = scalar_select %p5868_p2, 1, 0 }
  0x2d   : > { %s5035_s22 = scalar_lea.hbm %s7127_s0, 128 }
  0x2e   : > { %p5036_p1 = scmp.ne.s32.totalorder %s7127_s0, %s5035_s22  ;;  %p5042_p6 = scmp.lt.u32.totalorder %s5035_s22, %s7127_s0 }
  0x30   : > { %p5038_p3 = pnand %p5868_p2, %p5036_p1 }
  0x32   : > { %p5039_p4 = pneg %p5038_p3 }
  0x34   : > { %p5044_p7 = pnand %p5042_p6, %p5039_p4 }
  0x36   : > { %5047 = shalt.err (!%p5044_p7)
}
  0x37   : > { %s5048_s5 = scalar_lea.vmem %s602_s2, 128  ;;  %p5056_p5 = scmp.lt.s32.totalorder %s602_s2, %s602_s2 }
  0x38   : > { %p5049_p11 = scmp.ne.s32.totalorder %s602_s2, %s5048_s5  ;;  %p5057_p8 = scmp.lt.s32.totalorder %s5048_s5, %s5048_s5 }
  0x3a   : > { %p5051_p12 = pnand %p5049_p11, %p5868_p2  ;;  %p5058_p10 = por %p5057_p8, %p5056_p5 }
  0x3c   : > { %p5052_p9 = pneg %p5051_p12 }
  0x3e   : > { %p5059_p0 = pnand %p5058_p10, %p5052_p9 }
  0x40   : > { %5062 = shalt.err (!%p5059_p0)
}
  0x41   : > { %4850 = dma.hbm_to_vmem [thread:$0]  (!%p5849_p13), %s7127_s0, 128, %s602_s2, [#allocation4]  }
  0x42   : > { %s4162_s22 = sshll.u32 %s5845_s27, 6  ;;  %s4385_s28 = sshll.u32 %s5643_s30, 10 }
  0x43   : > { %s7129_s10 = sld [smem:[#allocation51_spill]]  ;;  %s682_s5 = scalar_lea.vmem [#allocation14], %s4162_s22 }
  0x44   : > { %s689_s25 = sshll.u32 %s682_s5, 4  ;;  %s4165_s21 = sshll.u32 %s5845_s27, 1  ;;  %s5892_s25 = int_to_ptr.vmem [resolvable:$true] %s689_s25 }
  0x45   : > { %s5894_s7 = scalar_lea.sflag [#allocation4], %s678_s1  ;;  %p7130_p8 = scmp.ne.s32.totalorder %s7126_s23, 0 }
  0x47   : > { %p5900_p9 = pneg %p7130_p8 }
  0x49   : > { %s5889_s4 = scalar_lea.hbm %s7129_s10, %s4385_s28  ;;  %s5068_s22 = scalar_lea.hbm %s7129_s10, 6144 }
  0x4a   : > { %s5063_s6 = scalar_lea.hbm %s5889_s4, 1024  ;;  %p5069_p1 = scmp.lt.u32.totalorder %s5889_s4, %s7129_s10 }
  0x4b   : > { %p5064_p5 = scmp.ne.s32.totalorder %s5889_s4, %s5063_s6  ;;  %p5070_p3 = scmp.lt.u32.totalorder %s5068_s22, %s5063_s6 }
  0x4c   : > { %s7131_s2 = scalar_select %p5900_p9, 1, 0 }
  0x4d   : > { %p5066_p10 = pnand %p5900_p9, %p5064_p5  ;;  %p5071_p4 = por %p5070_p3, %p5069_p1 }
  0x4e   : > { %p5072_p6 = scmp.lt.u32.totalorder %s5063_s6, %s5889_s4 }
  0x4f   : > { %p5067_p0 = pneg %p5066_p10 }
  0x50   : > { %p5073_p7 = por %p5072_p6, %p5071_p4 }
  0x52   : > { %p5074_p11 = pnand %p5073_p7, %p5067_p0 }
  0x54   : > { %5077 = shalt.err (!%p5074_p11)
}
  0x55   : > { %s5078_s1 = scalar_lea.vmem %s5892_s25, 1024  ;;  %s5646_s28 = smov [#allocation14]  }
  0x56   : > { %p5079_p12 = scmp.ne.s32.totalorder %s5892_s25, %s5078_s1  ;;  %s5083_s26 = sshll.u32 %s5646_s28, 4  ;;  %s5084_s26 = int_to_ptr.vmem [resolvable:$false] %s5083_s26 }
  0x57   : > { %s5085_s24 = scalar_lea.vmem %s5084_s26, 2048  ;;  %p5086_p13 = scmp.lt.s32.totalorder %s5892_s25, %s5084_s26 }
  0x58   : > { %p5081_p5 = pnand %p5079_p12, %p5900_p9  ;;  %p5087_p2 = scmp.lt.s32.totalorder %s5085_s24, %s5078_s1 }
  0x5a   : > { %p5082_p10 = pneg %p5081_p5  ;;  %p5088_p1 = por %p5087_p2, %p5086_p13 }
  0x5c   : > { %p5089_p3 = pnand %p5088_p1, %p5082_p10 }
  0x5e   : > { %5092 = shalt.err (!%p5089_p3)
}
  0x5f   : > { %s7086_s6 = smov 128   ;;  %s7087_s22 = smov 8  }
  0x60   : > { %4869 = dma.hbm_to_vmem [thread:$0]  (!%p7130_p8), %s5889_s4, 1024, %s5892_s25, %s5894_s7, %s7086_s6, %s7086_s6, %s7087_s22  }
  0x61   : > { %s4386_s5 = sshll.u32 %s5643_s30, 5  ;;  %s703_s1 = scalar_lea.vmem [#allocation15], %s4165_s21 }
  0x62   : > { %s711_s28 = sshll.u32 %s703_s1, 4  ;;  %s7132_s11 = sld [smem:[#allocation52_spill]]  ;;  %s712_s28 = int_to_ptr.vmem [resolvable:$true] %s711_s28 }
  0x68   : > { %s709_s0 = scalar_lea.hbm %s7132_s11, %s4386_s5  ;;  %s5098_s20 = scalar_lea.hbm %s7132_s11, 192 }
  0x69   : > { %s5093_s10 = scalar_lea.hbm %s709_s0, 32  ;;  %p5099_p4 = scmp.lt.u32.totalorder %s709_s0, %s7132_s11 }
  0x6a   : > { %p5094_p13 = scmp.ne.s32.totalorder %s709_s0, %s5093_s10  ;;  %p5100_p6 = scmp.lt.u32.totalorder %s5098_s20, %s5093_s10 }
  0x6b   : > { %p5102_p11 = scmp.lt.u32.totalorder %s5093_s10, %s709_s0 }
  0x6c   : > { %p5096_p2 = pnand %p5094_p13, %p5900_p9  ;;  %p5101_p7 = por %p5100_p6, %p5099_p4 }
  0x6e   : > { %p5097_p0 = pneg %p5096_p2  ;;  %p5103_p12 = por %p5102_p11, %p5101_p7 }
  0x70   : > { %p5104_p5 = pnand %p5103_p12, %p5097_p0 }
  0x72   : > { %5107 = shalt.err (!%p5104_p5)
}
  0x73   : > { %s5108_s21 = scalar_lea.vmem %s712_s28, 32  ;;  %s5649_s25 = smov [#allocation15]  }
  0x74   : > { %p5109_p10 = scmp.ne.s32.totalorder %s712_s28, %s5108_s21  ;;  %s5113_s5 = sshll.u32 %s5649_s25, 4  ;;  %s5114_s5 = int_to_ptr.vmem [resolvable:$false] %s5113_s5 }
  0x75   : > { %s5115_s8 = scalar_lea.vmem %s5114_s5, 64  ;;  %p5116_p13 = scmp.lt.s32.totalorder %s712_s28, %s5114_s5 }
  0x76   : > { %p5111_p1 = pnand %p5109_p10, %p5900_p9  ;;  %p5117_p2 = scmp.lt.s32.totalorder %s5115_s8, %s5108_s21 }
  0x78   : > { %p5112_p3 = pneg %p5111_p1  ;;  %p5118_p8 = por %p5117_p2, %p5116_p13 }
  0x7a   : > { %p5119_p4 = pnand %p5118_p8, %p5112_p3 }
  0x7c   : > { %5122 = shalt.err (!%p5119_p4)
}
  0x7d   : > { %p7133_p6 = scmp.ne.s32.totalorder %s7126_s23, 0  ;;  %s4168_s9 = sshll.u32 %s5845_s27, 5 }
  0x7e   : > { %s4387_s10 = sshll.u32 %s5643_s30, 9  ;;  %s722_s26 = scalar_lea.vmem [#allocation16], %s4168_s9 }
  0x7f   : > { %4872 = dma.hbm_to_vmem [thread:$0]  (!%p7133_p6), %s709_s0, 32, %s712_s28, %s5894_s7  }
  0x80   : > { %s5951_s1 = scalar_lea.hbm %s7039_s12, %s4387_s10  ;;  %s729_s24 = sshll.u32 %s722_s26, 4  ;;  %s5953_s24 = int_to_ptr.vmem [resolvable:$true] %s729_s24 }
  0x81   : > { %s5123_s4 = scalar_lea.hbm %s5951_s1, 512  ;;  %s5128_s21 = scalar_lea.hbm %s7039_s12, 3072 }
  0x82   : > { %p5124_p8 = scmp.ne.s32.totalorder %s5951_s1, %s5123_s4  ;;  %p5129_p11 = scmp.lt.u32.totalorder %s5951_s1, %s7039_s12 }
  0x83   : > { %p5130_p12 = scmp.lt.u32.totalorder %s5128_s21, %s5123_s4  ;;  %p5132_p10 = scmp.lt.u32.totalorder %s5123_s4, %s5951_s1 }
  0x84   : > { %p5126_p0 = pnand %p5124_p8, %p5900_p9 }
  0x85   : > { %p5131_p5 = por %p5130_p12, %p5129_p11 }
  0x86   : > { %p5127_p7 = pneg %p5126_p0 }
  0x87   : > { %p5133_p1 = por %p5132_p10, %p5131_p5 }
  0x89   : > { %p5134_p3 = pnand %p5133_p1, %p5127_p7 }
  0x8b   : > { %5137 = shalt.err (!%p5134_p3)
}
  0x8c   : > { %s5138_s8 = scalar_lea.vmem %s5953_s24, 512  ;;  %s5650_s9 = smov [#allocation16]  }
  0x8d   : > { %p5139_p13 = scmp.ne.s32.totalorder %s5953_s24, %s5138_s8  ;;  %s5143_s10 = sshll.u32 %s5650_s9, 4  ;;  %s5144_s10 = int_to_ptr.vmem [resolvable:$false] %s5143_s10 }
  0x8e   : > { %s5145_s20 = scalar_lea.vmem %s5144_s10, 1024  ;;  %p5146_p8 = scmp.lt.s32.totalorder %s5953_s24, %s5144_s10 }
  0x8f   : > { %p5141_p2 = pnand %p5139_p13, %p5900_p9  ;;  %p5147_p0 = scmp.lt.s32.totalorder %s5145_s20, %s5138_s8 }
  0x91   : > { %p5142_p4 = pneg %p5141_p2  ;;  %p5148_p11 = por %p5147_p0, %p5146_p8 }
  0x93   : > { %p5149_p12 = pnand %p5148_p11, %p5142_p4 }
  0x95   : > { %5152 = shalt.err (!%p5149_p12)
}
  0x96   : > { %s5651_s3 = smov 64   ;;  %s5652_s26 = smov 4  }
  0x97   : > { %4875 = dma.hbm_to_vmem [thread:$0]  (!%p7133_p6), %s5951_s1, 512, %s5953_s24, %s5894_s7, %s5651_s3, %s5651_s3, %s5652_s26  }
  0x98   : > { %s5980_s4 = sshll.u32 %s5643_s30, 4  ;;  %s742_s25 = scalar_lea.vmem [#allocation17], %s5845_s27 }
  0x99   : > { %s5986_s21 = scalar_lea.hbm %s7040_s13, %s5980_s4  ;;  %s749_s5 = sshll.u32 %s742_s25, 4  ;;  %s750_s5 = int_to_ptr.vmem [resolvable:$true] %s749_s5 }
  0x9a   : > { %s5153_s8 = scalar_lea.hbm %s5986_s21, 16  ;;  %s5158_s9 = scalar_lea.hbm %s7040_s13, 96 }
  0x9b   : > { %p5154_p7 = scmp.ne.s32.totalorder %s5986_s21, %s5153_s8  ;;  %p5159_p1 = scmp.lt.u32.totalorder %s5986_s21, %s7040_s13 }
  0x9c   : > { %p5160_p3 = scmp.lt.u32.totalorder %s5158_s9, %s5153_s8  ;;  %p5162_p2 = scmp.lt.u32.totalorder %s5153_s8, %s5986_s21 }
  0x9d   : > { %p5156_p5 = pnand %p5154_p7, %p5900_p9 }
  0x9e   : > { %p5161_p13 = por %p5160_p3, %p5159_p1 }
  0x9f   : > { %p5157_p10 = pneg %p5156_p5 }
  0xa0   : > { %p5163_p4 = por %p5162_p2, %p5161_p13 }
  0xa2   : > { %p5164_p8 = pnand %p5163_p4, %p5157_p10 }
  0xa4   : > { %5167 = shalt.err (!%p5164_p8)
}
  0xa5   : > { %s5168_s26 = scalar_lea.vmem %s750_s5, 16  ;;  %s5653_s0 = smov [#allocation17]  }
  0xa6   : > { %p5169_p0 = scmp.ne.s32.totalorder %s750_s5, %s5168_s26  ;;  %s5173_s28 = sshll.u32 %s5653_s0, 4  ;;  %s5174_s28 = int_to_ptr.vmem [resolvable:$false] %s5173_s28 }
  0xa7   : > { %s5175_s25 = scalar_lea.vmem %s5174_s28, 32  ;;  %p5176_p7 = scmp.lt.s32.totalorder %s750_s5, %s5174_s28 }
  0xa8   : > { %p5171_p11 = pnand %p5169_p0, %p5900_p9  ;;  %p5177_p5 = scmp.lt.s32.totalorder %s5175_s25, %s5168_s26 }
  0xaa   : > { %p5172_p12 = pneg %p5171_p11  ;;  %p5178_p6 = por %p5177_p5, %p5176_p7 }
  0xac   : > { %p5179_p1 = pnand %p5178_p6, %p5172_p12 }
  0xae   : > { %5182 = shalt.err (!%p5179_p1)
}
  0xaf   : > { %p7134_p3 = scmp.ne.s32.totalorder %s7126_s23, 0  ;;  %s6011_s24 = scalar_lea.hbm %s7041_s14, %s5980_s4 }
  0xb0   : > { %s759_s9 = scalar_lea.vmem [#allocation18], %s5845_s27  ;;  %s5183_s20 = scalar_lea.hbm %s6011_s24, 16 }
  0xb1   : > { %4878 = dma.hbm_to_vmem [thread:$0]  (!%p7134_p3), %s5986_s21, 16, %s750_s5, %s5894_s7  }
  0xb2   : > { %s766_s10 = sshll.u32 %s759_s9, 4  ;;  %p5184_p6 = scmp.ne.s32.totalorder %s6011_s24, %s5183_s20  ;;  %s767_s10 = int_to_ptr.vmem [resolvable:$true] %s766_s10 }
  0xb3   : > { %s5188_s21 = scalar_lea.hbm %s7041_s14, 96  ;;  %p5189_p2 = scmp.lt.u32.totalorder %s6011_s24, %s7041_s14 }
  0xb4   : > { %p5186_p10 = pnand %p5184_p6, %p5900_p9  ;;  %p5190_p4 = scmp.lt.u32.totalorder %s5188_s21, %s5183_s20 }
  0xb5   : > { %p5192_p0 = scmp.lt.u32.totalorder %s5183_s20, %s6011_s24 }
  0xb6   : > { %p5187_p13 = pneg %p5186_p10  ;;  %p5191_p8 = por %p5190_p4, %p5189_p2 }
  0xb8   : > { %p5193_p11 = por %p5192_p0, %p5191_p8 }
  0xba   : > { %p5194_p12 = pnand %p5193_p11, %p5187_p13 }
  0xbc   : > { %5197 = shalt.err (!%p5194_p12)
}
  0xbd   : > { %s5198_s25 = scalar_lea.vmem %s767_s10, 16  ;;  %s5654_s8 = smov [#allocation18]  }
  0xbe   : > { %p5199_p7 = scmp.ne.s32.totalorder %s767_s10, %s5198_s25  ;;  %s5203_s1 = sshll.u32 %s5654_s8, 4  ;;  %s5204_s1 = int_to_ptr.vmem [resolvable:$false] %s5203_s1 }
  0xbf   : > { %s5205_s9 = scalar_lea.vmem %s5204_s1, 32  ;;  %p5206_p6 = scmp.lt.s32.totalorder %s767_s10, %s5204_s1 }
  0xc0   : > { %p5201_p5 = pnand %p5199_p7, %p5900_p9  ;;  %p5207_p10 = scmp.lt.s32.totalorder %s5205_s9, %s5198_s25 }
  0xc2   : > { %p5202_p1 = pneg %p5201_p5  ;;  %p5208_p3 = por %p5207_p10, %p5206_p6 }
  0xc4   : > { %p5209_p2 = pnand %p5208_p3, %p5202_p1 }
  0xc6   : > { %5212 = shalt.err (!%p5209_p2)
}
  0xc7   : > { %p7135_p4 = scmp.ne.s32.totalorder %s7126_s23, 0  ;;  %s6036_s0 = scalar_lea.hbm %s7042_s15, %s5980_s4 }
  0xc8   : > { %s776_s21 = scalar_lea.vmem [#allocation19], %s5845_s27  ;;  %s7088_s28 = sshll.u32 %s5845_s27, 9 }
  0xc9   : > { %4881 = dma.hbm_to_vmem [thread:$0]  (!%p7135_p4), %s6011_s24, 16, %s767_s10, %s5894_s7  }
  0xca   : > { %s783_s5 = sshll.u32 %s776_s21, 4  ;;  %s5213_s25 = scalar_lea.hbm %s6036_s0, 16  ;;  %s784_s5 = int_to_ptr.vmem [resolvable:$true] %s783_s5 }
  0xcb   : > { %p5214_p3 = scmp.ne.s32.totalorder %s6036_s0, %s5213_s25  ;;  %s5218_s10 = scalar_lea.hbm %s7042_s15, 96 }
  0xcc   : > { %p5219_p0 = scmp.lt.u32.totalorder %s6036_s0, %s7042_s15  ;;  %p5220_p11 = scmp.lt.u32.totalorder %s5218_s10, %s5213_s25 }
  0xcd   : > { %p5216_p13 = pnand %p5214_p3, %p5900_p9  ;;  %p5222_p7 = scmp.lt.u32.totalorder %s5213_s25, %s6036_s0 }
  0xce   : > { %p5221_p12 = por %p5220_p11, %p5219_p0 }
  0xcf   : > { %p5217_p8 = pneg %p5216_p13 }
  0xd0   : > { %p5223_p5 = por %p5222_p7, %p5221_p12 }
  0xd2   : > { %p5224_p1 = pnand %p5223_p5, %p5217_p8 }
  0xd4   : > { %5227 = shalt.err (!%p5224_p1)
}
  0xd5   : > { %s5228_s20 = scalar_lea.vmem %s784_s5, 16  ;;  %s5655_s26 = smov [#allocation19]  }
  0xd6   : > { %p5229_p6 = scmp.ne.s32.totalorder %s784_s5, %s5228_s20  ;;  %s5233_s21 = sshll.u32 %s5655_s26, 4  ;;  %s5234_s21 = int_to_ptr.vmem [resolvable:$false] %s5233_s21 }
  0xd7   : > { %s5235_s8 = scalar_lea.vmem %s5234_s21, 32  ;;  %p5236_p3 = scmp.lt.s32.totalorder %s784_s5, %s5234_s21 }
  0xd8   : > { %p5231_p10 = pnand %p5229_p6, %p5900_p9  ;;  %p5237_p13 = scmp.lt.s32.totalorder %s5235_s8, %s5228_s20 }
  0xda   : > { %p5232_p2 = pneg %p5231_p10  ;;  %p5238_p4 = por %p5237_p13, %p5236_p3 }
  0xdc   : > { %p5239_p0 = pnand %p5238_p4, %p5232_p2 }
  0xde   : > { %5242 = shalt.err (!%p5239_p0)
}
  0xdf   : > { %p7136_p11 = scmp.ne.s32.totalorder %s7126_s23, 0  ;;  %s4388_s25 = sshll.u32 %s5643_s30, 13 }
  0xe0   : > { %s6064_s1 = scalar_lea.hbm %s7043_s16, %s4388_s25  ;;  %s794_s9 = scalar_lea.vmem [#allocation20], %s7088_s28 }
  0xe1   : > { %4884 = dma.hbm_to_vmem [thread:$0]  (!%p7136_p11), %s6036_s0, 16, %s784_s5, %s5894_s7  }
  0xe2   : > { %s801_s20 = sshll.u32 %s794_s9, 4  ;;  %s5243_s26 = scalar_lea.hbm %s6064_s1, 8192  ;;  %s6068_s20 = int_to_ptr.vmem [resolvable:$true] %s801_s20 }
  0xe3   : > { %p5244_p4 = scmp.ne.s32.totalorder %s6064_s1, %s5243_s26  ;;  %s5248_s21 = scalar_lea.hbm %s7043_s16, 49152 }
  0xe4   : > { %p5249_p7 = scmp.lt.u32.totalorder %s6064_s1, %s7043_s16  ;;  %p5250_p5 = scmp.lt.u32.totalorder %s5248_s21, %s5243_s26 }
  0xe5   : > { %p5246_p8 = pnand %p5244_p4, %p5900_p9  ;;  %p5252_p6 = scmp.lt.u32.totalorder %s5243_s26, %s6064_s1 }
  0xe6   : > { %p5251_p1 = por %p5250_p5, %p5249_p7 }
  0xe7   : > { %p5247_p12 = pneg %p5246_p8 }
  0xe8   : > { %p5253_p10 = por %p5252_p6, %p5251_p1 }
  0xea   : > { %p5254_p2 = pnand %p5253_p10, %p5247_p12 }
  0xec   : > { %5257 = shalt.err (!%p5254_p2)
}
  0xed   : > { %s5258_s10 = scalar_lea.vmem %s6068_s20, 8192  ;;  %s5656_s9 = smov [#allocation20]  }
  0xee   : > { %p5259_p3 = scmp.ne.s32.totalorder %s6068_s20, %s5258_s10  ;;  %s5263_s0 = sshll.u32 %s5656_s9, 4  ;;  %s5264_s0 = int_to_ptr.vmem [resolvable:$false] %s5263_s0 }
  0xef   : > { %s5265_s5 = scalar_lea.vmem %s5264_s0, 16384  ;;  %p5266_p4 = scmp.lt.s32.totalorder %s6068_s20, %s5264_s0 }
  0xf0   : > { %p5261_p13 = pnand %p5259_p3, %p5900_p9  ;;  %p5267_p8 = scmp.lt.s32.totalorder %s5265_s5, %s5258_s10 }
  0xf2   : > { %p5262_p0 = pneg %p5261_p13  ;;  %p5268_p7 = por %p5267_p8, %p5266_p4 }
  0xf4   : > { %p5269_p5 = pnand %p5268_p7, %p5262_p0 }
  0xf6   : > { %5272 = shalt.err (!%p5269_p5)
}
  0xf7   : > { %s7089_s26 = smov 1024   ;;  %s4177_s21 = sshll.u32 %s5845_s27, 4 }
  0xf8   : > { %4887 = dma.hbm_to_vmem [thread:$0]  (!%p7136_p11), %s6064_s1, 8192, %s6068_s20, %s5894_s7, %s7089_s26, %s7089_s26, %s5651_s3  }
  0xf9   : > { %s4389_s8 = sshll.u32 %s5643_s30, 8  ;;  %s815_s0 = scalar_lea.vmem [#allocation21], %s4177_s21 }
  0xfa   : > { %s6100_s9 = scalar_lea.hbm %s7044_s17, %s4389_s8  ;;  %s823_s5 = sshll.u32 %s815_s0, 4  ;;  %s824_s5 = int_to_ptr.vmem [resolvable:$true] %s823_s5 }
  0xfb   : > { %s6107_s28 = scalar_lea.hbm %s7045_s18, %s4388_s25  ;;  %s5273_s1 = scalar_lea.hbm %s6100_s9, 256 }
  0xfc   : > { %p5274_p12 = scmp.ne.s32.totalorder %s6100_s9, %s5273_s1  ;;  %s5278_s24 = scalar_lea.hbm %s7044_s17, 1536 }
  0xfd   : > { %p5279_p10 = scmp.lt.u32.totalorder %s6100_s9, %s7044_s17  ;;  %p5280_p2 = scmp.lt.u32.totalorder %s5278_s24, %s5273_s1 }
  0xfe   : > { %p5276_p1 = pnand %p5274_p12, %p5900_p9  ;;  %p5282_p13 = scmp.lt.u32.totalorder %s5273_s1, %s6100_s9 }
  0xff   : > { %p5281_p3 = por %p5280_p2, %p5279_p10 }
 0x100   : > { %p5277_p6 = pneg %p5276_p1 }
 0x101   : > { %p5283_p0 = por %p5282_p13, %p5281_p3 }
 0x103   : > { %p5284_p4 = pnand %p5283_p0, %p5277_p6 }
 0x105   : > { %5287 = shalt.err (!%p5284_p4)
}
 0x106   : > { %s5288_s30 = scalar_lea.vmem %s824_s5, 256  ;;  %s5658_s6 = smov [#allocation21]  }
 0x107   : > { %p5289_p8 = scmp.ne.s32.totalorder %s824_s5, %s5288_s30  ;;  %s5293_s22 = sshll.u32 %s5658_s6, 4  ;;  %s5294_s22 = int_to_ptr.vmem [resolvable:$false] %s5293_s22 }
 0x108   : > { %s5295_s25 = scalar_lea.vmem %s5294_s22, 512  ;;  %p5296_p12 = scmp.lt.s32.totalorder %s824_s5, %s5294_s22 }
 0x109   : > { %p5291_p7 = pnand %p5289_p8, %p5900_p9  ;;  %p5297_p1 = scmp.lt.s32.totalorder %s5295_s25, %s5288_s30 }
 0x10b   : > { %p5292_p5 = pneg %p5291_p7  ;;  %p5298_p11 = por %p5297_p1, %p5296_p12 }
 0x10d   : > { %p5299_p2 = pnand %p5298_p11, %p5292_p5 }
 0x10f   : > { %5302 = shalt.err (!%p5299_p2)
}
 0x110   : > { %p7137_p10 = scmp.ne.s32.totalorder %s7126_s23, 0  ;;  %s7138_s26 = sshll.u32 %s5845_s27, 9 }
 0x111   : > { %s834_s21 = scalar_lea.vmem [#allocation22], %s7138_s26  ;;  %s6135_s8 = scalar_lea.hbm %s7046_s19, %s5980_s4 }
 0x112   : > { %4890 = dma.hbm_to_vmem [thread:$0]  (!%p7137_p10), %s6100_s9, 256, %s824_s5, %s5894_s7  }
 0x113   : > { %s841_s0 = sshll.u32 %s834_s21, 4  ;;  %s5303_s24 = scalar_lea.hbm %s6107_s28, 8192  ;;  %s6129_s0 = int_to_ptr.vmem [resolvable:$true] %s841_s0 }
 0x114   : > { %p5304_p11 = scmp.ne.s32.totalorder %s6107_s28, %s5303_s24  ;;  %s5308_s6 = scalar_lea.hbm %s7045_s18, 49152 }
 0x115   : > { %p5309_p13 = scmp.lt.u32.totalorder %s6107_s28, %s7045_s18  ;;  %p5310_p0 = scmp.lt.u32.totalorder %s5308_s6, %s5303_s24 }
 0x116   : > { %p5306_p6 = pnand %p5304_p11, %p5900_p9  ;;  %p5312_p8 = scmp.lt.u32.totalorder %s5303_s24, %s6107_s28 }
 0x117   : > { %p5311_p4 = por %p5310_p0, %p5309_p13 }
 0x118   : > { %p5307_p3 = pneg %p5306_p6 }
 0x119   : > { %p5313_p7 = por %p5312_p8, %p5311_p4 }
 0x11b   : > { %p5314_p5 = pnand %p5313_p7, %p5307_p3 }
 0x11d   : > { %5317 = shalt.err (!%p5314_p5)
}
 0x11e   : > { %s5318_s22 = scalar_lea.vmem %s6129_s0, 8192  ;;  %s5659_s25 = smov [#allocation22]  }
 0x11f   : > { %p5319_p12 = scmp.ne.s32.totalorder %s6129_s0, %s5318_s22  ;;  %s5323_s26 = sshll.u32 %s5659_s25, 4  ;;  %s5324_s26 = int_to_ptr.vmem [resolvable:$false] %s5323_s26 }
 0x120   : > { %s5325_s21 = scalar_lea.vmem %s5324_s26, 16384  ;;  %p5326_p11 = scmp.lt.s32.totalorder %s6129_s0, %s5324_s26 }
 0x121   : > { %p5321_p1 = pnand %p5319_p12, %p5900_p9  ;;  %p5327_p6 = scmp.lt.s32.totalorder %s5325_s21, %s5318_s22 }
 0x123   : > { %p5322_p2 = pneg %p5321_p1  ;;  %p5328_p13 = por %p5327_p6, %p5326_p11 }
 0x125   : > { %p5329_p0 = pnand %p5328_p13, %p5322_p2 }
 0x127   : > { %5332 = shalt.err (!%p5329_p0)
}
 0x128   : > { %s7139_s1 = smov 1024   ;;  %s854_s20 = scalar_lea.vmem [#allocation23], %s5845_s27 }
 0x129   : > { %4893 = dma.hbm_to_vmem [thread:$0]  (!%p7137_p10), %s6107_s28, 8192, %s6129_s0, %s5894_s7, %s7139_s1, %s7139_s1, %s5651_s3  }
 0x12a   : > { %s861_s24 = sshll.u32 %s854_s20, 4  ;;  %s5660_s10 = smov [#allocation6]   ;;  %s6163_s24 = int_to_ptr.vmem [resolvable:$true] %s861_s24 }
 0x12b   : > { %s612_s30 = sshll.u32 %s5660_s10, 4  ;;  %s5333_s6 = scalar_lea.hbm %s6135_s8, 16  ;;  %s613_s30 = int_to_ptr.vmem [resolvable:$true] %s612_s30 }
 0x12c   : > { %p5334_p3 = scmp.ne.s32.totalorder %s6135_s8, %s5333_s6  ;;  %s5338_s22 = scalar_lea.hbm %s7046_s19, 96 }
 0x12d   : > { %p5339_p7 = scmp.lt.u32.totalorder %s6135_s8, %s7046_s19  ;;  %p5340_p5 = scmp.lt.u32.totalorder %s5338_s22, %s5333_s6 }
 0x12e   : > { %p5336_p4 = pnand %p5334_p3, %p5900_p9  ;;  %p5342_p1 = scmp.lt.u32.totalorder %s5333_s6, %s6135_s8 }
 0x12f   : > { %p5341_p12 = por %p5340_p5, %p5339_p7 }
 0x130   : > { %p5337_p8 = pneg %p5336_p4 }
 0x131   : > { %p5343_p2 = por %p5342_p1, %p5341_p12 }
 0x133   : > { %p5344_p11 = pnand %p5343_p2, %p5337_p8 }
 0x135   : > { %5347 = shalt.err (!%p5344_p11)
}
 0x136   : > { %s5348_s3 = scalar_lea.vmem %s6163_s24, 16  ;;  %s5661_s28 = smov [#allocation23]  }
 0x137   : > { %p5349_p6 = scmp.ne.s32.totalorder %s6163_s24, %s5348_s3  ;;  %s5353_s0 = sshll.u32 %s5661_s28, 4  ;;  %s5354_s0 = int_to_ptr.vmem [resolvable:$false] %s5353_s0 }
 0x138   : > { %s5355_s21 = scalar_lea.vmem %s5354_s0, 32  ;;  %p5356_p3 = scmp.lt.s32.totalorder %s6163_s24, %s5354_s0 }
 0x139   : > { %p5351_p13 = pnand %p5349_p6, %p5900_p9  ;;  %p5357_p4 = scmp.lt.s32.totalorder %s5355_s21, %s5348_s3 }
 0x13b   : > { %p5352_p0 = pneg %p5351_p13  ;;  %p5358_p7 = por %p5357_p4, %p5356_p3 }
 0x13d   : > { %p5359_p5 = pnand %p5358_p7, %p5352_p0 }
 0x13f   : > { %5362 = shalt.err (!%p5359_p5)
}
 0x140   : > { %4896 = dma.hbm_to_vmem [thread:$0]  (!%p7137_p10), %s6135_s8, 16, %s6163_s24, %s5894_s7  }
 0x141   : > { %s7140_s10 = sld [smem:[#allocation43_spill]]  ;;  %p7141_p12 = scmp.ne.s32.totalorder %s7128_s29, 0 }
 0x147   : > { %s5363_s6 = scalar_lea.hbm %s7140_s10, 16 }
 0x148   : > { %p5364_p8 = scmp.ne.s32.totalorder %s7140_s10, %s5363_s6  ;;  %p5370_p11 = scmp.lt.u32.totalorder %s5363_s6, %s7140_s10 }
 0x14a   : > { %p5366_p1 = pnand %p5364_p8, %p7141_p12 }
 0x14c   : > { %p5367_p2 = pneg %p5366_p1 }
 0x14e   : > { %p5372_p6 = pnand %p5370_p11, %p5367_p2 }
 0x150   : > { %5375 = shalt.err (!%p5372_p6)
}
 0x151   : > { %s5376_s26 = scalar_lea.vmem %s613_s30, 16  ;;  %s5383_s8 = scalar_lea.vmem %s613_s30, 32 }
 0x152   : > { %p5377_p13 = scmp.ne.s32.totalorder %s613_s30, %s5376_s26  ;;  %p5384_p4 = scmp.lt.s32.totalorder %s613_s30, %s613_s30 }
 0x153   : > { %p5385_p7 = scmp.lt.s32.totalorder %s5383_s8, %s5376_s26 }
 0x154   : > { %p5379_p0 = pnand %p5377_p13, %p7141_p12 }
 0x155   : > { %p5386_p5 = por %p5385_p7, %p5384_p4 }
 0x156   : > { %p5380_p3 = pneg %p5379_p0 }
 0x158   : > { %p5387_p10 = pnand %p5386_p5, %p5380_p3 }
 0x15a   : > { %5390 = shalt.err (!%p5387_p10)
}
 0x15b   : > { %s7142_s24 = sld [smem:[#allocation40_spill]]  ;;  %s5662_s0 = smov [#allocation9]  }
 0x15c   : > { %s639_s21 = sshll.u32 %s5662_s0, 4  ;;  %s7144_s6 = sld [smem:[#allocation53_spill]]  ;;  %s640_s21 = int_to_ptr.vmem [resolvable:$true] %s639_s21 }
 0x15d   : > { %s7145_s25 = sld [smem:[#allocation47_spill]] }
 0x161   : > { %p7143_p8 = scmp.ne.s32.totalorder %s7142_s24, 0 }
 0x162   : > { %s6209_s9 = scalar_lea.hbm %s7144_s6, %s5980_s4 }
 0x163   : > { %4853 = dma.hbm_to_vmem [thread:$0]  (!%p7143_p8), %s7140_s10, 16, %s613_s30, [#allocation7]  }
 0x164   : > { %s5391_s26 = scalar_lea.hbm %s7145_s25, 256 }
 0x165   : > { %p5392_p10 = scmp.ne.s32.totalorder %s7145_s25, %s5391_s26  ;;  %p5398_p11 = scmp.lt.u32.totalorder %s5391_s26, %s7145_s25 }
 0x167   : > { %p5394_p1 = pnand %p5392_p10, %p7141_p12 }
 0x169   : > { %p5395_p2 = pneg %p5394_p1 }
 0x16b   : > { %p5400_p6 = pnand %p5398_p11, %p5395_p2 }
 0x16d   : > { %5403 = shalt.err (!%p5400_p6)
}
 0x16e   : > { %s5404_s28 = scalar_lea.vmem %s640_s21, 256  ;;  %p5412_p4 = scmp.lt.s32.totalorder %s640_s21, %s640_s21 }
 0x16f   : > { %p5405_p13 = scmp.ne.s32.totalorder %s640_s21, %s5404_s28  ;;  %p5413_p7 = scmp.lt.s32.totalorder %s5404_s28, %s5404_s28 }
 0x171   : > { %p5407_p0 = pnand %p5405_p13, %p7141_p12  ;;  %p5414_p5 = por %p5413_p7, %p5412_p4 }
 0x173   : > { %p5408_p3 = pneg %p5407_p0 }
 0x175   : > { %p5415_p9 = pnand %p5414_p5, %p5408_p3 }
 0x177   : > { %5418 = shalt.err (!%p5415_p9)
}
 0x178   : > { %s7146_s11 = smov 8   ;;  %s7147_s0 = smov 128  }
 0x179   : > { %4859 = dma.hbm_to_vmem [thread:$0]  (!%p7143_p8), %s7145_s25, 256, %s640_s21, [#allocation10], %s7147_s0, %s7147_s0, %s7146_s11  }
 0x17a   : > { %s871_s5 = scalar_lea.vmem [#allocation24], %s5845_s27  ;;  %s5663_s26 = smov [#allocation8]  }
 0x17b   : > { %s878_s22 = sshll.u32 %s871_s5, 4  ;;  %s626_s8 = sshll.u32 %s5663_s26, 4  ;;  %s6233_s22 = int_to_ptr.vmem [resolvable:$true] %s878_s22  ;;  %s627_s8 = int_to_ptr.vmem [resolvable:$true] %s626_s8 }
 0x17c   : > { %s5419_s30 = scalar_lea.hbm %s6209_s9, 16  ;;  %p7148_p10 = scmp.ne.s32.totalorder %s7131_s2, 0 }
 0x17d   : > { %p5420_p9 = scmp.ne.s32.totalorder %s6209_s9, %s5419_s30  ;;  %s5424_s1 = scalar_lea.hbm %s7144_s6, 96 }
 0x17e   : > { %p5425_p11 = scmp.lt.u32.totalorder %s6209_s9, %s7144_s6  ;;  %p5426_p6 = scmp.lt.u32.totalorder %s5424_s1, %s5419_s30 }
 0x17f   : > { %p5422_p1 = pnand %p5420_p9, %p7148_p10  ;;  %p5428_p0 = scmp.lt.u32.totalorder %s5419_s30, %s6209_s9 }
 0x180   : > { %p5427_p13 = por %p5426_p6, %p5425_p11 }
 0x181   : > { %p5423_p2 = pneg %p5422_p1 }
 0x182   : > { %p5429_p3 = por %p5428_p0, %p5427_p13 }
 0x184   : > { %p5430_p4 = pnand %p5429_p3, %p5423_p2 }
 0x186   : > { %5433 = shalt.err (!%p5430_p4)
}
 0x187   : > { %s5434_s21 = scalar_lea.vmem %s6233_s22, 16  ;;  %s5664_s11 = smov [#allocation24]  }
 0x188   : > { %p5435_p7 = scmp.ne.s32.totalorder %s6233_s22, %s5434_s21  ;;  %s5439_s0 = sshll.u32 %s5664_s11, 4  ;;  %s5440_s0 = int_to_ptr.vmem [resolvable:$false] %s5439_s0 }
 0x189   : > { %s5441_s10 = scalar_lea.vmem %s5440_s0, 32  ;;  %p5442_p1 = scmp.lt.s32.totalorder %s6233_s22, %s5440_s0 }
 0x18a   : > { %p5437_p5 = pnand %p5435_p7, %p7148_p10  ;;  %p5443_p8 = scmp.lt.s32.totalorder %s5441_s10, %s5434_s21 }
 0x18c   : > { %p5438_p9 = pneg %p5437_p5  ;;  %p5444_p11 = por %p5443_p8, %p5442_p1 }
 0x18e   : > { %p5445_p6 = pnand %p5444_p11, %p5438_p9 }
 0x190   : > { %5448 = shalt.err (!%p5445_p6)
}
 0x191   : > { %p7149_p2 = scmp.ne.s32.totalorder %s7126_s23, 0  ;;  %s7150_s30 = sld [smem:[#allocation45_spill]] }
 0x193   : > { %4899 = dma.hbm_to_vmem [thread:$0]  (!%p7149_p2), %s6209_s9, 16, %s6233_s22, %s5894_s7  }
 0x197   : > { %s7151_s1 = smov %s7150_s30  ;;  %s5449_s3 = scalar_lea.hbm %s7150_s30, 16 }
 0x198   : > { %p5450_p13 = scmp.ne.s32.totalorder %s7151_s1, %s5449_s3  ;;  %p5456_p3 = scmp.lt.u32.totalorder %s5449_s3, %s7151_s1 }
 0x19a   : > { %p5452_p8 = pnand %p5450_p13, %p7141_p12 }
 0x19c   : > { %p5453_p0 = pneg %p5452_p8 }
 0x19e   : > { %p5458_p4 = pnand %p5456_p3, %p5453_p0 }
 0x1a0   : > { %5461 = shalt.err (!%p5458_p4)
}
 0x1a1   : > { %s5462_s0 = scalar_lea.vmem %s627_s8, 16  ;;  %s5469_s9 = scalar_lea.vmem %s627_s8, 32 }
 0x1a2   : > { %p5463_p7 = scmp.ne.s32.totalorder %s627_s8, %s5462_s0  ;;  %p5470_p1 = scmp.lt.s32.totalorder %s627_s8, %s627_s8 }
 0x1a3   : > { %p5471_p11 = scmp.lt.s32.totalorder %s5469_s9, %s5462_s0 }
 0x1a4   : > { %p5465_p5 = pnand %p5463_p7, %p7141_p12 }
 0x1a5   : > { %p5472_p6 = por %p5471_p11, %p5470_p1 }
 0x1a6   : > { %p5466_p9 = pneg %p5465_p5 }
 0x1a8   : > { %p5473_p2 = pnand %p5472_p6, %p5466_p9 }
 0x1aa   : > { %5476 = shalt.err (!%p5473_p2)
}
 0x1ab   : > { %p7152_p13 = scmp.ne.s32.totalorder %s7142_s24, 0  ;;  %s5665_s5 = smov [#allocation11]  }
 0x1ac   : > { %s656_s26 = sshll.u32 %s5665_s5, 4  ;;  %s5666_s30 = smov [#allocation12]   ;;  %s657_s26 = int_to_ptr.vmem [resolvable:$true] %s656_s26 }
 0x1ad   : > { %4856 = dma.hbm_to_vmem [thread:$0]  (!%p7152_p13), %s7151_s1, 16, %s627_s8, [#allocation7]  }
 0x1ae   : > { %s667_s3 = sshll.u32 %s5666_s30, 4  ;;  %s7153_s21 = sld [smem:[#allocation49_spill]]  ;;  %s668_s3 = int_to_ptr.vmem [resolvable:$true] %s667_s3 }
 0x1b4   : > { %s5477_s11 = scalar_lea.hbm %s7153_s21, 128 }
 0x1b5   : > { %p5478_p2 = scmp.ne.s32.totalorder %s7153_s21, %s5477_s11  ;;  %p5484_p3 = scmp.lt.u32.totalorder %s5477_s11, %s7153_s21 }
 0x1b7   : > { %p5480_p8 = pnand %p5478_p2, %p7141_p12 }
 0x1b9   : > { %p5481_p0 = pneg %p5480_p8 }
 0x1bb   : > { %p5486_p4 = pnand %p5484_p3, %p5481_p0 }
 0x1bd   : > { %5489 = shalt.err (!%p5486_p4)
}
 0x1be   : > { %s5490_s8 = scalar_lea.vmem %s657_s26, 128  ;;  %p5498_p1 = scmp.lt.s32.totalorder %s657_s26, %s657_s26 }
 0x1bf   : > { %p5491_p7 = scmp.ne.s32.totalorder %s657_s26, %s5490_s8  ;;  %p5499_p11 = scmp.lt.s32.totalorder %s5490_s8, %s5490_s8 }
 0x1c1   : > { %p5493_p5 = pnand %p5491_p7, %p7141_p12  ;;  %p5500_p6 = por %p5499_p11, %p5498_p1 }
 0x1c3   : > { %p5494_p9 = pneg %p5493_p5 }
 0x1c5   : > { %p5501_p10 = pnand %p5500_p6, %p5494_p9 }
 0x1c7   : > { %5504 = shalt.err (!%p5501_p10)
}
 0x1c8   : > { %4862 = dma.hbm_to_vmem [thread:$0]  (!%p7152_p13), %s7153_s21, 128, %s657_s26, [#allocation10]  }
 0x1c9   : > { %s7154_s28 = sld [smem:[#allocation50_spill]] }
 0x1cf   : > { %s7155_s20 = smov %s7154_s28  ;;  %s5505_s11 = scalar_lea.hbm %s7154_s28, 32 }
 0x1d0   : > { %p5506_p2 = scmp.ne.s32.totalorder %s7155_s20, %s5505_s11  ;;  %p5512_p10 = scmp.lt.u32.totalorder %s5505_s11, %s7155_s20 }
 0x1d2   : > { %p5508_p8 = pnand %p5506_p2, %p7141_p12 }
 0x1d4   : > { %p5509_p0 = pneg %p5508_p8 }
 0x1d6   : > { %p5514_p3 = pnand %p5512_p10, %p5509_p0 }
 0x1d8   : > { %5517 = shalt.err (!%p5514_p3)
}
 0x1d9   : > { %s5518_s10 = scalar_lea.vmem %s668_s3, 32  ;;  %p5526_p9 = scmp.lt.s32.totalorder %s668_s3, %s668_s3 }
 0x1da   : > { %p5519_p4 = scmp.ne.s32.totalorder %s668_s3, %s5518_s10  ;;  %p5527_p1 = scmp.lt.s32.totalorder %s5518_s10, %s5518_s10 }
 0x1dc   : > { %p5521_p7 = pnand %p5519_p4, %p7141_p12  ;;  %p5528_p11 = por %p5527_p1, %p5526_p9 }
 0x1de   : > { %p5522_p5 = pneg %p5521_p7 }
 0x1e0   : > { %p5529_p6 = pnand %p5528_p11, %p5522_p5 }
 0x1e2   : > { %5532 = shalt.err (!%p5529_p6)
}
 0x1e3   : > { %4865 = dma.hbm_to_vmem [thread:$0]  (!%p7152_p13), %s7155_s20, 32, %s668_s3, [#allocation13]  }
 0x1e4   : > { %s7156_s28 = sld [smem:[#allocation54_spill]]  ;;  %s888_s0 = scalar_lea.vmem [#allocation25], %s5845_s27 }
 0x1e5   : > { %s895_s9 = sshll.u32 %s888_s0, 4  ;;  %p7158_p2 = scmp.ne.s32.totalorder %s7131_s2, 0  ;;  %s896_s9 = int_to_ptr.vmem [resolvable:$true] %s895_s9 }
 0x1ea   : > { %s7157_s11 = smov %s7156_s28  ;;  %s6315_s29 = scalar_lea.hbm %s7156_s28, %s5980_s4 }
 0x1eb   : > { %s5533_s24 = scalar_lea.hbm %s6315_s29, 16  ;;  %s5538_s3 = scalar_lea.hbm %s7157_s11, 96 }
 0x1ec   : > { %p5534_p12 = scmp.ne.s32.totalorder %s6315_s29, %s5533_s24  ;;  %p5539_p13 = scmp.lt.u32.totalorder %s6315_s29, %s7157_s11 }
 0x1ed   : > { %p5540_p10 = scmp.lt.u32.totalorder %s5538_s3, %s5533_s24  ;;  %p5542_p4 = scmp.lt.u32.totalorder %s5533_s24, %s6315_s29 }
 0x1ee   : > { %p5536_p8 = pnand %p5534_p12, %p7158_p2 }
 0x1ef   : > { %p5541_p3 = por %p5540_p10, %p5539_p13 }
 0x1f0   : > { %p5537_p0 = pneg %p5536_p8 }
 0x1f1   : > { %p5543_p7 = por %p5542_p4, %p5541_p3 }
 0x1f3   : > { %p5544_p5 = pnand %p5543_p7, %p5537_p0 }
 0x1f5   : > { %5547 = shalt.err (!%p5544_p5)
}
 0x1f6   : > { %s5548_s27 = scalar_lea.vmem %s896_s9, 16  ;;  %s5667_s4 = smov [#allocation25]  }
 0x1f7   : > { %p5549_p9 = scmp.ne.s32.totalorder %s896_s9, %s5548_s27  ;;  %s5553_s5 = sshll.u32 %s5667_s4, 4  ;;  %s5554_s5 = int_to_ptr.vmem [resolvable:$false] %s5553_s5 }
 0x1f8   : > { %s5555_s6 = scalar_lea.vmem %s5554_s5, 32  ;;  %p5556_p6 = scmp.lt.s32.totalorder %s896_s9, %s5554_s5 }
 0x1f9   : > { %p5551_p1 = pnand %p5549_p9, %p7158_p2  ;;  %p5557_p12 = scmp.lt.s32.totalorder %s5555_s6, %s5548_s27 }
 0x1fb   : > { %p5552_p11 = pneg %p5551_p1  ;;  %p5558_p8 = por %p5557_p12, %p5556_p6 }
 0x1fd   : > { %p5559_p10 = pnand %p5558_p8, %p5552_p11 }
 0x1ff   : > { %5562 = shalt.err (!%p5559_p10)
}
 0x200   : > { %p7159_p13 = scmp.ne.s32.totalorder %s7126_s23, 0  ;;  %s7160_s30 = sld [smem:[#allocation39_spill]] }
 0x202   : > { %4902 = dma.hbm_to_vmem [thread:$0]  (!%p7159_p13), %s6315_s29, 16, %s896_s9, %s5894_s7  }
 0x206   : > { %p7161_p0 = scmp.ne.s32.totalorder %s7160_s30, 0 }
 0x207   : > { %s7162_s2 = sld [smem:[#allocation35_spill]] (!%p7161_p0) }
 0x208   : > { %904 = sbr.rel (%p7161_p0) target bundleno = 3885 (0xf2d), region = 108 }
 0x20d   : > { %p7163_p2 = scmp.eq.s32.totalorder (!%p7161_p0), %s7162_s2, 0 }
 0x20f   : > { %5606 = dma.done.wait (%p7163_p2), [#allocation4], 128   ;;  %p7164_p3 = pmov %p7163_p2 }
 0x210   : > { %p7165_p4 = pmov %p7163_p2 }
 0x211   : > { %5608 = vsyncadd (%p7164_p3), [#allocation4], 4294967168 }
 0x212   : > { %5610 = dma.done.wait (%p7165_p4), [#allocation7], 32   ;;  %p7166_p7 = pmov %p7163_p2 }
 0x213   : > { %p7167_p5 = pmov %p7163_p2 }
 0x214   : > { %5612 = vsyncadd (%p7166_p7), [#allocation7], 4294967264 }
 0x215   : > { %5614 = dma.done.wait (%p7167_p5), [#allocation10], 384   ;;  %p7168_p9 = pmov %p7163_p2 }
 0x216   : > { %p7169_p1 = pmov %p7163_p2 }
 0x217   : > { %5616 = vsyncadd (%p7168_p9), [#allocation10], 4294966912 }
 0x218   : > { %5618 = dma.done.wait (%p7169_p1), [#allocation13], 32   ;;  %p7170_p11 = pmov %p7169_p1 }
 0x219   : > { %s7171_s23 = sld [smem:[#allocation33_spill]]  ;;  %s7172_s7 = sld [smem:[#allocation38_spill]] }
 0x21a   : > { %5620 = vsyncadd (%p7170_p11), [#allocation13], 4294967264  ;;  %s930_s28 = sand.u32 1, %s7162_s2  }
 0x21b   : > { %s931_s9 = scalar_lea.sflag [#allocation4], %s930_s28 }
 0x21f   : > { %s6356_s29 = sand.u32 1, %s7171_s23   ;;  %p7173_p6 = scmp.ne.s32.totalorder %s7172_s7, 0 }
 0x220   : > { %s4193_s0 = sshll.u32 %s6356_s29, 6 }
 0x221   : > { %s6359_s24 = scalar_lea.vmem [#allocation14], %s4193_s0 }
 0x222   : > { %5622 = dma.done.wait (%p7173_p6), %s931_s9, 18304  }
 0x223   : > { %5624 = vsyncadd (%p7173_p6), %s931_s9, 4294948992  ;;  %s4194_s22 = sshll.u32 %s6356_s29, 1  ;;  %s4195_s8 = sshll.u32 %s6356_s29, 5 }
 0x224   : > { %s4196_s3 = sshll.u32 %s6356_s29, 9  ;;  %s4197_s10 = sshll.u32 %s6356_s29, 4 }
 0x225   : > { %s6369_s26 = scalar_lea.vmem [#allocation15], %s4194_s22  ;;  %s6371_s27 = scalar_lea.vmem [#allocation16], %s4195_s8 }
 0x226   : > { %s960_s4 = scalar_lea.vmem [#allocation17], %s6356_s29  ;;  %s6376_s30 = scalar_lea.vmem [#allocation20], %s4196_s3 }
 0x227   : > { %s6378_s23 = scalar_lea.vmem [#allocation21], %s4197_s10  ;;  %s6380_s7 = scalar_lea.vmem [#allocation22], %s4196_s3 }
 0x228   : > { %p7174_p12 = scmp.ne.s32.totalorder %s7162_s2, 0 }
 0x229   : > { %v1139_v0 = vld [vmem:[#allocation3] sm:$0x3f] (!%p7174_p12)  ;;  %vm1154_vm0 = vcmask (!%p7174_p12), 1045504   ;;  %s7175_s1 = sld [smem:[#allocation41_spill]] (!%p7174_p12)  ;;  %vm1147_vm1 = vcmask (!%p7174_p12), 48128   ;;  %vm1233_vm2 = vcmask (!%p7174_p12), 523264  }
 0x22a   : > { %1136 = sbr.rel (%p7174_p12) target bundleno = 777 (0x309), region = 184  ;;  %4492 = vmatprep.subr.msk.mxu0 (!%p7174_p12), %vm1154_vm0, %v1139_v0  ;;  %v4200_v3 = vld [vmem:[#allocation6] ss:$0 sm:$0xff] (!%p7174_p12) }
 0x22b   : > { %4493 = vmatpush3.msk.msra.mxu0 (!%p7174_p12), %vm1154_vm0, %v1139_v0 }
 0x22f   : > { %v1137_v1 = vld [vmem:[%s7175_s1] sm:$0xff] (!%p7174_p12)  ;;  %v1138_v2 = vld [vmem:[%s7175_s1 + $0x8] sm:$0xff] (!%p7174_p12) }
 0x230   : > { %4494 = vmatprep.mubr.msk.f32.mxu0 (!%p7174_p12), %vm1147_vm1, %v1137_v1 }
 0x231   : > { %4495 = vmatmul.mubr.msk.f32.vlgmr.msra.gmra.mrb[0].mxu0 %vm1147_vm1, %v1138_v2 }
 0x304   : > { %v4496_v4 = vpop.f32.mrb[0].mxu0 }
 0x305   : > { %v1230_v5 = vadd.f32 %v4496_v4, %v4200_v3  ;;  %v1224_v6 = vpop.f32.mrb[1].mxu0 }
 0x306   : > { %v1225_v7 = vadd.f32 %v4200_v3, %v1224_v6 }
 0x307   : > { %1235 = vst.msk [vmem:[#allocation2 + $0x8] sm:$0xff] %vm1233_vm2, %v1230_v5 }
 0x308   : > { %1234 = vst.msk [vmem:[#allocation2] sm:$0xff] %vm1233_vm2, %v1225_v7 }
 0x309 PF: > { %v5007_v8 = vld [vmem:[%s6359_s24 + $0x4] ss:$8 sps:$4 sm:$0xff]   ;;  %v5009_v9 = vld [vmem:[%s6359_s24] ss:$8 sps:$4 sm:$0xff]   ;;  %v5668_v10 = vmov 0   ;;  %s7176_s10 = sld [smem:[#allocation46_spill]]  ;;  %v1249_v43 = vlaneseq }
 0x30a   : > { %1335 = vmatprep.mubr.bf16.mxu0 %v5668_v10  ;;  %1303 = vmatprep.subr.bf16.mxu0 %v5007_v8  ;;  %v5010_v11 = vld [vmem:[%s6359_s24 + $0x14] ss:$8 sps:$4 sm:$0xff]   ;;  %v5012_v12 = vld [vmem:[%s6359_s24 + $0x10] ss:$8 sps:$4 sm:$0xff]   ;;  %v5013_v13 = vld [vmem:[%s6359_s24 + $0x24] ss:$8 sps:$4 sm:$0xff]  }
 0x30b   : > { %1304 = vmatpush1.bf16.msra.mxu0 %v5009_v9  ;;  %v5015_v16 = vld [vmem:[%s6359_s24 + $0x20] ss:$8 sps:$4 sm:$0xff]   ;;  %s5669_s22 = smov 64   ;;  %v5016_v17 = vld [vmem:[%s6359_s24 + $0x34] ss:$8 sps:$4 sm:$0xff]   ;;  %vm1299_vm3 = vcmask 523264  }
 0x30c   : > { %1305 = vmatprep.subr.bf16.mxu0 %v5010_v11  ;;  %v5018_v20 = vld [vmem:[%s6359_s24 + $0x30] ss:$8 sps:$4 sm:$0xff]   ;;  %v6521_v45 = vshrl.u32 %v1249_v43, 7  ;;  %v1247_v49 = vld [vmem:[%s6369_s26] sm:$0x3]  ;;  %vm6585_vm4 = vmpackc.low %vm1299_vm3, %vm1299_vm3  ;;  %s7179_s24 = sld [smem:[#allocation48_spill]] }
 0x30d   : > { %vm1723_vm5 = vcmask 64512   ;;  %s7185_s5 = sld [smem:[#allocation35_spill]] }
 0x30e   : > { %v6428_v22 = vld [vmem:[#allocation2 + $0x8] sm:$0xff]  ;;  %v6524_v48 = vsub.s32 0, %v6521_v45  ;;  %v6528_v51 = vsub.s32 1, %v6521_v45 }
 0x30f   : > { %v6402_v14 = vld [vmem:[%s7176_s10] sm:$0xff]  ;;  %v6407_v15 = vld [vmem:[%s7176_s10 + $0x10] sm:$0xff]  ;;  %1306 = vmatpush1.bf16.msra.mxu0 %v5012_v12  ;;  %v6418_v18 = vld [vmem:[%s7176_s10 + $0x8] sm:$0xff] }
 0x310   : > { %1378 = vrot.lane.b32.xlu0 %v6402_v14, %s5669_s22  ;;  %1307 = vmatprep.subr.bf16.mxu0 %v5013_v13  ;;  %v6423_v19 = vld [vmem:[%s7176_s10 + $0x18] sm:$0xff]  ;;  %v6426_v21 = vld [vmem:[#allocation2] sm:$0xff]  ;;  %v6437_v23 = vld [vmem:[%s7176_s10 + $0x20] sm:$0xff]  ;;  %v1252_v52 = vrot.slane %v1247_v49, %v6524_v48  ;;  %v1256_v55 = vrot.slane %v1247_v49, %v6528_v51 }
 0x311   : > { %1382 = vrot.lane.b32.xlu1 %v6407_v15, %s5669_s22  ;;  %v6442_v24 = vld [vmem:[%s7176_s10 + $0x28] sm:$0xff]  ;;  %v1238_v25 = vpack.c.bf16 %v6428_v22, %v6426_v21  ;;  %v6453_v26 = vld [vmem:[%s7176_s10 + $0x30] sm:$0xff]  ;;  %v6458_v27 = vld [vmem:[%s7176_s10 + $0x38] sm:$0xff] }
 0x312   : > { %v6468_v28 = vld [vmem:[%s7176_s10 + $0x40] sm:$0xff]  ;;  %v6473_v29 = vld [vmem:[%s7176_s10 + $0x48] sm:$0xff]  ;;  %v6482_v30 = vld [vmem:[%s7176_s10 + $0x50] sm:$0xff] }
 0x313   : > { %1308 = vmatpush1.bf16.msra.mxu0 %v5015_v16  ;;  %v6487_v31 = vld [vmem:[%s7176_s10 + $0x58] sm:$0xff]  ;;  %v6496_v32 = vld [vmem:[%s7176_s10 + $0x60] sm:$0xff]  ;;  %v6501_v33 = vld [vmem:[%s7176_s10 + $0x68] sm:$0xff]  ;;  %p4377_p8 = scmp.ne.s32.totalorder %s7185_s5, 5 }
 0x314   : > { %1380 = vrot.lane.b32.xlu0 %v6418_v18, %s5669_s22  ;;  %1309 = vmatprep.subr.bf16.mxu0 %v5016_v17  ;;  %v6510_v34 = vld [vmem:[%s7176_s10 + $0x70] sm:$0xff]  ;;  %v6515_v35 = vld [vmem:[%s7176_s10 + $0x78] sm:$0xff]  ;;  %s7186_s8 = sld [smem:[#allocation44_spill]] (!%p4377_p8)  ;;  %vm5671_vm6 = vmmov (!%p4377_p8), 0   ;;  %vm3673_vm7 = vcmask (!%p4377_p8), 130048   ;;  %vm3835_vm8 = vcmask (!%p4377_p8), 25600  }
 0x315   : > { %1384 = vrot.lane.b32.xlu1 %v6423_v19, %s5669_s22 }
 0x317   : > { %1310 = vmatpush1.bf16.msra.mxu0 %v5018_v20 }
 0x318   : > { %1386 = vrot.lane.b32.xlu0 %v6437_v23, %s5669_s22 }
 0x319   : > { %1388 = vrot.lane.b32.xlu1 %v6442_v24, %s5669_s22 }
 0x31a   : > { %4212 = vmatmul.mubr.msk.bf16.vlgmr.msra.gmra.mrb[0].mxu0 %vm1299_vm3, %v1238_v25 }
 0x31c   : > { %1390 = vrot.lane.b32.xlu0 %v6453_v26, %s5669_s22 }
 0x31d   : > { %1392 = vrot.lane.b32.xlu1 %v6458_v27, %s5669_s22 }
 0x320   : > { %1394 = vrot.lane.b32.xlu0 %v6468_v28, %s5669_s22 }
 0x321   : > { %1396 = vrot.lane.b32.xlu1 %v6473_v29, %s5669_s22 }
 0x324   : > { %1398 = vrot.lane.b32.xlu0 %v6482_v30, %s5669_s22 }
 0x325   : > { %1400 = vrot.lane.b32.xlu1 %v6487_v31, %s5669_s22 }
 0x328   : > { %1402 = vrot.lane.b32.xlu0 %v6496_v32, %s5669_s22 }
 0x329   : > { %1404 = vrot.lane.b32.xlu1 %v6501_v33, %s5669_s22 }
 0x32c   : > { %1406 = vrot.lane.b32.xlu0 %v6510_v34, %s5669_s22 }
 0x32d   : > { %1408 = vrot.lane.b32.xlu1 %v6515_v35, %s5669_s22 }
 0x382   : > { %v1379_v38 = vpop.permute.xlu0 %1378 }
 0x383   : > { %v1383_v36 = vpop.permute.xlu1 %1382 }
 0x386   : > { %v1381_v40 = vpop.permute.xlu0 %1380 }
 0x387   : > { %v1385_v37 = vpop.permute.xlu1 %1384 }
 0x38a   : > { %v1387_v42 = vpop.permute.xlu0 %1386 }
 0x38b   : > { %v1389_v39 = vpop.permute.xlu1 %1388 }
 0x38e   : > { %v1391_v46 = vpop.permute.xlu0 %1390 }
 0x38f   : > { %v1393_v41 = vpop.permute.xlu1 %1392 }
 0x392   : > { %v1395_v50 = vpop.permute.xlu0 %1394 }
 0x393   : > { %v1397_v44 = vpop.permute.xlu1 %1396 }
 0x396   : > { %v1399_v58 = vpop.permute.xlu0 %1398 }
 0x397   : > { %v1401_v47 = vpop.permute.xlu1 %1400 }
 0x39a   : > { %v1403_v16 = vpop.permute.xlu0 %1402 }
 0x39b   : > { %v1405_v53 = vpop.permute.xlu1 %1404 }
 0x39f   : > { %v1409_v2 = vpop.permute.xlu1 %1408 }
 0x3ed   : > { %v1337_v54 = vpop.f32.mrb[0].mxu0 }
 0x3ee   : > { %v1338_v56 = vadd.f32 %v1337_v54, %v1252_v52  ;;  %v1339_v57 = vpop.f32.mrb[1].mxu0 }
 0x3ef   : > { %v1341_v59 = vpop.f32.mrb[2].mxu0  ;;  %v1340_v62 = vadd.f32 %v1339_v57, %v1256_v55 }
 0x3f0   : > { %v6532_v60 = vadd.f32 %v1341_v59, %v1252_v52  ;;  %v1343_v61 = vpop.f32.mrb[3].mxu0  ;;  %4529 = vmatprep.mubr.msk.f32.mxu1 %vm1299_vm3, %v1338_v56  ;;  %v1428_v63 = vmul.f32 %v1383_v36, %v1338_v56  ;;  %v1426_v0 = vmul.f32 %v1379_v38, %v1338_v56  ;;  %v1432_v6 = vmul.f32 %v1391_v46, %v1338_v56 }
 0x3f1   : > { %v1344_v1 = vadd.f32 %v1343_v61, %v1256_v55  ;;  %v1430_v7 = vmul.f32 %v1387_v42, %v1338_v56  ;;  %v1436_v12 = vmul.f32 %v1399_v58, %v1338_v56  ;;  %v1434_v25 = vmul.f32 %v1395_v50, %v1338_v56 }
 0x3f2   : > { %v1429_v3 = vmul.f32 %v1385_v37, %v6532_v60  ;;  %v1427_v4 = vmul.f32 %v1381_v40, %v6532_v60  ;;  %v1433_v5 = vmul.f32 %v1393_v41, %v6532_v60  ;;  %v1431_v8 = vmul.f32 %v1389_v39, %v6532_v60 }
 0x3f3   : > { %v1437_v13 = vmul.f32 %v1401_v47, %v6532_v60  ;;  %v1441_v17 = vmul.f32 %v1409_v2, %v6532_v60  ;;  %v1435_v36 = vmul.f32 %v1397_v44, %v6532_v60  ;;  %v1442_v38 = vmul.f32 %v6402_v14, %v1340_v62 }
 0x3f4   : > { %v4972_v9 = vpack.i.bf16 %v1429_v3, %v1428_v63  ;;  %v4967_v11 = vpack.i.bf16 %v1427_v4, %v1426_v0  ;;  %v4982_v20 = vpack.i.bf16 %v1433_v5, %v1432_v6  ;;  %v4977_v37 = vpack.i.bf16 %v1431_v8, %v1430_v7 }
 0x3f5   : > { %v1443_v39 = vmul.f32 %v6418_v18, %v1344_v1  ;;  %v1444_v40 = vmul.f32 %v6407_v15, %v1340_v62  ;;  %v1445_v41 = vmul.f32 %v6423_v19, %v1344_v1  ;;  %v1446_v42 = vmul.f32 %v6437_v23, %v1340_v62 }
 0x3f6   : > { %4973 = vrot.lane.b32.xlu1 %v4972_v9, %s5669_s22  ;;  %4968 = vrot.lane.b32.xlu0 %v4967_v11, %s5669_s22  ;;  %v1447_v43 = vmul.f32 %v6442_v24, %v1344_v1  ;;  %v4992_v46 = vpack.i.bf16 %v1437_v13, %v1436_v12  ;;  %v1448_v44 = vmul.f32 %v6453_v26, %v1340_v62  ;;  %v1407_v26 = vpop.permute.xlu0 %1406 }
 0x3f7   : > { %v6550_v47 = vpack.c.bf16 %v1443_v39, %v1442_v38  ;;  %v1449_v49 = vmul.f32 %v6458_v27, %v1344_v1  ;;  %v6554_v50 = vpack.c.bf16 %v1445_v41, %v1444_v40  ;;  %v1450_v18 = vmul.f32 %v6468_v28, %v1340_v62 }
 0x3f8   : > { %v6556_v14 = vpack.c.bf16 %v1447_v43, %v1446_v42  ;;  %v1451_v15 = vmul.f32 %v6473_v29, %v1344_v1  ;;  %v1452_v23 = vmul.f32 %v6482_v30, %v1340_v62  ;;  %v1453_v24 = vmul.f32 %v6487_v31, %v1344_v1 }
 0x3f9   : > { %v6562_v19 = vpack.c.bf16 %v1449_v49, %v1448_v44  ;;  %v4987_v27 = vpack.i.bf16 %v1435_v36, %v1434_v25  ;;  %v1454_v54 = vmul.f32 %v6496_v32, %v1340_v62  ;;  %v1455_v28 = vmul.f32 %v6501_v33, %v1344_v1  ;;  %v1631_v49 = vld [vmem:[%s7179_s24] sm:$0xff] }
 0x3fa   : > { %4983 = vrot.lane.b32.xlu1 %v4982_v20, %s5669_s22  ;;  %4978 = vrot.lane.b32.xlu0 %v4977_v37, %s5669_s22  ;;  %v6566_v52 = vpack.c.bf16 %v1451_v15, %v1450_v18  ;;  %v1439_v29 = vmul.f32 %v1405_v53, %v6532_v60  ;;  %v6571_v55 = vpack.c.bf16 %v1453_v24, %v1452_v23  ;;  %v1632_v18 = vld [vmem:[%s7179_s24 + $0x8] sm:$0xff]  ;;  %v1633_v15 = vld [vmem:[%s7179_s24 + $0x10] sm:$0xff] }
 0x3fb   : > { %v1456_v57 = vmul.f32 %v6510_v34, %v1340_v62  ;;  %v1457_v58 = vmul.f32 %v6515_v35, %v1344_v1  ;;  %v6575_v59 = vpack.c.bf16 %v1455_v28, %v1454_v54  ;;  %v1440_v30 = vmul.f32 %v1407_v26, %v1338_v56  ;;  %v1634_v24 = vld [vmem:[%s7179_s24 + $0x18] sm:$0xff]  ;;  %v1637_v28 = vld [vmem:[%s7179_s24 + $0x30] sm:$0xff]  ;;  %v1643_v1 = vld [vmem:[%s7179_s24 + $0x60] sm:$0xff] }
 0x3fc   : > { %v1438_v31 = vmul.f32 %v1403_v16, %v1338_v56  ;;  %v4700_v23 = vpack.c.bf16 %v1632_v18, %v1631_v49  ;;  %v4704_v26 = vpack.c.bf16 %v1634_v24, %v1633_v15 }
 0x3fd   : > { %v6579_v61 = vpack.c.bf16 %v1457_v58, %v1456_v57  ;;  %v5002_v32 = vpack.i.bf16 %v1441_v17, %v1440_v30  ;;  %v1459_v58 = vld [vmem:[#allocation9 + $0x8] sm:$0xff]  ;;  %v1458_v30 = vld [vmem:[#allocation9] sm:$0xff] }
 0x3fe   : > { %4993 = vrot.lane.b32.xlu1 %v4992_v46, %s5669_s22  ;;  %4988 = vrot.lane.b32.xlu0 %v4987_v27, %s5669_s22  ;;  %v4997_v33 = vpack.i.bf16 %v1439_v29, %v1438_v31  ;;  %v1636_v27 = vld [vmem:[%s7179_s24 + $0x28] sm:$0xff]  ;;  %v1638_v29 = vld [vmem:[%s7179_s24 + $0x38] sm:$0xff] }
 0x3ff   : > { %4701 = vmatprep.subr.bf16.mxu0 %v4700_v23  ;;  %v4712_v57 = vpack.c.bf16 %v1638_v29, %v1637_v28 }
 0x400   : > { %4703 = vmatpush3.bf16.msra.mxu0 %v4700_v23 }
 0x401   : > { %4705 = vmatprep.subr.bf16.mxu0 %v4704_v26 }
 0x402   : > { %5003 = vrot.lane.b32.xlu1 %v5002_v32, %s5669_s22  ;;  %4998 = vrot.lane.b32.xlu0 %v4997_v33, %s5669_s22 }
 0x404   : > { %4707 = vmatpush3.bf16.msra.mxu0 %v4704_v26 }
 0x468   : > { %v4974_v53 = vpop.permute.xlu1 %4973  ;;  %v4969_v34 = vpop.permute.xlu0 %4968 }
 0x469   : > { %v4976_v62 = vunpack.i.h.bf16 %v4974_v53  ;;  %v4975_v35 = vunpack.i.l.bf16 %v4974_v53  ;;  %v4971_v63 = vunpack.i.h.bf16 %v4969_v34  ;;  %v4970_v0 = vunpack.i.l.bf16 %v4969_v34  ;;  %v1639_v34 = vld [vmem:[%s7179_s24 + $0x40] sm:$0xff] }
 0x46b   : > { %v4652_v56 = vpack.c.bf16 %v4971_v63, %v4970_v0  ;;  %v4658_v2 = vpack.c.bf16 %v4976_v62, %v4975_v35  ;;  %v1640_v62 = vld [vmem:[%s7179_s24 + $0x48] sm:$0xff]  ;;  %v1641_v63 = vld [vmem:[%s7179_s24 + $0x50] sm:$0xff]  ;;  %v1642_v0 = vld [vmem:[%s7179_s24 + $0x58] sm:$0xff] }
 0x46c   : > { %v4979_v3 = vpop.permute.xlu0 %4978  ;;  %v4984_v7 = vpop.permute.xlu1 %4983  ;;  %v4716_v35 = vpack.c.bf16 %v1640_v62, %v1639_v34  ;;  %v2047_v34 = vld [vmem:[%s6376_s30 + $0x48] sm:$0xff] }
 0x46d   : > { %4654 = vmatprep.subr.msk.bf16.mxu1 %vm6585_vm4, %v4652_v56  ;;  %v4981_v4 = vunpack.i.h.bf16 %v4979_v3  ;;  %v4980_v5 = vunpack.i.l.bf16 %v4979_v3  ;;  %v4986_v8 = vunpack.i.h.bf16 %v4984_v7  ;;  %v4985_v9 = vunpack.i.l.bf16 %v4984_v7  ;;  %v1722_v7 = vld [vmem:[#allocation11] sm:$0xff] }
 0x46e   : > { %4657 = vmatpush3.bf16.xpose.msk.msra.mxu1 %vm6585_vm4, %v4652_v56  ;;  %v4720_v56 = vpack.c.bf16 %v1642_v0, %v1641_v63  ;;  %v2054_v0 = vld [vmem:[%s6376_s30 + $0x80] sm:$0xff] }
 0x46f   : > { %4660 = vmatprep.subr.msk.bf16.mxu1 %vm6585_vm4, %v4658_v2  ;;  %v4664_v6 = vpack.c.bf16 %v4981_v4, %v4980_v5  ;;  %v4670_v11 = vpack.c.bf16 %v4986_v8, %v4985_v9  ;;  %v1645_v4 = vld [vmem:[%s7179_s24 + $0x70] sm:$0xff]  ;;  %v1646_v5 = vld [vmem:[%s7179_s24 + $0x78] sm:$0xff] }
 0x470   : > { %v4989_v12 = vpop.permute.xlu0 %4988  ;;  %v4994_v20 = vpop.permute.xlu1 %4993 }
 0x471   : > { %v4991_v13 = vunpack.i.h.bf16 %v4989_v12  ;;  %v4990_v16 = vunpack.i.l.bf16 %v4989_v12  ;;  %v4996_v25 = vunpack.i.h.bf16 %v4994_v20  ;;  %v4995_v36 = vunpack.i.l.bf16 %v4994_v20 }
 0x473   : > { %v4676_v17 = vpack.c.bf16 %v4991_v13, %v4990_v16  ;;  %v4682_v37 = vpack.c.bf16 %v4996_v25, %v4995_v36 }
 0x474   : > { %v4999_v38 = vpop.permute.xlu0 %4998  ;;  %v5004_v42 = vpop.permute.xlu1 %5003 }
 0x475   : > { %v5001_v39 = vunpack.i.h.bf16 %v4999_v38  ;;  %v5000_v40 = vunpack.i.l.bf16 %v4999_v38  ;;  %v5006_v43 = vunpack.i.h.bf16 %v5004_v42  ;;  %v5005_v46 = vunpack.i.l.bf16 %v5004_v42 }
 0x476   : > { %4663 = vmatpush3.bf16.xpose.msk.msra.mxu1 %vm6585_vm4, %v4658_v2  ;;  %v1644_v2 = vld [vmem:[%s7179_s24 + $0x68] sm:$0xff] }
 0x477   : > { %4666 = vmatprep.subr.msk.bf16.mxu1 %vm6585_vm4, %v4664_v6  ;;  %v4688_v41 = vpack.c.bf16 %v5001_v39, %v5000_v40  ;;  %v4694_v44 = vpack.c.bf16 %v5006_v43, %v5005_v46  ;;  %v4724_v3 = vpack.c.bf16 %v1644_v2, %v1643_v1  ;;  %v4233_v43 = vld [vmem:[%s960_s4] ss:$0 sm:$0xff]  ;;  %v2062_v1 = vld [vmem:[%s6376_s30 + $0xc0] sm:$0xff]  ;;  %s7181_s4 = scalar_lea.vmem [#allocation19], %s6356_s29 }
 0x478   : > { %v4255_v2 = vcombine.high %v2054_v0, %v2062_v1 }
 0x47e   : > { %4669 = vmatpush3.bf16.xpose.msk.msra.mxu1 %vm6585_vm4, %v4664_v6  ;;  %v4728_v6 = vpack.c.bf16 %v1646_v5, %v1645_v4  ;;  %v4254_v4 = vcombine.low %v2054_v0, %v2062_v1 }
 0x47f   : > { %4672 = vmatprep.subr.msk.bf16.mxu1 %vm6585_vm4, %v4670_v11 }
 0x486   : > { %4675 = vmatpush3.bf16.xpose.msk.msra.mxu1 %vm6585_vm4, %v4670_v11 }
 0x487   : > { %4678 = vmatprep.subr.msk.bf16.mxu1 %vm6585_vm4, %v4676_v17 }
 0x48e   : > { %4681 = vmatpush3.bf16.xpose.msk.msra.mxu1 %vm6585_vm4, %v4676_v17 }
 0x48f   : > { %4684 = vmatprep.subr.msk.bf16.mxu1 %vm6585_vm4, %v4682_v37 }
 0x496   : > { %4687 = vmatpush3.bf16.xpose.msk.msra.mxu1 %vm6585_vm4, %v4682_v37 }
 0x497   : > { %4690 = vmatprep.subr.msk.bf16.mxu1 %vm6585_vm4, %v4688_v41 }
 0x49e   : > { %4693 = vmatpush3.bf16.xpose.msk.msra.mxu1 %vm6585_vm4, %v4688_v41 }
 0x49f   : > { %4696 = vmatprep.subr.msk.bf16.mxu1 %vm6585_vm4, %v4694_v44 }
 0x4a6   : > { %4699 = vmatpush3.bf16.xpose.msk.msra.mxu1 %vm6585_vm4, %v4694_v44 }
 0x4ad   : > { %4530 = vmatmul.mubr.msk.f32.vlgmr.msra.gmra.mrb[0].mxu1 %vm1299_vm3, %v6532_v60  ;;  %v1635_v60 = vld [vmem:[%s7179_s24 + $0x20] sm:$0xff] }
 0x4ae   : > { %v4708_v54 = vpack.c.bf16 %v1636_v27, %v1635_v60 }
 0x4b0   : > { %4709 = vmatprep.subr.bf16.mxu0 %v4708_v54 }
 0x4b1   : > { %4711 = vmatpush3.bf16.msra.mxu0 %v4708_v54 }
 0x4b2   : > { %4713 = vmatprep.subr.bf16.mxu0 %v4712_v57 }
 0x4b5   : > { %4715 = vmatpush3.bf16.msra.mxu0 %v4712_v57 }
 0x4b6   : > { %4717 = vmatprep.subr.bf16.mxu0 %v4716_v35 }
 0x4b9   : > { %4719 = vmatpush3.bf16.msra.mxu0 %v4716_v35 }
 0x4ba   : > { %4721 = vmatprep.subr.bf16.mxu0 %v4720_v56 }
 0x4bd   : > { %4723 = vmatpush3.bf16.msra.mxu0 %v4720_v56  ;;  %v2055_v56 = vld [vmem:[%s6376_s30 + $0x88] sm:$0xff] }
 0x4be   : > { %4725 = vmatprep.subr.bf16.mxu0 %v4724_v3 }
 0x4c1   : > { %4727 = vmatpush3.bf16.msra.mxu0 %v4724_v3  ;;  %v2063_v3 = vld [vmem:[%s6376_s30 + $0xc8] sm:$0xff] }
 0x4c2   : > { %4729 = vmatprep.subr.bf16.mxu0 %v4728_v6  ;;  %v4256_v5 = vcombine.low %v2055_v56, %v2063_v3 }
 0x4c5   : > { %4731 = vmatpush3.bf16.msra.mxu0 %v4728_v6  ;;  %v4257_v6 = vcombine.high %v2055_v56, %v2063_v3  ;;  %v2096_v3 = vld [vmem:[%s6376_s30 + $0x1d0] sm:$0xff] }
 0x4c6   : > { %4567 = vmatprep.subr.mxu0 %v1722_v7 }
 0x580   : > { %v4531_v31 = vpop.f32.mrb[0].mxu1 }
 0x581   : > { %v1618_v32 = vadd.f32 %v4531_v31, %v1459_v58  ;;  %v1612_v33 = vpop.f32.mrb[1].mxu1  ;;  %v2038_v31 = vld [vmem:[%s6376_s30] sm:$0xff] }
 0x582   : > { %v1613_v53 = vadd.f32 %v1612_v33, %v1458_v30  ;;  %v2039_v33 = vld [vmem:[%s6376_s30 + $0x8] sm:$0xff] }
 0x583   : > { %1623 = vmax.xlane.f32.xlu1 %v1618_v32  ;;  %v4240_v35 = vcombine.low %v2039_v33, %v2047_v34  ;;  %v4241_v63 = vcombine.high %v2039_v33, %v2047_v34  ;;  %v2080_v34 = vld [vmem:[%s6376_s30 + $0x150] sm:$0xff] }
 0x584   : > { %1621 = vmax.xlane.f32.xlu0 %v1613_v53 }
 0x610   : > { %v1624_v8 = vpop.xlane.xlu1 %1623 }
 0x611   : > { %v1626_v9 = vsub.f32 %v1618_v32, %v1624_v8  ;;  %v1622_v11 = vpop.xlane.xlu0 %1621  ;;  %v2046_v32 = vld [vmem:[%s6376_s30 + $0x40] sm:$0xff] }
 0x612   : > { %v1625_v12 = vsub.f32 %v1613_v53, %v1622_v11  ;;  %v4239_v53 = vcombine.high %v2038_v31, %v2046_v32  ;;  %v4238_v62 = vcombine.low %v2038_v31, %v2046_v32  ;;  %v2078_v8 = vld [vmem:[%s6376_s30 + $0x140] sm:$0xff] }
 0x613   : > { %v1629_v13 = vmul.f32 1.442695, %v1626_v9  ;;  %v2071_v9 = vld [vmem:[%s6376_s30 + $0x108] sm:$0xff] }
 0x614   : > { %v1627_v16 = vmul.f32 1.442695, %v1625_v12 }
 0x616   : > { %5019 = vpow2.f32 %v1627_v16  ;;  %v2086_v16 = vld [vmem:[%s6376_s30 + $0x180] sm:$0xff] }
 0x617   : > { %5021 = vpow2.f32 %v1629_v13  ;;  %v2079_v13 = vld [vmem:[%s6376_s30 + $0x148] sm:$0xff] }
 0x620   : > { %v5020_v17 = vpop.eup %5019 }
 0x621   : > { %v5022_v20 = vpop.eup %5021  ;;  %4564 = vmatprep.mubr.f32.mxu0 %v5020_v17 }
 0x622   : > { %4565 = vmatmul.mubr.f32.vlgmr.msra.gmra.mrb[4].mxu0 %v5022_v20 }
 0x623   : > { %4568 = vmatpush3.msra.mxu0 %v1722_v7  ;;  %v2070_v7 = vld [vmem:[%s6376_s30 + $0x100] sm:$0xff] }
 0x624   : > { %4733 = vmatprep.subr.bf16.mxu0 %v6550_v47  ;;  %v4270_v11 = vcombine.low %v2070_v7, %v2078_v8  ;;  %v4271_v12 = vcombine.high %v2070_v7, %v2078_v8 }
 0x6f5   : > { %v4566_v25 = vpop.f32.mrb[4].mxu0 }
 0x6f6   : > { %v1713_v36 = vpop.f32.mrb[5].mxu0 }
 0x6f7   : > { %4569 = vmatprep.mubr.msk.f32.mxu0 %vm1723_vm5, %v1713_v36 }
 0x6f8   : > { %4570 = vmatmul.mubr.msk.f32.vlgmr.msra.gmra.mrb[6].mxu0 %vm1723_vm5, %v4566_v25  ;;  %v4273_v25 = vcombine.high %v2071_v9, %v2079_v13 }
 0x6f9   : > { %4735 = vmatpush3.bf16.msra.mxu0 %v6550_v47  ;;  %4604 = vmatprep.mubr.f32.mxu0 %v5020_v17  ;;  %v4392_v47 = vld [vmem:[%s6371_s27] sm:$0xff]  }
 0x6fa   : > { %4737 = vmatprep.subr.bf16.mxu0 %v6554_v50  ;;  %4765 = vmatprep.subr.bf16.mxu1 %v4392_v47  ;;  %v2094_v17 = vld [vmem:[%s6376_s30 + $0x1c0] sm:$0xff] }
 0x6fb   : > { %4767 = vmatpush3.bf16.msra.mxu1 %v4392_v47  ;;  %v4287_v36 = vcombine.high %v2086_v16, %v2094_v17  ;;  %v2087_v47 = vld [vmem:[%s6376_s30 + $0x188] sm:$0xff] }
 0x6fd   : > { %4739 = vmatpush3.bf16.msra.mxu0 %v6554_v50  ;;  %v4407_v50 = vld [vmem:[%s6371_s27 + $0x8] sm:$0xff]  }
 0x6fe   : > { %4741 = vmatprep.subr.bf16.mxu0 %v6556_v14  ;;  %4769 = vmatprep.subr.bf16.mxu1 %v4407_v50 }
 0x6ff   : > { %4771 = vmatpush3.bf16.msra.mxu1 %v4407_v50  ;;  %v2095_v50 = vld [vmem:[%s6376_s30 + $0x1c8] sm:$0xff] }
 0x701   : > { %4743 = vmatpush3.bf16.msra.mxu0 %v6556_v14  ;;  %v4408_v14 = vld [vmem:[%s6371_s27 + $0x10] sm:$0xff]  }
 0x702   : > { %4745 = vmatprep.subr.bf16.mxu0 %v6562_v19  ;;  %4773 = vmatprep.subr.bf16.mxu1 %v4408_v14 }
 0x703   : > { %4775 = vmatpush3.bf16.msra.mxu1 %v4408_v14  ;;  %v2040_v14 = vld [vmem:[%s6376_s30 + $0x10] sm:$0xff] }
 0x705   : > { %4747 = vmatpush3.bf16.msra.mxu0 %v6562_v19  ;;  %v4409_v19 = vld [vmem:[%s6371_s27 + $0x18] sm:$0xff]   ;;  %s7180_s27 = scalar_lea.vmem [#allocation18], %s6356_s29 }
 0x706   : > { %4749 = vmatprep.subr.bf16.mxu0 %v6566_v52  ;;  %4777 = vmatprep.subr.bf16.mxu1 %v4409_v19 }
 0x707   : > { %4779 = vmatpush3.bf16.msra.mxu1 %v4409_v19  ;;  %v4289_v19 = vcombine.high %v2087_v47, %v2095_v50 }
 0x708   : > { %2509 = vmatprep.subr.bf16.mxu1 %v4239_v53 }
 0x709   : > { %4751 = vmatpush3.bf16.msra.mxu0 %v6566_v52 }
 0x70a   : > { %4753 = vmatprep.subr.bf16.mxu0 %v6571_v55 }
 0x70d   : > { %4755 = vmatpush3.bf16.msra.mxu0 %v6571_v55 }
 0x70e   : > { %4757 = vmatprep.subr.bf16.mxu0 %v6575_v59 }
 0x711   : > { %4759 = vmatpush3.bf16.msra.mxu0 %v6575_v59 }
 0x712   : > { %4761 = vmatprep.subr.bf16.mxu0 %v6579_v61 }
 0x715   : > { %4763 = vmatpush3.bf16.msra.mxu0 %v6579_v61 }
 0x716   : > { %2552 = vmatprep.subr.bf16.mxu0 %v4241_v63 }
 0x718   : > { %4605 = vmatmul.mubr.f32.vlgmr.msra.gmra.mrb[8].mxu0 %v5022_v20  ;;  %v4272_v20 = vcombine.low %v2071_v9, %v2079_v13  ;;  %v2043_v13 = vld [vmem:[%s6376_s30 + $0x28] sm:$0xff] }
 0x719   : > { %2584 = vmatprep.mubr.bf16.mxu0 %v5668_v10  ;;  %2553 = vmatpush1.bf16.msra.mxu0 %v4240_v35  ;;  %v2081_v35 = vld [vmem:[%s6376_s30 + $0x158] sm:$0xff] }
 0x71a   : > { %2554 = vmatprep.subr.bf16.mxu0 %v4257_v6 }
 0x71d   : > { %2555 = vmatpush1.bf16.msra.mxu0 %v4256_v5  ;;  %v2097_v5 = vld [vmem:[%s6376_s30 + $0x1d8] sm:$0xff] }
 0x71e   : > { %2556 = vmatprep.subr.bf16.mxu0 %v4273_v25 }
 0x721   : > { %2557 = vmatpush1.bf16.msra.mxu0 %v4272_v20 }
 0x722   : > { %2558 = vmatprep.subr.bf16.mxu0 %v4289_v19  ;;  %v2067_v19 = vld [vmem:[%s6376_s30 + $0xe8] sm:$0xff] }
 0x7cb   : > { %v4571_v52 = vpop.f32.mrb[6].mxu0 }
 0x7cc   : > { %v1796_v55 = vpop.f32.mrb[7].mxu0  ;;  %v1881_v59 = vmax.f32 %v4571_v52, 1e-30  ;;  %v2048_v52 = vld [vmem:[%s6376_s30 + $0x50] sm:$0xff] }
 0x7cd   : > { %v1880_v61 = vmax.f32 %v1796_v55, 1e-30  ;;  %v2041_v55 = vld [vmem:[%s6376_s30 + $0x18] sm:$0xff] }
 0x7ce   : > { %5023 = vrcp.f32 %v1881_v59  ;;  %v2049_v59 = vld [vmem:[%s6376_s30 + $0x58] sm:$0xff] }
 0x7cf   : > { %5025 = vrcp.f32 %v1880_v61  ;;  %v4286_v61 = vcombine.low %v2086_v16, %v2094_v17  ;;  %v2051_v16 = vld [vmem:[%s6376_s30 + $0x68] sm:$0xff] }
 0x7d8   : > { %v5024_v37 = vpop.eup %5023 }
 0x7d9   : > { %v5026_v39 = vpop.eup %5025 }
 0x7eb   : > { %v4606_v38 = vpop.f32.mrb[8].mxu0 }
 0x7ec   : > { %v1885_v40 = vmul.f32 %v5024_v37, %v4606_v38  ;;  %v1871_v41 = vpop.f32.mrb[9].mxu0  ;;  %v4242_v37 = vcombine.low %v2040_v14, %v2048_v52  ;;  %v4244_v38 = vcombine.low %v2041_v55, %v2049_v59 }
 0x7ed   : > { %v1884_v42 = vmul.f32 %v5026_v39, %v1871_v41  ;;  %v4288_v39 = vcombine.low %v2087_v47, %v2095_v50  ;;  %v4245_v41 = vcombine.high %v2041_v55, %v2049_v59  ;;  %v2058_v47 = vld [vmem:[%s6376_s30 + $0xa0] sm:$0xff]  ;;  %v4248_v55 = vcombine.low %v2043_v13, %v2051_v16 }
 0x7ee   : > { %v2066_v50 = vld [vmem:[%s6376_s30 + $0xe0] sm:$0xff] }
 0x7ef   : > { %4623 = vmatprep.mubr.msk.f32.mxu1 %vm1299_vm3, %v1884_v42  ;;  %2559 = vmatpush1.bf16.msra.mxu0 %v4288_v39  ;;  %v4263_v59 = vcombine.high %v2058_v47, %v2066_v50  ;;  %v2075_v39 = vld [vmem:[%s6376_s30 + $0x128] sm:$0xff] }
 0x7f0   : > { %4624 = vmatmul.mubr.msk.f32.vlgmr.msra.gmra.mrb[2].mxu1 %vm1299_vm3, %v1885_v40  ;;  %v4243_v40 = vcombine.high %v2040_v14, %v2048_v52  ;;  %2638 = vmatprep.subr.bf16.mxu0 %v4245_v41  ;;  %v2059_v14 = vld [vmem:[%s6376_s30 + $0xa8] sm:$0xff]  ;;  %v4262_v41 = vcombine.low %v2058_v47, %v2066_v50  ;;  %v2909_v47 = vld [vmem:[%s6380_s7 + $0x40] sm:$0xff] }
 0x7f1   : > { %2541 = vmatprep.mubr.bf16.mxu1 %v5668_v10  ;;  %2510 = vmatpush1.bf16.msra.mxu1 %v4238_v62  ;;  %v2073_v62 = vld [vmem:[%s6376_s30 + $0x118] sm:$0xff]  ;;  %v2902_v50 = vld [vmem:[%s6380_s7 + $0x8] sm:$0xff] }
 0x7f2   : > { %2511 = vmatprep.subr.bf16.mxu1 %v4255_v2  ;;  %v4277_v56 = vcombine.high %v2073_v62, %v2081_v35  ;;  %v2088_v2 = vld [vmem:[%s6376_s30 + $0x190] sm:$0xff]  ;;  %v4276_v7 = vcombine.low %v2073_v62, %v2081_v35  ;;  %v2069_v62 = vld [vmem:[%s6376_s30 + $0xf8] sm:$0xff] }
 0x7f3   : > { %v4291_v8 = vcombine.high %v2088_v2, %v2096_v3  ;;  %v4290_v17 = vcombine.low %v2088_v2, %v2096_v3  ;;  %v2084_v2 = vld [vmem:[%s6376_s30 + $0x170] sm:$0xff]  ;;  %v2077_v3 = vld [vmem:[%s6376_s30 + $0x138] sm:$0xff] }
 0x7f5   : > { %2512 = vmatpush1.bf16.msra.mxu1 %v4254_v4  ;;  %v2089_v4 = vld [vmem:[%s6376_s30 + $0x198] sm:$0xff] }
 0x7f6   : > { %2513 = vmatprep.subr.bf16.mxu1 %v4271_v12  ;;  %v4293_v9 = vcombine.high %v2089_v4, %v2097_v5  ;;  %v2050_v12 = vld [vmem:[%s6376_s30 + $0x60] sm:$0xff]  ;;  %v4292_v20 = vcombine.low %v2089_v4, %v2097_v5  ;;  %v2085_v4 = vld [vmem:[%s6376_s30 + $0x178] sm:$0xff] }
 0x7f9   : > { %2514 = vmatpush1.bf16.msra.mxu1 %v4270_v11  ;;  %v2042_v11 = vld [vmem:[%s6376_s30 + $0x20] sm:$0xff] }
 0x7fa   : > { %2515 = vmatprep.subr.bf16.mxu1 %v4287_v36  ;;  %v4247_v25 = vcombine.high %v2042_v11, %v2050_v12  ;;  %v4249_v36 = vcombine.high %v2043_v13, %v2051_v16  ;;  %v4246_v52 = vcombine.low %v2042_v11, %v2050_v12  ;;  %v2100_v11 = vld [vmem:[%s6376_s30 + $0x1f0] sm:$0xff]  ;;  %v2093_v12 = vld [vmem:[%s6376_s30 + $0x1b8] sm:$0xff] }
 0x7fb   : > { %v2101_v13 = vld [vmem:[%s6376_s30 + $0x1f8] sm:$0xff] }
 0x7fd   : > { %2516 = vmatpush1.bf16.msra.mxu1 %v4286_v61  ;;  %v4265_v61 = vcombine.high %v2059_v14, %v2067_v19 }
 0x7fe   : > { %2595 = vmatprep.subr.bf16.mxu1 %v4243_v40  ;;  %v2083_v40 = vld [vmem:[%s6376_s30 + $0x168] sm:$0xff] }
 0x8c3   : > { %v4625_v46 = vpop.f32.mrb[2].mxu1 }
 0x8c4   : > { %v1981_v44 = vpop.f32.mrb[3].mxu1  ;;  %v1987_v49 = vadd.f32 %v4625_v46, %v4233_v43 }
 0x8c5   : > { %v1982_v18 = vadd.f32 %v4233_v43, %v1981_v44 }
 0x8c6   : > { %v1991_v24 = vadd.f32 %v1987_v49, %v6428_v22 }
 0x8c7   : > { %v1990_v15 = vadd.f32 %v1982_v18, %v6426_v21 }
 0x8c8   : > { %v1997_v26 = vsel %vm1299_vm3, %v1991_v24, 0.0 }
 0x8c9   : > { %v1994_v23 = vsel %vm1299_vm3, %v1990_v15, 0.0 }
 0x8ca   : > { %1995 = vadd.xlane.f32.xlu0 %v1994_v23 }
 0x8ce   : > { %1998 = vadd.xlane.f32.xlu0 %v1997_v26 }
 0x957   : > { %v1996_v60 = vpop.xlane.xlu0 %1995 }
 0x958   : > { %v2001_v27 = vmul.f32 0.015625, %v1996_v60 }
 0x95a   : > { %v6701_v54 = vsub.f32 %v1990_v15, %v2001_v27 }
 0x95b   : > { %v1999_v28 = vpop.xlane.xlu0 %1998 }
 0x95c   : > { %v2002_v29 = vmul.f32 0.015625, %v1999_v28  ;;  %v2005_v21 = vmul.f32 %v6701_v54, %v6701_v54  ;;  %v4237_v28 = vld [vmem:[%s7181_s4] ss:$0 sm:$0xff] }
 0x95e   : > { %v6705_v57 = vsub.f32 %v1991_v24, %v2002_v29  ;;  %v2007_v22 = vsel %vm1299_vm3, %v2005_v21, 0.0  ;;  %v4236_v24 = vld [vmem:[%s7180_s27] ss:$0 sm:$0xff] }
 0x95f   : > { %2008 = vadd.xlane.f32.xlu1 %v2007_v22  ;;  %v2056_v21 = vld [vmem:[%s6376_s30 + $0x90] sm:$0xff] }
 0x960   : > { %v2006_v58 = vmul.f32 %v6705_v57, %v6705_v57  ;;  %v2064_v22 = vld [vmem:[%s6376_s30 + $0xd0] sm:$0xff] }
 0x961   : > { %v4259_v33 = vcombine.high %v2056_v21, %v2064_v22  ;;  %v4258_v63 = vcombine.low %v2056_v21, %v2064_v22  ;;  %v2053_v21 = vld [vmem:[%s6376_s30 + $0x78] sm:$0xff] }
 0x962   : > { %v2010_v30 = vsel %vm1299_vm3, %v2006_v58, 0.0  ;;  %v2057_v58 = vld [vmem:[%s6376_s30 + $0x98] sm:$0xff] }
 0x963   : > { %2011 = vadd.xlane.f32.xlu0 %v2010_v30  ;;  %v2065_v30 = vld [vmem:[%s6376_s30 + $0xd8] sm:$0xff] }
 0x964   : > { %v4261_v53 = vcombine.high %v2057_v58, %v2065_v30  ;;  %v4260_v0 = vcombine.low %v2057_v58, %v2065_v30 }
 0x9ec   : > { %v2009_v42 = vpop.xlane.xlu1 %2008 }
 0x9ed   : > { %v2013_v43 = vmul.f32 0.015625, %v2009_v42  ;;  %v4264_v42 = vcombine.low %v2059_v14, %v2067_v19  ;;  %v2910_v14 = vld [vmem:[%s6380_s7 + $0x48] sm:$0xff] }
 0x9ef   : > { %v2015_v46 = vadd.f32 1e-05, %v2013_v43 }
 0x9f0   : > { %v2012_v44 = vpop.xlane.xlu0 %2011 }
 0x9f1   : > { %5027 = vrsqrt.f32 %v2015_v46  ;;  %v2014_v49 = vmul.f32 0.015625, %v2012_v44  ;;  %v4281_v46 = vcombine.high %v2075_v39, %v2083_v40  ;;  %v2090_v44 = vld [vmem:[%s6376_s30 + $0x1a0] sm:$0xff] }
 0x9f3   : > { %v2016_v18 = vadd.f32 1e-05, %v2014_v49  ;;  %v2098_v49 = vld [vmem:[%s6376_s30 + $0x1e0] sm:$0xff] }
 0x9f4   : > { %v4294_v22 = vcombine.low %v2090_v44, %v2098_v49 }
 0x9f5   : > { %5029 = vrsqrt.f32 %v2016_v18  ;;  %v2091_v18 = vld [vmem:[%s6376_s30 + $0x1a8] sm:$0xff] }
 0x9fb   : > { %v5028_v15 = vpop.eup %5027 }
 0x9fc   : > { %v2019_v23 = vmul.f32 %v5028_v15, %v6701_v54  ;;  %v2099_v15 = vld [vmem:[%s6376_s30 + $0x1e8] sm:$0xff] }
 0x9fd   : > { %v4296_v58 = vcombine.low %v2091_v18, %v2099_v15 }
 0x9fe   : > { %v2027_v60 = vmul.f32 %v4236_v24, %v2019_v23 }
 0x9ff   : > { %v5030_v26 = vpop.eup %5029 }
 0xa00   : > { %v2020_v27 = vmul.f32 %v5030_v26, %v6705_v57  ;;  %v6741_v31 = vadd.f32 %v4237_v28, %v2027_v60  ;;  %v2072_v57 = vld [vmem:[%s6376_s30 + $0x110] sm:$0xff]  ;;  %v4295_v26 = vcombine.high %v2090_v44, %v2098_v49  ;;  %v4297_v60 = vcombine.high %v2091_v18, %v2099_v15  ;;  %v2934_v44 = vld [vmem:[%s6380_s7 + $0x108] sm:$0xff] }
 0xa01   : > { %v4275_v1 = vcombine.high %v2072_v57, %v2080_v34  ;;  %v4274_v6 = vcombine.low %v2072_v57, %v2080_v34  ;;  %v2068_v57 = vld [vmem:[%s6376_s30 + $0xf0] sm:$0xff]  ;;  %v2061_v34 = vld [vmem:[%s6376_s30 + $0xb8] sm:$0xff]  ;;  %v2942_v49 = vld [vmem:[%s6380_s7 + $0x148] sm:$0xff] }
 0xa02   : > { %v2028_v29 = vmul.f32 %v4236_v24, %v2020_v27  ;;  %v4280_v24 = vcombine.low %v2075_v39, %v2083_v40  ;;  %v2044_v27 = vld [vmem:[%s6376_s30 + $0x30] sm:$0xff]  ;;  %v4313_v40 = vcombine.low %v2902_v50, %v2910_v14 }
 0xa04   : > { %v6743_v54 = vadd.f32 %v4237_v28, %v2028_v29  ;;  %v2052_v28 = vld [vmem:[%s6376_s30 + $0x70] sm:$0xff]  ;;  %v2045_v29 = vld [vmem:[%s6376_s30 + $0x38] sm:$0xff] }
 0xa05   : > { %v4251_v30 = vcombine.high %v2044_v27, %v2052_v28  ;;  %v4250_v35 = vcombine.low %v2044_v27, %v2052_v28  ;;  %v2957_v27 = vld [vmem:[%s6380_s7 + $0x1c0] sm:$0xff]  ;;  %v2950_v28 = vld [vmem:[%s6380_s7 + $0x188] sm:$0xff] }
 0xa06   : > { %v6747_v32 = vpack.c.bf16 %v6743_v54, %v6741_v31 }
 0xa08   : > { %4302 = vmatmul.mubr.msk.bf16.vlgmr.msra.gmra.mrb[4].mxu1 %vm1299_vm3, %v6747_v32  ;;  %4303 = vmatmul.mubr.msk.bf16.vlgmr.msra.gmra.mrb[12].mxu0 %vm1299_vm3, %v6747_v32 }
 0xa09   : > { %2596 = vmatpush1.bf16.msra.mxu1 %v4242_v37  ;;  %2639 = vmatpush1.bf16.msra.mxu0 %v4244_v38  ;;  %v2074_v37 = vld [vmem:[%s6376_s30 + $0x120] sm:$0xff] }
 0xa0a   : > { %2597 = vmatprep.subr.bf16.mxu1 %v4259_v33  ;;  %2640 = vmatprep.subr.bf16.mxu0 %v4261_v53  ;;  %v2082_v38 = vld [vmem:[%s6376_s30 + $0x160] sm:$0xff]  ;;  %v4253_v33 = vcombine.high %v2045_v29, %v2053_v21  ;;  %v2060_v53 = vld [vmem:[%s6376_s30 + $0xb0] sm:$0xff] }
 0xa0b   : > { %2627 = vmatprep.mubr.bf16.mxu1 %v5668_v10  ;;  %2670 = vmatprep.mubr.bf16.mxu0 %v5668_v10  ;;  %v4279_v43 = vcombine.high %v2074_v37, %v2082_v38  ;;  %v4278_v23 = vcombine.low %v2074_v37, %v2082_v38  ;;  %v4266_v5 = vcombine.low %v2060_v53, %v2068_v57  ;;  %v2918_v37 = vld [vmem:[%s6380_s7 + $0x88] sm:$0xff] }
 0xa0c   : > { %v2926_v38 = vld [vmem:[%s6380_s7 + $0xc8] sm:$0xff] }
 0xa0d   : > { %2598 = vmatpush1.bf16.msra.mxu1 %v4258_v63  ;;  %2641 = vmatpush1.bf16.msra.mxu0 %v4260_v0  ;;  %v4252_v63 = vcombine.low %v2045_v29, %v2053_v21  ;;  %v4267_v0 = vcombine.high %v2060_v53, %v2068_v57  ;;  %v6831_v53 = vld [vmem:[%s6380_s7 + $0x50] sm:$0xff]  ;;  %v6834_v57 = vld [vmem:[%s6380_s7 + $0x18] sm:$0xff] }
 0xa0e   : > { %2599 = vmatprep.subr.bf16.mxu1 %v4275_v1  ;;  %2642 = vmatprep.subr.bf16.mxu0 %v4277_v56  ;;  %v4269_v1 = vcombine.high %v2061_v34, %v2069_v62  ;;  %v2076_v56 = vld [vmem:[%s6376_s30 + $0x130] sm:$0xff] }
 0xa0f   : > { %v4282_v16 = vcombine.low %v2076_v56, %v2084_v2 }
 0xa11   : > { %2600 = vmatpush1.bf16.msra.mxu1 %v4274_v6  ;;  %2643 = vmatpush1.bf16.msra.mxu0 %v4276_v7  ;;  %v4268_v6 = vcombine.low %v2061_v34, %v2069_v62  ;;  %v4283_v7 = vcombine.high %v2076_v56, %v2084_v2  ;;  %v6845_v56 = vld [vmem:[%s6378_s23 + $0x8] sm:$0xff] }
 0xa12   : > { %2601 = vmatprep.subr.bf16.mxu1 %v4291_v8  ;;  %2644 = vmatprep.subr.bf16.mxu0 %v4293_v9  ;;  %v4285_v8 = vcombine.high %v2077_v3, %v2085_v4  ;;  %v2092_v9 = vld [vmem:[%s6376_s30 + $0x1b0] sm:$0xff]  ;;  %s7182_s30 = scalar_lea.vmem [#allocation23], %s6356_s29 }
 0xa13   : > { %v4298_v19 = vcombine.low %v2092_v9, %v2100_v11 }
 0xa15   : > { %2602 = vmatpush1.bf16.msra.mxu1 %v4290_v17  ;;  %2645 = vmatpush1.bf16.msra.mxu0 %v4292_v20  ;;  %v4284_v17 = vcombine.low %v2077_v3, %v2085_v4  ;;  %v4299_v20 = vcombine.high %v2092_v9, %v2100_v11  ;;  %v2116_v3 = vsub.s32 2, %v6521_v45  ;;  %v2102_v4 = vld [vmem:[%s6378_s23] sm:$0xff]  ;;  %s7183_s23 = scalar_lea.vmem [#allocation24], %s6356_s29 }
 0xa16   : > { %2681 = vmatprep.subr.bf16.mxu1 %v4247_v25  ;;  %2724 = vmatprep.subr.bf16.mxu0 %v4249_v36  ;;  %v4301_v25 = vcombine.high %v2093_v12, %v2101_v13  ;;  %v2901_v36 = vld [vmem:[%s6380_s7] sm:$0xff] }
 0xa17   : > { %v4311_v39 = vcombine.low %v2901_v36, %v2909_v47 }
 0xa18   : > { %4304 = vmatmul.mubr.msk.bf16.vlgmr.msra.gmra.mrb[8].mxu1 %vm1299_vm3, %v6747_v32  ;;  %4305 = vmatmul.mubr.msk.bf16.vlgmr.msra.gmra.mrb[16].mxu0 %vm1299_vm3, %v6747_v32 }
 0xa19   : > { %2682 = vmatpush1.bf16.msra.mxu1 %v4246_v52  ;;  %2725 = vmatpush1.bf16.msra.mxu0 %v4248_v55  ;;  %v4312_v52 = vcombine.high %v2901_v36, %v2909_v47  ;;  %v4314_v55 = vcombine.high %v2902_v50, %v2910_v14 }
 0xa1a   : > { %2683 = vmatprep.subr.bf16.mxu1 %v4263_v59  ;;  %2726 = vmatprep.subr.bf16.mxu0 %v4265_v61  ;;  %v2917_v59 = vld [vmem:[%s6380_s7 + $0x80] sm:$0xff] }
 0xa1b   : > { %2713 = vmatprep.mubr.bf16.mxu1 %v5668_v10  ;;  %2756 = vmatprep.mubr.bf16.mxu0 %v5668_v10  ;;  %v2925_v61 = vld [vmem:[%s6380_s7 + $0xc0] sm:$0xff] }
 0xa1c   : > { %v4327_v18 = vcombine.low %v2917_v59, %v2925_v61 }
 0xa1d   : > { %2684 = vmatpush1.bf16.msra.mxu1 %v4262_v41  ;;  %2727 = vmatpush1.bf16.msra.mxu0 %v4264_v42  ;;  %v4328_v41 = vcombine.high %v2917_v59, %v2925_v61  ;;  %v4330_v42 = vcombine.high %v2918_v37, %v2926_v38 }
 0xa1e   : > { %2685 = vmatprep.subr.bf16.mxu1 %v4279_v43  ;;  %2728 = vmatprep.subr.bf16.mxu0 %v4281_v46  ;;  %v2933_v43 = vld [vmem:[%s6380_s7 + $0x100] sm:$0xff] }
 0xa1f   : > { %v2941_v46 = vld [vmem:[%s6380_s7 + $0x140] sm:$0xff] }
 0xa20   : > { %v4344_v15 = vcombine.high %v2933_v43, %v2941_v46 }
 0xa21   : > { %2686 = vmatpush1.bf16.msra.mxu1 %v4278_v23  ;;  %2729 = vmatpush1.bf16.msra.mxu0 %v4280_v24  ;;  %v4346_v23 = vcombine.high %v2934_v44, %v2942_v49  ;;  %v4343_v24 = vcombine.low %v2933_v43, %v2941_v46 }
 0xa22   : > { %2687 = vmatprep.subr.bf16.mxu1 %v4295_v26  ;;  %2730 = vmatprep.subr.bf16.mxu0 %v4297_v60  ;;  %v4345_v26 = vcombine.low %v2934_v44, %v2942_v49  ;;  %v2949_v60 = vld [vmem:[%s6380_s7 + $0x180] sm:$0xff]  ;;  %v2920_v49 = vld [vmem:[%s6380_s7 + $0x98] sm:$0xff] }
 0xa23   : > { %v4359_v29 = vcombine.low %v2949_v60, %v2957_v27  ;;  %v4360_v21 = vcombine.high %v2949_v60, %v2957_v27 }
 0xa25   : > { %2688 = vmatpush1.bf16.msra.mxu1 %v4294_v22  ;;  %2731 = vmatpush1.bf16.msra.mxu0 %v4296_v58  ;;  %v2958_v22 = vld [vmem:[%s6380_s7 + $0x1c8] sm:$0xff] }
 0xa26   : > { %2767 = vmatprep.subr.bf16.mxu1 %v4251_v30  ;;  %2810 = vmatprep.subr.bf16.mxu0 %v4253_v33  ;;  %v4361_v58 = vcombine.low %v2950_v28, %v2958_v22  ;;  %v4362_v30 = vcombine.high %v2950_v28, %v2958_v22  ;;  %v6828_v33 = vld [vmem:[%s6380_s7 + $0x10] sm:$0xff]  ;;  %v2128_v28 = vsub.s32 5, %v6521_v45 }
 0xa27   : > { %v4315_v34 = vcombine.low %v6828_v33, %v6831_v53  ;;  %v4316_v62 = vcombine.high %v6828_v33, %v6831_v53  ;;  %v2943_v53 = vld [vmem:[%s6380_s7 + $0x150] sm:$0xff] }
 0xa28   : > { %4306 = vmatmul.mubr.msk.bf16.vlgmr.msra.gmra.mrb[12].mxu1 %vm1299_vm3, %v6747_v32  ;;  %4307 = vmatmul.mubr.msk.bf16.vlgmr.msra.gmra.mrb[20].mxu0 %vm1299_vm3, %v6747_v32 }
 0xa29   : > { %2768 = vmatpush1.bf16.msra.mxu1 %v4250_v35  ;;  %2811 = vmatpush1.bf16.msra.mxu0 %v4252_v63  ;;  %v2912_v35 = vld [vmem:[%s6380_s7 + $0x58] sm:$0xff] }
 0xa2a   : > { %2769 = vmatprep.subr.bf16.mxu1 %v4267_v0  ;;  %2812 = vmatprep.subr.bf16.mxu0 %v4269_v1  ;;  %v4317_v63 = vcombine.low %v6834_v57, %v2912_v35  ;;  %v4318_v0 = vcombine.high %v6834_v57, %v2912_v35  ;;  %v2132_v1 = vsub.s32 6, %v6521_v45  ;;  %v2936_v57 = vld [vmem:[%s6380_s7 + $0x118] sm:$0xff] }
 0xa2b   : > { %2799 = vmatprep.mubr.bf16.mxu1 %v5668_v10  ;;  %2842 = vmatprep.mubr.bf16.mxu0 %v5668_v10  ;;  %v4300_v10 = vcombine.low %v2093_v12, %v2101_v13 }
 0xa2c   : > { %v6848_v2 = vrot.slane %v6845_v56, %v2132_v1  ;;  %v2133_v22 = vrot.slane %v2102_v4, %v2132_v1 }
 0xa2d   : > { %2770 = vmatpush1.bf16.msra.mxu1 %v4266_v5  ;;  %2813 = vmatpush1.bf16.msra.mxu0 %v4268_v6  ;;  %v2120_v5 = vsub.s32 3, %v6521_v45  ;;  %v2109_v6 = vrot.slane %v2102_v4, %v6524_v48 }
 0xa2e   : > { %2771 = vmatprep.subr.bf16.mxu1 %v4283_v7  ;;  %2814 = vmatprep.subr.bf16.mxu0 %v4285_v8  ;;  %v2117_v7 = vrot.slane %v2102_v4, %v2116_v3  ;;  %v2113_v8 = vrot.slane %v2102_v4, %v6528_v51 }
 0xa2f   : > { %v2121_v9 = vrot.slane %v2102_v4, %v2120_v5 }
 0xa31   : > { %2772 = vmatpush1.bf16.msra.mxu1 %v4282_v16  ;;  %2815 = vmatpush1.bf16.msra.mxu0 %v4284_v17 }
 0xa32   : > { %2773 = vmatprep.subr.bf16.mxu1 %v4299_v20  ;;  %2816 = vmatprep.subr.bf16.mxu0 %v4301_v25 }
 0xa35   : > { %2774 = vmatpush1.bf16.msra.mxu1 %v4298_v19  ;;  %2817 = vmatpush1.bf16.msra.mxu0 %v4300_v10 }
 0xa36   : > { %3292 = vmatprep.subr.bf16.mxu1 %v4312_v52  ;;  %3333 = vmatprep.subr.bf16.mxu0 %v4314_v55 }
 0xa38   : > { %4308 = vmatmul.mubr.msk.bf16.vlgmr.msra.gmra.mrb[16].mxu1 %vm1299_vm3, %v6747_v32  ;;  %4309 = vmatmul.mubr.msk.bf16.vlgmr.msra.gmra.mrb[24].mxu0 %vm1299_vm3, %v6747_v32  ;;  %v4329_v32 = vcombine.low %v2918_v37, %v2926_v38 }
 0xa3e   : > { %3293 = vmatpush1.bf16.xpose.msra.mxu1 %v4311_v39  ;;  %3334 = vmatpush1.bf16.xpose.msra.mxu0 %v4313_v40  ;;  %v2919_v40 = vld [vmem:[%s6380_s7 + $0x90] sm:$0xff] }
 0xa3f   : > { %3294 = vmatprep.subr.bf16.mxu1 %v4328_v41  ;;  %3335 = vmatprep.subr.bf16.mxu0 %v4330_v42  ;;  %v2927_v41 = vld [vmem:[%s6380_s7 + $0xd0] sm:$0xff] }
 0xa40   : > { %v4332_v60 = vcombine.high %v2919_v40, %v2927_v41 }
 0xa46   : > { %3295 = vmatpush1.bf16.xpose.msra.mxu1 %v4327_v18  ;;  %3336 = vmatpush1.bf16.xpose.msra.mxu0 %v4329_v32  ;;  %v2928_v18 = vld [vmem:[%s6380_s7 + $0xd8] sm:$0xff] }
 0xa47   : > { %3296 = vmatprep.subr.bf16.mxu1 %v4344_v15  ;;  %3337 = vmatprep.subr.bf16.mxu0 %v4346_v23  ;;  %v4334_v27 = vcombine.high %v2920_v49, %v2928_v18 }
 0xa4e   : > { %3297 = vmatpush1.bf16.xpose.msra.mxu1 %v4343_v24  ;;  %3338 = vmatpush1.bf16.xpose.msra.mxu0 %v4345_v26  ;;  %v2124_v26 = vsub.s32 4, %v6521_v45 }
 0xa4f   : > { %3298 = vmatprep.subr.bf16.mxu1 %v4360_v21  ;;  %3339 = vmatprep.subr.bf16.mxu0 %v4362_v30  ;;  %v2129_v30 = vrot.slane %v2102_v4, %v2128_v28 }
 0xa50   : > { %v2125_v21 = vrot.slane %v2102_v4, %v2124_v26 }
 0xa56   : > { %3299 = vmatpush1.bf16.xpose.msra.mxu1 %v4359_v29  ;;  %3340 = vmatpush1.bf16.xpose.msra.mxu0 %v4361_v58  ;;  %v2136_v29 = vsub.s32 7, %v6521_v45  ;;  %v2935_v58 = vld [vmem:[%s6380_s7 + $0x110] sm:$0xff] }
 0xa57   : > { %3374 = vmatprep.subr.bf16.mxu1 %v4316_v62  ;;  %3415 = vmatprep.subr.bf16.mxu0 %v4318_v0  ;;  %v2944_v62 = vld [vmem:[%s6380_s7 + $0x158] sm:$0xff] }
 0xa58   : > { %v2137_v33 = vrot.slane %v2102_v4, %v2136_v29 }
 0xadb   : > { %v2543_v11 = vpop.f32.mrb[4].mxu1  ;;  %v2586_v12 = vpop.f32.mrb[12].mxu0 }
 0xadc   : > { %v2544_v13 = vadd.f32 %v2543_v11, %v2109_v6  ;;  %v2587_v16 = vadd.f32 %v2586_v12, %v2117_v7  ;;  %v2545_v17 = vpop.f32.mrb[5].mxu1  ;;  %v2588_v20 = vpop.f32.mrb[13].mxu0  ;;  %v4350_v11 = vcombine.high %v2936_v57, %v2944_v62 }
 0xadd   : > { %v2546_v25 = vadd.f32 %v2545_v17, %v2113_v8  ;;  %v2589_v36 = vadd.f32 %v2588_v20, %v2121_v9  ;;  %v2547_v47 = vpop.f32.mrb[6].mxu1  ;;  %v2590_v50 = vpop.f32.mrb[14].mxu0 }
 0xade   : > { %v2548_v14 = vadd.f32 %v2547_v47, %v2109_v6  ;;  %v2591_v19 = vadd.f32 %v2590_v50, %v2117_v7  ;;  %v2549_v10 = vpop.f32.mrb[7].mxu1  ;;  %v2592_v52 = vpop.f32.mrb[15].mxu0  ;;  %v2853_v61 = vmax.f32 %v2544_v13, 0.0  ;;  %v2855_v37 = vmax.f32 %v2587_v16, 0.0 }
 0xadf   : > { %v2550_v55 = vadd.f32 %v2549_v10, %v2113_v8  ;;  %v2593_v59 = vadd.f32 %v2592_v52, %v2121_v9  ;;  %v2854_v42 = vmax.f32 %v2546_v25, 0.0  ;;  %v2856_v43 = vmax.f32 %v2589_v36, 0.0 }
 0xae0   : > { %v2869_v38 = vmax.f32 %v2548_v14, 0.0  ;;  %v2871_v39 = vmax.f32 %v2591_v19, 0.0  ;;  %v4348_v9 = vcombine.high %v2935_v58, %v2943_v53 }
 0xae1   : > { %v2870_v46 = vmax.f32 %v2550_v55, 0.0  ;;  %v2872_v44 = vmax.f32 %v2593_v59, 0.0  ;;  %v2951_v55 = vld [vmem:[%s6380_s7 + $0x190] sm:$0xff] }
 0xae2   : > { %v2885_v32 = vpack.c.bf16 %v2869_v38, %v2853_v61  ;;  %v2887_v15 = vpack.c.bf16 %v2871_v39, %v2855_v37  ;;  %v2959_v59 = vld [vmem:[%s6380_s7 + $0x1d0] sm:$0xff] }
 0xae3   : > { %v2886_v23 = vpack.c.bf16 %v2870_v46, %v2854_v42  ;;  %v2888_v24 = vpack.c.bf16 %v2872_v44, %v2856_v43 }
 0xae5   : > { %3324 = vmatprep.mubr.bf16.mxu1 %v2886_v23  ;;  %3365 = vmatprep.mubr.bf16.mxu0 %v2888_v24  ;;  %v2141_v23 = vrot.slane %v6845_v56, %v6524_v48  ;;  %v2149_v24 = vrot.slane %v6845_v56, %v2116_v3  ;;  %v4363_v48 = vcombine.low %v2951_v55, %v2959_v59 }
 0xae6   : > { %3325 = vmatmul.mubr.bf16.vlgmr.msra.gmra.mrb[20].mxu1 %v2885_v32  ;;  %3366 = vmatmul.mubr.bf16.vlgmr.msra.gmra.mrb[28].mxu0 %v2887_v15  ;;  %v4364_v32 = vcombine.high %v2951_v55, %v2959_v59  ;;  %v2922_v55 = vld [vmem:[%s6380_s7 + $0xa8] sm:$0xff] }
 0xae7   : > { %3375 = vmatpush1.bf16.xpose.msra.mxu1 %v4315_v34  ;;  %3416 = vmatpush1.bf16.xpose.msra.mxu0 %v4317_v63  ;;  %v4331_v34 = vcombine.low %v2919_v40, %v2927_v41  ;;  %v4333_v63 = vcombine.low %v2920_v49, %v2928_v18  ;;  %v2952_v40 = vld [vmem:[%s6380_s7 + $0x198] sm:$0xff]  ;;  %v4347_v49 = vcombine.low %v2935_v58, %v2943_v53  ;;  %v2906_v58 = vld [vmem:[%s6380_s7 + $0x28] sm:$0xff] }
 0xae8   : > { %3376 = vmatprep.subr.bf16.mxu1 %v4332_v60  ;;  %3417 = vmatprep.subr.bf16.mxu0 %v4334_v27  ;;  %v2960_v41 = vld [vmem:[%s6380_s7 + $0x1d8] sm:$0xff]  ;;  %v4349_v18 = vcombine.low %v2936_v57, %v2944_v62  ;;  %v2905_v60 = vld [vmem:[%s6380_s7 + $0x20] sm:$0xff]  ;;  %v2145_v27 = vrot.slane %v6845_v56, %v6528_v51  ;;  %v2930_v59 = vld [vmem:[%s6380_s7 + $0xe8] sm:$0xff] }
 0xae9   : > { %v4366_v15 = vcombine.high %v2952_v40, %v2960_v41  ;;  %v4365_v57 = vcombine.low %v2952_v40, %v2960_v41  ;;  %v4338_v41 = vcombine.high %v2922_v55, %v2930_v59 }
 0xaeb   : > { %v2629_v35 = vpop.f32.mrb[8].mxu1  ;;  %v2672_v0 = vpop.f32.mrb[16].mxu0 }
 0xaec   : > { %v2630_v6 = vadd.f32 %v2629_v35, %v2125_v21  ;;  %v2673_v7 = vadd.f32 %v2672_v0, %v2133_v22  ;;  %v2631_v8 = vpop.f32.mrb[9].mxu1  ;;  %v2674_v1 = vpop.f32.mrb[17].mxu0 }
 0xaed   : > { %v2632_v12 = vadd.f32 %v2631_v8, %v2129_v30  ;;  %v2675_v13 = vadd.f32 %v2674_v1, %v2137_v33  ;;  %v2633_v16 = vpop.f32.mrb[10].mxu1  ;;  %v2676_v17 = vpop.f32.mrb[18].mxu0 }
 0xaee   : > { %v2634_v4 = vadd.f32 %v2633_v16, %v2125_v21  ;;  %v2677_v20 = vadd.f32 %v2676_v17, %v2133_v22  ;;  %v2635_v25 = vpop.f32.mrb[11].mxu1  ;;  %v2678_v36 = vpop.f32.mrb[19].mxu0  ;;  %v2857_v14 = vmax.f32 %v2630_v6, 0.0  ;;  %v2859_v19 = vmax.f32 %v2673_v7, 0.0  ;;  %v2913_v22 = vld [vmem:[%s6380_s7 + $0x60] sm:$0xff] }
 0xaef   : > { %v2636_v47 = vadd.f32 %v2635_v25, %v2129_v30  ;;  %v2679_v50 = vadd.f32 %v2678_v36, %v2137_v33  ;;  %3377 = vmatpush1.bf16.xpose.msra.mxu1 %v4331_v34  ;;  %3418 = vmatpush1.bf16.xpose.msra.mxu0 %v4333_v63  ;;  %v2858_v61 = vmax.f32 %v2632_v12, 0.0  ;;  %v2860_v37 = vmax.f32 %v2675_v13, 0.0  ;;  %v2914_v30 = vld [vmem:[%s6380_s7 + $0x68] sm:$0xff] }
 0xaf0   : > { %v2873_v10 = vmax.f32 %v2634_v4, 0.0  ;;  %v2875_v52 = vmax.f32 %v2677_v20, 0.0  ;;  %3378 = vmatprep.subr.bf16.mxu1 %v4348_v9  ;;  %3419 = vmatprep.subr.bf16.mxu0 %v4350_v11  ;;  %v2153_v21 = vrot.slane %v6845_v56, %v2120_v5  ;;  %v4320_v34 = vcombine.high %v2905_v60, %v2913_v22 }
 0xaf1   : > { %v2874_v38 = vmax.f32 %v2636_v47, 0.0  ;;  %v2876_v39 = vmax.f32 %v2679_v50, 0.0  ;;  %v4322_v63 = vcombine.high %v2906_v58, %v2914_v30 }
 0xaf2   : > { %v6880_v42 = vpack.c.bf16 %v2873_v10, %v2857_v14  ;;  %v6882_v43 = vpack.c.bf16 %v2875_v52, %v2859_v19  ;;  %v2921_v14 = vld [vmem:[%s6380_s7 + $0xa0] sm:$0xff] }
 0xaf3   : > { %v2890_v46 = vpack.c.bf16 %v2874_v38, %v2858_v61  ;;  %v2892_v44 = vpack.c.bf16 %v2876_v39, %v2860_v37  ;;  %v2929_v52 = vld [vmem:[%s6380_s7 + $0xe0] sm:$0xff]  ;;  %v4319_v38 = vcombine.low %v2905_v60, %v2913_v22  ;;  %v4321_v39 = vcombine.low %v2906_v58, %v2914_v30 }
 0xaf4   : > { %v4336_v40 = vcombine.high %v2921_v14, %v2929_v52  ;;  %v4337_v22 = vcombine.low %v2922_v55, %v2930_v59 }
 0xaf5   : > { %3406 = vmatprep.mubr.bf16.mxu1 %v2890_v46  ;;  %3447 = vmatprep.mubr.bf16.mxu0 %v2892_v44  ;;  %v2157_v46 = vrot.slane %v6845_v56, %v2124_v26  ;;  %v2161_v44 = vrot.slane %v6845_v56, %v2128_v28 }
 0xaf7   : > { %3379 = vmatpush1.bf16.xpose.msra.mxu1 %v4347_v49  ;;  %3420 = vmatpush1.bf16.xpose.msra.mxu0 %v4349_v18  ;;  %v2169_v49 = vrot.slane %v6845_v56, %v2136_v29  ;;  %v2938_v18 = vld [vmem:[%s6380_s7 + $0x128] sm:$0xff] }
 0xaf8   : > { %3380 = vmatprep.subr.bf16.mxu1 %v4364_v32  ;;  %3421 = vmatprep.subr.bf16.mxu0 %v4366_v15  ;;  %v2946_v32 = vld [vmem:[%s6380_s7 + $0x168] sm:$0xff] }
 0xaf9   : > { %v4354_v29 = vcombine.high %v2938_v18, %v2946_v32 }
 0xafb   : > { %v2715_v33 = vpop.f32.mrb[12].mxu1  ;;  %v2758_v53 = vpop.f32.mrb[20].mxu0 }
 0xafc   : > { %v2716_v62 = vadd.f32 %v2715_v33, %v2141_v23  ;;  %v2759_v35 = vadd.f32 %v2758_v53, %v2149_v24  ;;  %v2717_v3 = vpop.f32.mrb[13].mxu1  ;;  %v2760_v0 = vpop.f32.mrb[21].mxu0 }
 0xafd   : > { %v2718_v6 = vadd.f32 %v2717_v3, %v2145_v27  ;;  %v2761_v7 = vadd.f32 %v2760_v0, %v2153_v21  ;;  %v2719_v51 = vpop.f32.mrb[14].mxu1  ;;  %v2762_v8 = vpop.f32.mrb[22].mxu0 }
 0xafe   : > { %v2720_v1 = vadd.f32 %v2719_v51, %v2141_v23  ;;  %v2763_v9 = vadd.f32 %v2762_v8, %v2149_v24  ;;  %v2721_v5 = vpop.f32.mrb[15].mxu1  ;;  %v2764_v11 = vpop.f32.mrb[23].mxu0  ;;  %v2861_v16 = vmax.f32 %v2716_v62, 0.0  ;;  %v2863_v17 = vmax.f32 %v2759_v35, 0.0 }
 0xaff   : > { %v2722_v12 = vadd.f32 %v2721_v5, %v2145_v27  ;;  %v2765_v13 = vadd.f32 %v2764_v11, %v2153_v21  ;;  %3381 = vmatpush1.bf16.xpose.msra.mxu1 %v4363_v48  ;;  %3422 = vmatpush1.bf16.xpose.msra.mxu0 %v4365_v57  ;;  %v2862_v25 = vmax.f32 %v2718_v6, 0.0  ;;  %v2864_v36 = vmax.f32 %v2761_v7, 0.0  ;;  %v2954_v11 = vld [vmem:[%s6380_s7 + $0x1a8] sm:$0xff] }
 0xb00   : > { %v2877_v4 = vmax.f32 %v2720_v1, 0.0  ;;  %v2879_v20 = vmax.f32 %v2763_v9, 0.0  ;;  %3456 = vmatprep.subr.bf16.mxu1 %v4320_v34  ;;  %3497 = vmatprep.subr.bf16.mxu0 %v4322_v63  ;;  %v4335_v24 = vcombine.low %v2921_v14, %v2929_v52  ;;  %v2961_v1 = vld [vmem:[%s6380_s7 + $0x1e0] sm:$0xff]  ;;  %v2916_v14 = vld [vmem:[%s6380_s7 + $0x78] sm:$0xff] }
 0xb01   : > { %v2878_v47 = vmax.f32 %v2722_v12, 0.0  ;;  %v2880_v50 = vmax.f32 %v2765_v13, 0.0  ;;  %v2962_v12 = vld [vmem:[%s6380_s7 + $0x1e8] sm:$0xff] }
 0xb02   : > { %v6899_v19 = vpack.c.bf16 %v2877_v4, %v2861_v16  ;;  %v6901_v10 = vpack.c.bf16 %v2879_v20, %v2863_v17  ;;  %v4353_v4 = vcombine.low %v2938_v18, %v2946_v32  ;;  %v4369_v55 = vcombine.low %v2954_v11, %v2962_v12  ;;  %v2940_v18 = vld [vmem:[%s6380_s7 + $0x138] sm:$0xff] }
 0xb03   : > { %v2894_v61 = vpack.c.bf16 %v2878_v47, %v2862_v25  ;;  %v2896_v37 = vpack.c.bf16 %v2880_v50, %v2864_v36  ;;  %v4370_v25 = vcombine.high %v2954_v11, %v2962_v12  ;;  %v2907_v36 = vld [vmem:[%s6380_s7 + $0x30] sm:$0xff]  ;;  %v2908_v50 = vld [vmem:[%s6380_s7 + $0x38] sm:$0xff] }
 0xb04   : > { %v2915_v47 = vld [vmem:[%s6380_s7 + $0x70] sm:$0xff]  ;;  %v2948_v32 = vld [vmem:[%s6380_s7 + $0x178] sm:$0xff] }
 0xb05   : > { %v4324_v59 = vcombine.high %v2907_v36, %v2915_v47 }
 0xb06   : > { %3407 = vmatmul.mubr.bf16.vlgmr.msra.gmra.mrb[24].mxu1 %v6880_v42  ;;  %3448 = vmatmul.mubr.bf16.vlgmr.msra.gmra.mrb[32].mxu0 %v6882_v43  ;;  %v2937_v42 = vld [vmem:[%s6380_s7 + $0x120] sm:$0xff] }
 0xb07   : > { %3457 = vmatpush1.bf16.xpose.msra.mxu1 %v4319_v38  ;;  %3488 = vmatprep.mubr.bf16.mxu1 %v2894_v61  ;;  %v2945_v43 = vld [vmem:[%s6380_s7 + $0x160] sm:$0xff]  ;;  %v4326_v61 = vcombine.high %v2908_v50, %v2916_v14  ;;  %v2931_v38 = vld [vmem:[%s6380_s7 + $0xf0] sm:$0xff] }
 0xb08   : > { %3498 = vmatpush1.bf16.xpose.msra.mxu0 %v4321_v39  ;;  %3529 = vmatprep.mubr.bf16.mxu0 %v2896_v37  ;;  %v4352_v28 = vcombine.high %v2937_v42, %v2945_v43  ;;  %v4351_v17 = vcombine.low %v2937_v42, %v2945_v43  ;;  %v2923_v37 = vld [vmem:[%s6380_s7 + $0xb0] sm:$0xff]  ;;  %v4323_v39 = vcombine.low %v2907_v36, %v2915_v47 }
 0xb09   : > { %3458 = vmatprep.subr.bf16.mxu1 %v4336_v40  ;;  %3499 = vmatprep.subr.bf16.mxu0 %v4338_v41  ;;  %v2924_v40 = vld [vmem:[%s6380_s7 + $0xb8] sm:$0xff]  ;;  %v2939_v42 = vld [vmem:[%s6380_s7 + $0x130] sm:$0xff] }
 0xb0a   : > { %v2932_v41 = vld [vmem:[%s6380_s7 + $0xf8] sm:$0xff]  ;;  %v2947_v43 = vld [vmem:[%s6380_s7 + $0x170] sm:$0xff] }
 0xb0b   : > { %v2801_v15 = vpop.f32.mrb[16].mxu1  ;;  %v2844_v23 = vpop.f32.mrb[24].mxu0 }
 0xb0c   : > { %v2802_v60 = vadd.f32 %v2801_v15, %v2157_v46  ;;  %v2845_v26 = vadd.f32 %v2844_v23, %v6848_v2  ;;  %v2803_v27 = vpop.f32.mrb[17].mxu1  ;;  %v2846_v21 = vpop.f32.mrb[25].mxu0  ;;  %v4339_v15 = vcombine.low %v2923_v37, %v2931_v38  ;;  %v4341_v23 = vcombine.low %v2924_v40, %v2932_v41 }
 0xb0d   : > { %v2804_v58 = vadd.f32 %v2803_v27, %v2161_v44  ;;  %v2847_v45 = vadd.f32 %v2846_v21, %v2169_v49  ;;  %v2805_v30 = vpop.f32.mrb[18].mxu1  ;;  %v2848_v56 = vpop.f32.mrb[26].mxu0  ;;  %v2964_v27 = vld [vmem:[%s6380_s7 + $0x1f8] sm:$0xff]  ;;  %v4355_v21 = vcombine.low %v2939_v42, %v2947_v43 }
 0xb0e   : > { %v2806_v33 = vadd.f32 %v2805_v30, %v2157_v46  ;;  %v2849_v53 = vadd.f32 %v2848_v56, %v6848_v2  ;;  %v2807_v48 = vpop.f32.mrb[19].mxu1  ;;  %v2850_v57 = vpop.f32.mrb[27].mxu0  ;;  %v2865_v3 = vmax.f32 %v2802_v60, 0.0  ;;  %v2867_v0 = vmax.f32 %v2845_v26, 0.0  ;;  %v2953_v2 = vld [vmem:[%s6380_s7 + $0x1a0] sm:$0xff]  ;;  %v2963_v60 = vld [vmem:[%s6380_s7 + $0x1f0] sm:$0xff] }
 0xb0f   : > { %v2808_v62 = vadd.f32 %v2807_v48, %v2161_v44  ;;  %v2851_v35 = vadd.f32 %v2850_v57, %v2169_v49  ;;  %3459 = vmatpush1.bf16.xpose.msra.mxu1 %v4335_v24  ;;  %v2866_v6 = vmax.f32 %v2804_v58, 0.0  ;;  %v2868_v7 = vmax.f32 %v2847_v45, 0.0  ;;  %v2956_v26 = vld [vmem:[%s6380_s7 + $0x1b8] sm:$0xff]  ;;  %v4310_v56 = vld [vmem:[%s7182_s30] ss:$0 sm:$0xff] }
 0xb10   : > { %v2881_v34 = vmax.f32 %v2806_v33, 0.0  ;;  %v2883_v63 = vmax.f32 %v2849_v53, 0.0  ;;  %3500 = vmatpush1.bf16.xpose.msra.mxu0 %v4337_v22  ;;  %3460 = vmatprep.subr.bf16.mxu1 %v4352_v28  ;;  %v4368_v20 = vcombine.high %v2953_v2, %v2961_v1  ;;  %v4367_v52 = vcombine.low %v2953_v2, %v2961_v1 }
 0xb11   : > { %v2882_v51 = vmax.f32 %v2808_v62, 0.0  ;;  %v2884_v8 = vmax.f32 %v2851_v35, 0.0  ;;  %3501 = vmatprep.subr.bf16.mxu0 %v4354_v29  ;;  %v4325_v46 = vcombine.low %v2908_v50, %v2916_v14  ;;  %v4340_v44 = vcombine.high %v2923_v37, %v2931_v38 }
 0xb12   : > { %v6925_v9 = vpack.c.bf16 %v2881_v34, %v2865_v3  ;;  %v6927_v5 = vpack.c.bf16 %v2883_v63, %v2867_v0  ;;  %v4342_v49 = vcombine.high %v2924_v40, %v2932_v41  ;;  %v4358_v24 = vcombine.high %v2940_v18, %v2948_v32 }
 0xb13   : > { %v2898_v13 = vpack.c.bf16 %v2882_v51, %v2866_v6  ;;  %v2900_v16 = vpack.c.bf16 %v2884_v8, %v2868_v7  ;;  %v4357_v22 = vcombine.low %v2940_v18, %v2948_v32  ;;  %v4374_v58 = vcombine.high %v2956_v26, %v2964_v27 }
 0xb14   : > { %v4373_v30 = vcombine.low %v2956_v26, %v2964_v27 }
 0xb17   : > { %3461 = vmatpush1.bf16.xpose.msra.mxu1 %v4351_v17 }
 0xb18   : > { %3502 = vmatpush1.bf16.xpose.msra.mxu0 %v4353_v4  ;;  %3462 = vmatprep.subr.bf16.mxu1 %v4368_v20 }
 0xb19   : > { %3503 = vmatprep.subr.bf16.mxu0 %v4370_v25 }
 0xb1f   : > { %3463 = vmatpush1.bf16.xpose.msra.mxu1 %v4367_v52 }
 0xb20   : > { %3504 = vmatpush1.bf16.xpose.msra.mxu0 %v4369_v55  ;;  %3538 = vmatprep.subr.bf16.mxu1 %v4324_v59 }
 0xb21   : > { %3579 = vmatprep.subr.bf16.mxu0 %v4326_v61 }
 0xb26   : > { %3489 = vmatmul.mubr.bf16.vlgmr.msra.gmra.mrb[28].mxu1 %v6899_v19  ;;  %v4356_v19 = vcombine.high %v2939_v42, %v2947_v43 }
 0xb27   : > { %3530 = vmatmul.mubr.bf16.vlgmr.msra.gmra.mrb[36].mxu0 %v6901_v10  ;;  %3539 = vmatpush1.bf16.xpose.msra.mxu1 %v4323_v39  ;;  %v2955_v10 = vld [vmem:[%s6380_s7 + $0x1b0] sm:$0xff]  ;;  %s7184_s7 = scalar_lea.vmem [#allocation25], %s6356_s29 }
 0xb28   : > { %3570 = vmatprep.mubr.bf16.mxu1 %v2898_v13  ;;  %3580 = vmatpush1.bf16.xpose.msra.mxu0 %v4325_v46  ;;  %v4372_v28 = vcombine.high %v2955_v10, %v2963_v60  ;;  %v4371_v45 = vcombine.low %v2955_v10, %v2963_v60 }
 0xb29   : > { %3611 = vmatprep.mubr.bf16.mxu0 %v2900_v16  ;;  %3540 = vmatprep.subr.bf16.mxu1 %v4340_v44 }
 0xb2a   : > { %3581 = vmatprep.subr.bf16.mxu0 %v4342_v49 }
 0xb2f   : > { %3541 = vmatpush1.bf16.xpose.msra.mxu1 %v4339_v15 }
 0xb30   : > { %3582 = vmatpush1.bf16.xpose.msra.mxu0 %v4341_v23  ;;  %3542 = vmatprep.subr.bf16.mxu1 %v4356_v19 }
 0xb31   : > { %3583 = vmatprep.subr.bf16.mxu0 %v4358_v24 }
 0xb37   : > { %3543 = vmatpush1.bf16.xpose.msra.mxu1 %v4355_v21 }
 0xb38   : > { %3584 = vmatpush1.bf16.xpose.msra.mxu0 %v4357_v22  ;;  %3544 = vmatprep.subr.bf16.mxu1 %v4372_v28 }
 0xb39   : > { %3585 = vmatprep.subr.bf16.mxu0 %v4374_v58 }
 0xb3f   : > { %3545 = vmatpush1.bf16.xpose.msra.mxu1 %v4371_v45 }
 0xb40   : > { %3586 = vmatpush1.bf16.xpose.msra.mxu0 %v4373_v30 }
 0xb46   : > { %3571 = vmatmul.mubr.bf16.vlgmr.msra.gmra.mrb[32].mxu1 %v6925_v9 }
 0xb47   : > { %3612 = vmatmul.mubr.bf16.vlgmr.msra.gmra.mrb[40].mxu0 %v6927_v5 }
 0xbb9   : > { %v3326_v29 = vpop.f32.mrb[20].mxu1  ;;  %v3367_v33 = vpop.f32.mrb[28].mxu0 }
 0xbba   : > { %v3327_v53 = vadd.f32 %v4310_v56, %v3326_v29  ;;  %v3328_v48 = vpop.f32.mrb[21].mxu1  ;;  %v3369_v57 = vpop.f32.mrb[29].mxu0 }
 0xbbb   : > { %v3329_v62 = vpop.f32.mrb[22].mxu1  ;;  %v3370_v35 = vpop.f32.mrb[30].mxu0 }
 0xbbc   : > { %v3368_v3 = vadd.f32 %v3367_v33, %v3327_v53  ;;  %v3330_v0 = vadd.f32 %v4310_v56, %v3329_v62  ;;  %v3331_v34 = vpop.f32.mrb[23].mxu1  ;;  %v3372_v63 = vpop.f32.mrb[31].mxu0  ;;  %v4375_v62 = vld [vmem:[%s7183_s23] ss:$0 sm:$0xff] }
 0xbbe   : > { %v3371_v6 = vadd.f32 %v3370_v35, %v3330_v0  ;;  %v4376_v0 = vld [vmem:[%s7184_s7] ss:$0 sm:$0xff] }
 0xbd9   : > { %v3408_v7 = vpop.f32.mrb[24].mxu1  ;;  %v3449_v51 = vpop.f32.mrb[32].mxu0 }
 0xbda   : > { %v3409_v8 = vadd.f32 %v3408_v7, %v3368_v3  ;;  %v3410_v2 = vpop.f32.mrb[25].mxu1  ;;  %v3451_v1 = vpop.f32.mrb[33].mxu0 }
 0xbdb   : > { %v3411_v9 = vpop.f32.mrb[26].mxu1  ;;  %v3452_v5 = vpop.f32.mrb[34].mxu0  ;;  %v3747_v2 = vld [vmem:[%s7186_s8] sm:$0xff] (!%p4377_p8)  ;;  %v5670_v1 = vmov (!%p4377_p8), 0.0|0.0  }
 0xbdc   : > { %v3450_v11 = vadd.f32 %v3449_v51, %v3409_v8  ;;  %v3412_v12 = vadd.f32 %v3411_v9, %v3371_v6  ;;  %v3413_v13 = vpop.f32.mrb[27].mxu1  ;;  %v3454_v16 = vpop.f32.mrb[35].mxu0  ;;  %4780 = vmatprep.subr.bf16.mxu0 (!%p4377_p8), %v5670_v1  ;;  %v5672_v9 = vmov (!%p4377_p8), 0.0   ;;  %4783 = vmatprep.subr.bf16.mxu1 (!%p4377_p8), %v5670_v1 }
 0xbdd   : > { %4630 = vmatprep.mubr.msk.f32.mxu0 (!%p4377_p8), %vm5671_vm6, %v5672_v9  ;;  %v3672_v13 = vld [vmem:[#allocation12] sm:$0x3] (!%p4377_p8)  ;;  %4649 = vmatprep.mubr.msk.f32.mxu1 (!%p4377_p8), %vm5671_vm6, %v5672_v9 }
 0xbde   : > { %v3453_v17 = vadd.f32 %v3452_v5, %v3412_v12  ;;  %v3748_v5 = vld [vmem:[%s7186_s8 + $0x8] sm:$0xff] (!%p4377_p8)  ;;  %v3750_v12 = vld [vmem:[%s7186_s8 + $0x18] sm:$0xff] (!%p4377_p8) }
 0xbdf   : > { %v4784_v16 = vpack.c.bf16 (!%p4377_p8), %v3748_v5, %v3747_v2 }
 0xbe1   : > { %4785 = vmatpush3.bf16.msra.mxu1 (!%p4377_p8), %v4784_v16 }
 0xbe2   : > { %4786 = vmatprep.subr.bf16.mxu1 (!%p4377_p8), %v5670_v1 }
 0xbf9   : > { %v3490_v4 = vpop.f32.mrb[28].mxu1 }
 0xbfa   : > { %v3491_v20 = vadd.f32 %v3490_v4, %v3450_v11  ;;  %v3531_v25 = vpop.f32.mrb[36].mxu0  ;;  %v3492_v36 = vpop.f32.mrb[29].mxu1  ;;  %v3749_v11 = vld [vmem:[%s7186_s8 + $0x10] sm:$0xff] (!%p4377_p8)  ;;  %v3751_v4 = vld [vmem:[%s7186_s8 + $0x20] sm:$0xff] (!%p4377_p8) }
 0xbfb   : > { %v3533_v47 = vpop.f32.mrb[37].mxu0  ;;  %v3493_v50 = vpop.f32.mrb[30].mxu1  ;;  %v3753_v36 = vld [vmem:[%s7186_s8 + $0x30] sm:$0xff] (!%p4377_p8) }
 0xbfc   : > { %v3532_v14 = vadd.f32 %v3531_v25, %v3491_v20  ;;  %v3494_v52 = vadd.f32 %v3493_v50, %v3453_v17  ;;  %v3534_v55 = vpop.f32.mrb[38].mxu0  ;;  %v3495_v59 = vpop.f32.mrb[31].mxu1  ;;  %v4787_v17 = vpack.c.bf16 (!%p4377_p8), %v3750_v12, %v3749_v11  ;;  %v3752_v20 = vld [vmem:[%s7186_s8 + $0x28] sm:$0xff] (!%p4377_p8)  ;;  %v3754_v47 = vld [vmem:[%s7186_s8 + $0x38] sm:$0xff] (!%p4377_p8) }
 0xbfd   : > { %v3536_v61 = vpop.f32.mrb[39].mxu0  ;;  %v4790_v25 = vpack.c.bf16 (!%p4377_p8), %v3752_v20, %v3751_v4  ;;  %v4793_v50 = vpack.c.bf16 (!%p4377_p8), %v3754_v47, %v3753_v36 }
 0xbfe   : > { %v3535_v37 = vadd.f32 %v3534_v55, %v3494_v52  ;;  %4788 = vmatpush3.bf16.msra.mxu1 (!%p4377_p8), %v4787_v17  ;;  %v4379_v55 = vld [vmem:[#allocation8] ss:$0 sm:$0xff] (!%p4377_p8) }
 0xbff   : > { %4789 = vmatprep.subr.bf16.mxu1 (!%p4377_p8), %v5670_v1 }
 0xc02   : > { %4791 = vmatpush3.bf16.msra.mxu1 (!%p4377_p8), %v4790_v25 }
 0xc03   : > { %4792 = vmatprep.subr.bf16.mxu1 (!%p4377_p8), %v5670_v1 }
 0xc06   : > { %4794 = vmatpush3.bf16.msra.mxu1 (!%p4377_p8), %v4793_v50 }
 0xc19   : > { %v3572_v38 = vpop.f32.mrb[32].mxu1 }
 0xc1a   : > { %v3573_v39 = vadd.f32 %v3572_v38, %v3532_v14  ;;  %v3613_v40 = vpop.f32.mrb[40].mxu0  ;;  %v3574_v41 = vpop.f32.mrb[33].mxu1 }
 0xc1b   : > { %v3615_v46 = vpop.f32.mrb[41].mxu0  ;;  %v3575_v44 = vpop.f32.mrb[34].mxu1 }
 0xc1c   : > { %v3614_v49 = vadd.f32 %v3613_v40, %v3573_v39  ;;  %v3576_v42 = vadd.f32 %v3575_v44, %v3535_v37  ;;  %v3616_v43 = vpop.f32.mrb[42].mxu0  ;;  %v3577_v18 = vpop.f32.mrb[35].mxu1 }
 0xc1d   : > { %v3618_v32 = vpop.f32.mrb[43].mxu0 }
 0xc1e   : > { %v3617_v15 = vadd.f32 %v3616_v43, %v3576_v42  ;;  %v3620_v23 = vadd.f32 %v3614_v49, %v6741_v31 }
 0xc20   : > { %v3624_v19 = vsel %vm1299_vm3, %v3620_v23, 0.0  ;;  %v3621_v24 = vadd.f32 %v3617_v15, %v6743_v54 }
 0xc21   : > { %3625 = vadd.xlane.f32.xlu1 %v3624_v19 }
 0xc22   : > { %v3627_v10 = vsel %vm1299_vm3, %v3621_v24, 0.0 }
 0xc23   : > { %3628 = vadd.xlane.f32.xlu0 %v3627_v10 }
 0xcae   : > { %v3626_v60 = vpop.xlane.xlu1 %3625 }
 0xcaf   : > { %v3630_v26 = vmul.f32 0.015625, %v3626_v60 }
 0xcb0   : > { %v3629_v27 = vpop.xlane.xlu0 %3628 }
 0xcb1   : > { %v3632_v21 = vsub.f32 %v3620_v23, %v3630_v26  ;;  %v3631_v22 = vmul.f32 0.015625, %v3629_v27 }
 0xcb3   : > { %v3633_v28 = vsub.f32 %v3621_v24, %v3631_v22  ;;  %v3634_v58 = vmul.f32 %v3632_v21, %v3632_v21 }
 0xcb5   : > { %v3636_v45 = vsel %vm1299_vm3, %v3634_v58, 0.0  ;;  %v3635_v30 = vmul.f32 %v3633_v28, %v3633_v28 }
 0xcb6   : > { %3637 = vadd.xlane.f32.xlu1 %v3636_v45 }
 0xcb7   : > { %v3639_v31 = vsel %vm1299_vm3, %v3635_v30, 0.0 }
 0xcb8   : > { %3640 = vadd.xlane.f32.xlu0 %v3639_v31 }
 0xd43   : > { %v3638_v54 = vpop.xlane.xlu1 %3637 }
 0xd44   : > { %v3642_v56 = vmul.f32 0.015625, %v3638_v54 }
 0xd45   : > { %v3641_v29 = vpop.xlane.xlu0 %3640 }
 0xd46   : > { %v3644_v33 = vadd.f32 1e-05, %v3642_v56  ;;  %v3643_v53 = vmul.f32 0.015625, %v3641_v29 }
 0xd48   : > { %5031 = vrsqrt.f32 %v3644_v33  ;;  %v3645_v48 = vadd.f32 1e-05, %v3643_v53 }
 0xd4a   : > { %5033 = vrsqrt.f32 %v3645_v48 }
 0xd52   : > { %v5032_v57 = vpop.eup %5031 }
 0xd53   : > { %v3648_v35 = vmul.f32 %v5032_v57, %v3632_v21 }
 0xd54   : > { %v5034_v3 = vpop.eup %5033 }
 0xd55   : > { %v3656_v34 = vmul.f32 %v4375_v62, %v3648_v35  ;;  %v3649_v63 = vmul.f32 %v5034_v3, %v3633_v28  ;;  %3671 = sbr.rel (%p4377_p8) target bundleno = 3851 (0xf0b), region = 188 }
 0xd57   : > { %v3664_v6 = vadd.f32 %v4376_v0, %v3656_v34  ;;  %v3657_v7 = vmul.f32 %v4375_v62, %v3649_v63 }
 0xd59   : > { %3666 = vst.msk [vmem:[#allocation2] sm:$0xff] %vm1299_vm3, %v3664_v6  ;;  %v3665_v51 = vadd.f32 %v4376_v0, %v3657_v7 }
 0xd5b   : > { %3667 = vst.msk [vmem:[#allocation2 + $0x8] sm:$0xff] %vm1299_vm3, %v3665_v51  ;;  %v4781_v8 = vpack.c.bf16 (!%p4377_p8), %v3665_v51, %v3664_v6 }
 0xd5d   : > { %4782 = vmatpush3.bf16.msra.mxu0 %v4781_v8 }
 0xd60   : > { %4631 = vmatmul.mubr.msk.f32.vlgmr.msra.gmra.mrb[0].mxu0 %vm3673_vm7, %v3672_v13 }
 0xe33   : > { %v3743_v14 = vpop.f32.mrb[0].mxu0 }
 0xe34   : > { %v4632_v52 = vpop.f32.mrb[1].mxu0  ;;  %4650 = vmatmul.mubr.msk.f32.vlgmr.msra.gmra.mrb[0].mxu1 %vm1299_vm3, %v3743_v14 }
 0xf07   : > { %v3831_v59 = vpop.f32.mrb[0].mxu1 }
 0xf08   : > { %v3832_v61 = vadd.f32 %v4379_v55, %v3831_v59  ;;  %v4651_v37 = vpop.f32.mrb[1].mxu1 }
 0xf0a   : > { %3836 = vst.msk [vmem:[#allocation26] sm:$0x3] %vm3835_vm8, %v3832_v61 }
 0xf0b PF: > { %s7187_s9 = sld [smem:[#allocation35_spill]]  ;;  %s5673_s29 = smov [#allocation26]  }
 0xf0c   : > { %s3844_s28 = sshll.u32 %s5673_s29, 4  ;;  %s3845_s28 = int_to_ptr.vmem [resolvable:$true] %s3844_s28 }
 0xf0d   : > { %s5563_s0 = scalar_lea.vmem %s3845_s28, 32  ;;  %p5570_p3 = scmp.lt.s32.totalorder %s3845_s28, %s3845_s28 }
 0xf0e   : > { %p5564_p13 = scmp.ne.s32.totalorder %s3845_s28, %s5563_s0  ;;  %p5571_p4 = scmp.lt.s32.totalorder %s5563_s0, %s5563_s0 }
 0xf10   : > { %p5572_p7 = por %p5571_p4, %p5570_p3 }
 0xf11   : > { %p4916_p10 = scmp.eq.s32.totalorder %s7187_s9, 5 }
 0xf13   : > { %p5565_p0 = pnand %p5564_p13, %p4916_p10 }
 0xf15   : > { %p5566_p2 = pneg %p5565_p0 }
 0xf17   : > { %p5573_p5 = pnand %p5572_p7, %p5566_p2 }
 0xf19   : > { %5576 = shalt.err (!%p5573_p5)
}
 0xf1a   : > { %s7188_s26 = sld [smem:[#allocation55_spill]] }
 0xf20   : > { %s5577_s22 = scalar_lea.hbm %s7188_s26, 32 }
 0xf21   : > { %p5578_p9 = scmp.ne.s32.totalorder %s7188_s26, %s5577_s22  ;;  %p5583_p6 = scmp.lt.u32.totalorder %s5577_s22, %s7188_s26 }
 0xf23   : > { %p5579_p1 = pnand %p5578_p9, %p4916_p10 }
 0xf25   : > { %p5580_p11 = pneg %p5579_p1 }
 0xf27   : > { %p5585_p12 = pnand %p5583_p6, %p5580_p11 }
 0xf29   : > { %5588 = shalt.err (!%p5585_p12)
}
 0xf2a   : > { %4844 = dma.vmem_to_hbm [thread:$0]  (%p4916_p10), %s3845_s28, 32, %s7188_s26, [#allocation5]  }
 0xf2b   : > { %5626 = dma.done.wait (%p4916_p10), [#allocation5], 32  }
 0xf2c   : > { %5628 = vsyncadd (%p4916_p10), [#allocation5], 4294967264 }
 0xf2d PF: > { %s7189_s30 = sld [smem:[#allocation36_spill]]  ;;  %s7190_s3 = sld [smem:[#allocation33_spill]] }
 0xf2e   : > { %s7191_s28 = sld [smem:[#allocation34_spill]]  ;;  %s7192_s29 = sld [smem:[#allocation37_spill]] }
 0xf33   : > { %p34_p8 = scmp.ge.s32.totalorder %s7189_s30, 8  }
 0xf35   :  { %36 = sbr.rel (!%p34_p8) target bundleno = 22 (0x16), region = 297 }
 0xf3c   :  { %3857 = vsyncpa [#allocation4], 1 }
 0xf3d   :  { %3859 = vsyncpa [#allocation4 + $0x1], 1 }
 0xf3e   :  { %3860 = vsyncpa [#allocation7], 1 }
 0xf3f   :  { %3861 = vsyncpa [#allocation10], 1 }
 0xf40   :  { %3862 = vsyncpa [#allocation13], 1 }
 0xf41   :  { %3863 = vsyncpa [#allocation5], 1 }
 0xf42   :  { %3865 = vsyncpa [#allocation5 + $0x1], 1 }

</bundles_post_ra>
